<compile_context>
chip_gen: v5e
topology: v5e:2x2
jax: 0.10.0
libtpu: 0.0.40
codegen_flags: <defaults>
</compile_context>

<pallas_src>
import math
from functools import partial

import jax
import jax.numpy as jnp
from jax import lax
from jax.experimental import pallas as pl
from jax.experimental.pallas import tpu as pltpu


def _layernorm(x, g, b, eps=1e-5):
    mu = jnp.mean(x, axis=-1, keepdims=True)
    var = jnp.mean((x - mu) ** 2, axis=-1, keepdims=True)
    return (x - mu) * lax.rsqrt(var + eps) * g + b


# ----------------------------- CLIPLayer kernel -----------------------------
def clip_layer_kernel(x_ref, mask_ref, g1_ref, be1_ref, wqkv_ref, bqkv_ref,
                      wo_ref, bo_ref, g2_ref, be2_ref, w1_ref, bf1_ref,
                      w2_ref, bf2_ref, o_ref, attn_scr, *, n_head):
    b_blk, T, D = x_ref.shape
    dh = D // n_head
    M = b_blk * T

    x = x_ref[...].reshape(M, D)                     # f32 residual stream

    # --- attention block (pre-LN, causal) ---
    h = _layernorm(x, g1_ref[...], be1_ref[...])     # f32 elementwise math
    hb = h.astype(jnp.bfloat16)                      # bf16 MXU operands
    # Fused QKV: one (M,D)@(D,3D) matmul.  1/sqrt(dh) is folded into the
    # Q third of wqkv/bqkv at init time (no per-score scale in-kernel).
    qkv = (jnp.dot(hb, wqkv_ref[...], preferred_element_type=jnp.float32)
           + bqkv_ref[...]).astype(jnp.bfloat16)
    q = qkv[:, :D]                                   # 128-aligned lane slices
    k = qkv[:, D:2 * D]
    v = qkv[:, 2 * D:]

    # Precomputed causal bias, broadcast once (hoisted out of the head loop).
    bias = jnp.broadcast_to(mask_ref[...][None], (b_blk, T, T))

    # Per-head loop with batch-batched einsums (sequences never mix).  Head
    # outputs are written into a VMEM scratch slab — no jnp.concatenate.
    # TODO(synk): a single head-batched dot_general ((B*H, T, dh) operands)
    # would drop the per-head slices but needs a 4-D relayout/transpose.
    for hd in range(n_head):
        sl = slice(hd * dh, (hd + 1) * dh)
        qh = q[:, sl].reshape(b_blk, T, dh)
        kh = k[:, sl].reshape(b_blk, T, dh)
        vh = v[:, sl].reshape(b_blk, T, dh)
        s = jnp.einsum("bqd,bkd->bqk", qh, kh,
                       preferred_element_type=jnp.float32) + bias
        s = s - jnp.max(s, axis=-1, keepdims=True)
        p = jnp.exp(s)                               # f32 softmax numerics
        p = p * pl.reciprocal(jnp.sum(p, axis=-1, keepdims=True), approx=True)
        oh = jnp.einsum("bqk,bkd->bqd", p.astype(jnp.bfloat16), vh,
                        preferred_element_type=jnp.float32)
        attn_scr[:, sl] = oh.reshape(M, dh)

    attn = attn_scr[...].astype(jnp.bfloat16)        # full-width out projection
    attn = jnp.dot(attn, wo_ref[...],
                   preferred_element_type=jnp.float32) + bo_ref[...]
    x = x + attn

    # --- MLP block (quick-GELU: x * sigmoid(1.702 x), f32 elementwise) ---
    h2 = _layernorm(x, g2_ref[...], be2_ref[...]).astype(jnp.bfloat16)
    f = jnp.dot(h2, w1_ref[...], preferred_element_type=jnp.float32) + bf1_ref[...]
    f = f * pl.reciprocal(1.0 + jnp.exp(-1.702 * f), approx=True)
    y = jnp.dot(f.astype(jnp.bfloat16), w2_ref[...],
                preferred_element_type=jnp.float32) + bf2_ref[...]
    o_ref[...] = (x + y).reshape(b_blk, T, D)


def run_clip_layer(x, causal_bias, p, *, n_head, b_blk, vmem_limit_bytes):
    B, T, D = x.shape
    assert B % b_blk == 0
    xspec = pl.BlockSpec((b_blk, T, D), lambda b: (b, 0, 0))
    # Grid-invariant tensors: whole array resident in VMEM, copied once,
    # no double-buffering (key for fitting v7x's 64 MiB VMEM at real size).
    wspec = pl.BlockSpec(memory_space=pltpu.MemorySpace.VMEM)

    params = [p["ln1_g"], p["ln1_b"], p["wqkv"], p["bqkv"], p["wo"], p["bo"],
              p["ln2_g"], p["ln2_b"], p["w1"], p["b1"], p["w2"], p["b2"]]
    return pl.pallas_call(
        partial(clip_layer_kernel, n_head=n_head),
        out_shape=jax.ShapeDtypeStruct((B, T, D), jnp.float32),
        grid_spec=pltpu.PrefetchScalarGridSpec(
            num_scalar_prefetch=0,
            grid=(B // b_blk,),
            in_specs=[xspec, wspec] + [wspec] * len(params),
            out_specs=xspec,
            scratch_shapes=[pltpu.VMEM((b_blk * T, D), jnp.float32)]),
        compiler_params=pltpu.CompilerParams(
            dimension_semantics=("parallel",),
            vmem_limit_bytes=vmem_limit_bytes),
    )(x, causal_bias, *params)


# --------------------------- final LayerNorm kernel --------------------------
def layernorm_kernel(x_ref, g_ref, b_ref, o_ref):
    b_blk, T, D = x_ref.shape
    x = x_ref[...].reshape(b_blk * T, D)
    o_ref[...] = _layernorm(x, g_ref[...], b_ref[...]).reshape(b_blk, T, D)


def run_layernorm(x, g, b, *, b_blk):
    B, T, D = x.shape
    xspec = pl.BlockSpec((b_blk, T, D), lambda i: (i, 0, 0))
    wspec = pl.BlockSpec(memory_space=pltpu.MemorySpace.VMEM)
    return pl.pallas_call(
        layernorm_kernel,
        out_shape=jax.ShapeDtypeStruct((B, T, D), jnp.float32),
        grid_spec=pltpu.PrefetchScalarGridSpec(
            num_scalar_prefetch=0, grid=(B // b_blk,),
            in_specs=[xspec, wspec, wspec], out_specs=xspec),
        compiler_params=pltpu.CompilerParams(
            dimension_semantics=("parallel",)),
    )(x, g, b)


# ------------------------------ parameter setup ------------------------------
def make_causal_bias(n_tokens):
    row = jnp.arange(n_tokens)[:, None]
    col = jnp.arange(n_tokens)[None, :]
    return jnp.where(col > row, -1e30, 0.0).astype(jnp.float32)


def init_clip_params(key, n_vocab, n_embed, n_tokens, n_head, n_layers):
    D, F4 = n_embed, 4 * n_embed
    qk_scale = 1.0 / math.sqrt(D // n_head)
    keys = iter(jax.random.split(key, 2 + 12 * n_layers))

    def nrm(shape, scale=0.02):
        return (scale * jax.random.normal(next(keys), shape)).astype(jnp.float32)

    params = {
        "tok_emb": nrm((n_vocab, D)),
        "pos_emb": nrm((n_tokens, D)),   # nn.Parameter(zeros) in torch; random here
        "ln_f_g": jnp.ones((1, D), jnp.float32),
        "ln_f_b": jnp.zeros((1, D), jnp.float32),
        "layers": [],
    }
    for _ in range(n_layers):
        wq, bq = nrm((D, D)) * qk_scale, nrm((1, D)) * qk_scale  # scale folded
        wk, bk = nrm((D, D)), nrm((1, D))
        wv, bv = nrm((D, D)), nrm((1, D))
        params["layers"].append({
            "ln1_g": jnp.ones((1, D), jnp.float32),
            "ln1_b": jnp.zeros((1, D), jnp.float32),
            # fused QKV projection; weights stored in bf16, bias in f32.
            "wqkv": jnp.concatenate([wq, wk, wv], axis=1).astype(jnp.bfloat16),
            "bqkv": jnp.concatenate([bq, bk, bv], axis=1),
            "wo": nrm((D, D)).astype(jnp.bfloat16), "bo": nrm((1, D)),
            "ln2_g": jnp.ones((1, D), jnp.float32),
            "ln2_b": jnp.zeros((1, D), jnp.float32),
            "w1": nrm((D, F4)).astype(jnp.bfloat16), "b1": nrm((1, F4)),
            "w2": nrm((F4, D)).astype(jnp.bfloat16), "b2": nrm((1, D)),
        })
    return params


def clip_forward(tokens, params, causal_bias, *, n_head, b_blk, vmem_limit_bytes):
    tokens = tokens.astype(jnp.int32)                # tokens.type(torch.long)
    # CLIPEmbedding: token gather + positional add (plain-JAX glue).
    # TODO(synk): embedding gather kept in JAX; a DMA-gather Pallas kernel is
    # possible but unnecessary for this small synthetic table.
    state = jnp.take(params["tok_emb"], tokens, axis=0) + params["pos_emb"][None]
    state = state.astype(jnp.float32)
    # TODO(synk): per-layer pallas_calls round-trip activations through HBM;
    # multi-layer fusion (budgeted against 64 MiB on v7x) is a further step.
    for lp in params["layers"]:
        state = run_clip_layer(state, causal_bias, lp, n_head=n_head,
                               b_blk=b_blk, vmem_limit_bytes=vmem_limit_bytes)
    return run_layernorm(state, params["ln_f_g"], params["ln_f_b"], b_blk=b_blk)


if __name__ == "__main__":
    # Scaled-down CLIP: vocab=512, embed=128 (multiple of 128), tokens=16
    # (multiple of 8), heads=4 (dh=32), layers=2, batch=4 blocked 2 per step.
    N_VOCAB, N_EMBED, N_TOKENS, N_HEAD, N_LAYERS = 512, 128, 16, 4, 2
    BATCH, B_BLK = 4, 2

    key = jax.random.PRNGKey(0)
    pkey, tkey = jax.random.split(key)
    params = init_clip_params(pkey, N_VOCAB, N_EMBED, N_TOKENS, N_HEAD, N_LAYERS)
    tokens = jax.random.randint(tkey, (BATCH, N_TOKENS), 0, N_VOCAB, dtype=jnp.int32)
    causal_bias = make_causal_bias(N_TOKENS)

    # Scoped-VMEM budget: one layer's weights + a few activation blocks +
    # headroom, clamped to stay within v7x's 64 MiB physical VMEM.
    layer_bytes = sum(int(v.size) * v.dtype.itemsize
                      for v in params["layers"][0].values())
    act_bytes = B_BLK * N_TOKENS * N_EMBED * 4
    vmem_limit = int(min(max(layer_bytes + 8 * act_bytes + (8 << 20), 32 << 20),
                         64 << 20))

    fwd = jax.jit(partial(clip_forward, n_head=N_HEAD, b_blk=B_BLK,
                          vmem_limit_bytes=vmem_limit))
    out = jax.block_until_ready(fwd(tokens, params, causal_bias))
    assert out.shape == (BATCH, N_TOKENS, N_EMBED)
    assert bool(jnp.all(jnp.isfinite(out)))
    print("KERNEL_OK")
</pallas_src>

<mosaic_0001>
module attributes {stable_mosaic.version = 11 : i64} {
  func.func @layernorm_kernel(%arg0: i32, %arg1: memref<2x16x128xf32, #tpu.memory_space<vmem>>, %arg2: memref<1x128xf32, #tpu.memory_space<vmem>>, %arg3: memref<1x128xf32, #tpu.memory_space<vmem>>, %arg4: memref<2x16x128xf32, #tpu.memory_space<vmem>>) attributes {dimension_semantics = [#tpu.dimension_semantics<parallel>], iteration_bounds = array<i64: 2>, scalar_prefetch = 0 : i64, scratch_operands = 0 : i64, tpu.core_type = #tpu.core_type<tc>, window_params = [{transform_indices = @transform_0, window_bounds = array<i64: 2, 16, 128>}, {pipeline_mode = #tpu.pipeline_mode<synchronous>, transform_indices = @transform_1, window_bounds = array<i64: 1, 128>}, {pipeline_mode = #tpu.pipeline_mode<synchronous>, transform_indices = @transform_2, window_bounds = array<i64: 1, 128>}, {transform_indices = @transform_3, window_bounds = array<i64: 2, 16, 128>}]} {
    %c0 = arith.constant 0 : index
    %c0_0 = arith.constant 0 : index
    %c0_1 = arith.constant 0 : index
    %0 = vector.load %arg1[%c0, %c0_0, %c0_1] : memref<2x16x128xf32, #tpu.memory_space<vmem>>, vector<2x16x128xf32>
    %1 = vector.shape_cast %0 : vector<2x16x128xf32> to vector<32x128xf32>
    %c0_2 = arith.constant 0 : index
    %c0_3 = arith.constant 0 : index
    %2 = vector.load %arg2[%c0_2, %c0_3] : memref<1x128xf32, #tpu.memory_space<vmem>>, vector<1x128xf32>
    %c0_4 = arith.constant 0 : index
    %c0_5 = arith.constant 0 : index
    %3 = vector.load %arg3[%c0_4, %c0_5] : memref<1x128xf32, #tpu.memory_space<vmem>>, vector<1x128xf32>
    %cst = arith.constant dense<0.000000e+00> : vector<32xf32>
    %4 = vector.multi_reduction <add>, %1, %cst [1] : vector<32x128xf32> to vector<32xf32>
    %5 = vector.shape_cast %4 : vector<32xf32> to vector<32x1xf32>
    %cst_6 = arith.constant 1.280000e+02 : f32
    %6 = vector.broadcast %cst_6 : f32 to vector<32x1xf32>
    %7 = arith.divf %5, %6 : vector<32x1xf32>
    %8 = vector.broadcast %7 : vector<32x1xf32> to vector<32x128xf32>
    %9 = arith.subf %1, %8 : vector<32x128xf32>
    %10 = arith.mulf %9, %9 : vector<32x128xf32>
    %cst_7 = arith.constant dense<0.000000e+00> : vector<32xf32>
    %11 = vector.multi_reduction <add>, %10, %cst_7 [1] : vector<32x128xf32> to vector<32xf32>
    %12 = vector.shape_cast %11 : vector<32xf32> to vector<32x1xf32>
    %cst_8 = arith.constant 1.280000e+02 : f32
    %13 = vector.broadcast %cst_8 : f32 to vector<32x1xf32>
    %14 = arith.divf %12, %13 : vector<32x1xf32>
    %15 = vector.broadcast %7 : vector<32x1xf32> to vector<32x128xf32>
    %16 = arith.subf %1, %15 : vector<32x128xf32>
    %cst_9 = arith.constant 9.99999974E-6 : f32
    %17 = vector.broadcast %cst_9 : f32 to vector<32x1xf32>
    %18 = arith.addf %14, %17 : vector<32x1xf32>
    %19 = math.rsqrt %18 : vector<32x1xf32>
    %20 = vector.broadcast %19 : vector<32x1xf32> to vector<32x128xf32>
    %21 = arith.mulf %16, %20 : vector<32x128xf32>
    %22 = vector.broadcast %2 : vector<1x128xf32> to vector<32x128xf32>
    %23 = arith.mulf %21, %22 : vector<32x128xf32>
    %24 = vector.broadcast %3 : vector<1x128xf32> to vector<32x128xf32>
    %25 = arith.addf %23, %24 : vector<32x128xf32>
    %26 = vector.shape_cast %25 : vector<32x128xf32> to vector<2x16x128xf32>
    %c0_10 = arith.constant 0 : index
    %c0_11 = arith.constant 0 : index
    %c0_12 = arith.constant 0 : index
    %27 = vector.load %arg4[%c0_10, %c0_11, %c0_12] : memref<2x16x128xf32, #tpu.memory_space<vmem>>, vector<2x16x128xf32>
    tpu.vector_store %arg4[%c0_10, %c0_11, %c0_12], %26 {strides = array<i32>} : memref<2x16x128xf32, #tpu.memory_space<vmem>>, vector<2x16x128xf32>,
    return
  }
  func.func @transform_0(%arg0: i32) -> (i32, i32, i32) {
    %c0_i32 = arith.constant 0 : i32
    %c0_i32_0 = arith.constant 0 : i32
    %c0_i32_1 = arith.constant 0 : i32
    return %arg0, %c0_i32, %c0_i32_0 : i32, i32, i32
  }
  func.func @transform_1(%arg0: i32) -> (i32, i32) {
    %c0_i32 = arith.constant 0 : i32
    %c0_i32_0 = arith.constant 0 : i32
    %c0_i32_1 = arith.constant 0 : i32
    return %c0_i32, %c0_i32_0 : i32, i32
  }
  func.func @transform_2(%arg0: i32) -> (i32, i32) {
    %c0_i32 = arith.constant 0 : i32
    %c0_i32_0 = arith.constant 0 : i32
    %c0_i32_1 = arith.constant 0 : i32
    return %c0_i32, %c0_i32_0 : i32, i32
  }
  func.func @transform_3(%arg0: i32) -> (i32, i32, i32) {
    %c0_i32 = arith.constant 0 : i32
    %c0_i32_0 = arith.constant 0 : i32
    %c0_i32_1 = arith.constant 0 : i32
    return %arg0, %c0_i32, %c0_i32_0 : i32, i32, i32
  }
}

module attributes {stable_mosaic.version = 11 : i64} {
  func.func @clip_layer_kernel(%arg0: i32, %arg1: memref<2x16x128xf32, #tpu.memory_space<vmem>>, %arg2: memref<16x16xf32, #tpu.memory_space<vmem>>, %arg3: memref<1x128xf32, #tpu.memory_space<vmem>>, %arg4: memref<1x128xf32, #tpu.memory_space<vmem>>, %arg5: memref<128x384xbf16, #tpu.memory_space<vmem>>, %arg6: memref<1x384xf32, #tpu.memory_space<vmem>>, %arg7: memref<128x128xbf16, #tpu.memory_space<vmem>>, %arg8: memref<1x128xf32, #tpu.memory_space<vmem>>, %arg9: memref<1x128xf32, #tpu.memory_space<vmem>>, %arg10: memref<1x128xf32, #tpu.memory_space<vmem>>, %arg11: memref<128x512xbf16, #tpu.memory_space<vmem>>, %arg12: memref<1x512xf32, #tpu.memory_space<vmem>>, %arg13: memref<512x128xbf16, #tpu.memory_space<vmem>>, %arg14: memref<1x128xf32, #tpu.memory_space<vmem>>, %arg15: memref<2x16x128xf32, #tpu.memory_space<vmem>>, %arg16: memref<32x128xf32, #tpu.memory_space<vmem>>) attributes {dimension_semantics = [#tpu.dimension_semantics<parallel>], iteration_bounds = array<i64: 2>, scalar_prefetch = 0 : i64, scratch_operands = 1 : i64, tpu.core_type = #tpu.core_type<tc>, window_params = [{transform_indices = @transform_0, window_bounds = array<i64: 2, 16, 128>}, {pipeline_mode = #tpu.pipeline_mode<synchronous>, transform_indices = @transform_1, window_bounds = array<i64: 16, 16>}, {pipeline_mode = #tpu.pipeline_mode<synchronous>, transform_indices = @transform_2, window_bounds = array<i64: 1, 128>}, {pipeline_mode = #tpu.pipeline_mode<synchronous>, transform_indices = @transform_3, window_bounds = array<i64: 1, 128>}, {pipeline_mode = #tpu.pipeline_mode<synchronous>, transform_indices = @transform_4, window_bounds = array<i64: 128, 384>}, {pipeline_mode = #tpu.pipeline_mode<synchronous>, transform_indices = @transform_5, window_bounds = array<i64: 1, 384>}, {pipeline_mode = #tpu.pipeline_mode<synchronous>, transform_indices = @transform_6, window_bounds = array<i64: 128, 128>}, {pipeline_mode = #tpu.pipeline_mode<synchronous>, transform_indices = @transform_7, window_bounds = array<i64: 1, 128>}, {pipeline_mode = #tpu.pipeline_mode<synchronous>, transform_indices = @transform_8, window_bounds = array<i64: 1, 128>}, {pipeline_mode = #tpu.pipeline_mode<synchronous>, transform_indices = @transform_9, window_bounds = array<i64: 1, 128>}, {pipeline_mode = #tpu.pipeline_mode<synchronous>, transform_indices = @transform_10, window_bounds = array<i64: 128, 512>}, {pipeline_mode = #tpu.pipeline_mode<synchronous>, transform_indices = @transform_11, window_bounds = array<i64: 1, 512>}, {pipeline_mode = #tpu.pipeline_mode<synchronous>, transform_indices = @transform_12, window_bounds = array<i64: 512, 128>}, {pipeline_mode = #tpu.pipeline_mode<synchronous>, transform_indices = @transform_13, window_bounds = array<i64: 1, 128>}, {transform_indices = @transform_14, window_bounds = array<i64: 2, 16, 128>}]} {
    %c0 = arith.constant 0 : index
    %c0_0 = arith.constant 0 : index
    %c0_1 = arith.constant 0 : index
    %0 = vector.load %arg1[%c0, %c0_0, %c0_1] : memref<2x16x128xf32, #tpu.memory_space<vmem>>, vector<2x16x128xf32>
    %1 = vector.shape_cast %0 : vector<2x16x128xf32> to vector<32x128xf32>
    %c0_2 = arith.constant 0 : index
    %c0_3 = arith.constant 0 : index
    %2 = vector.load %arg3[%c0_2, %c0_3] : memref<1x128xf32, #tpu.memory_space<vmem>>, vector<1x128xf32>
    %c0_4 = arith.constant 0 : index
    %c0_5 = arith.constant 0 : index
    %3 = vector.load %arg4[%c0_4, %c0_5] : memref<1x128xf32, #tpu.memory_space<vmem>>, vector<1x128xf32>
    %cst = arith.constant dense<0.000000e+00> : vector<32xf32>
    %4 = vector.multi_reduction <add>, %1, %cst [1] : vector<32x128xf32> to vector<32xf32>
    %5 = vector.shape_cast %4 : vector<32xf32> to vector<32x1xf32>
    %cst_6 = arith.constant 1.280000e+02 : f32
    %6 = vector.broadcast %cst_6 : f32 to vector<32x1xf32>
    %7 = arith.divf %5, %6 : vector<32x1xf32>
    %8 = vector.broadcast %7 : vector<32x1xf32> to vector<32x128xf32>
    %9 = arith.subf %1, %8 : vector<32x128xf32>
    %10 = arith.mulf %9, %9 : vector<32x128xf32>
    %cst_7 = arith.constant dense<0.000000e+00> : vector<32xf32>
    %11 = vector.multi_reduction <add>, %10, %cst_7 [1] : vector<32x128xf32> to vector<32xf32>
    %12 = vector.shape_cast %11 : vector<32xf32> to vector<32x1xf32>
    %cst_8 = arith.constant 1.280000e+02 : f32
    %13 = vector.broadcast %cst_8 : f32 to vector<32x1xf32>
    %14 = arith.divf %12, %13 : vector<32x1xf32>
    %15 = vector.broadcast %7 : vector<32x1xf32> to vector<32x128xf32>
    %16 = arith.subf %1, %15 : vector<32x128xf32>
    %cst_9 = arith.constant 9.99999974E-6 : f32
    %17 = vector.broadcast %cst_9 : f32 to vector<32x1xf32>
    %18 = arith.addf %14, %17 : vector<32x1xf32>
    %19 = math.rsqrt %18 : vector<32x1xf32>
    %20 = vector.broadcast %19 : vector<32x1xf32> to vector<32x128xf32>
    %21 = arith.mulf %16, %20 : vector<32x128xf32>
    %22 = vector.broadcast %2 : vector<1x128xf32> to vector<32x128xf32>
    %23 = arith.mulf %21, %22 : vector<32x128xf32>
    %24 = vector.broadcast %3 : vector<1x128xf32> to vector<32x128xf32>
    %25 = arith.addf %23, %24 : vector<32x128xf32>
    %26 = arith.truncf %25 : vector<32x128xf32> to vector<32x128xbf16>
    %c0_10 = arith.constant 0 : index
    %c0_11 = arith.constant 0 : index
    %27 = vector.load %arg5[%c0_10, %c0_11] : memref<128x384xbf16, #tpu.memory_space<vmem>>, vector<128x384xbf16>
    %cst_12 = arith.constant dense<0.000000e+00> : vector<32x384xf32>
    %28 = tpu.matmul %26, %27, %cst_12 {dimension_numbers = #tpu.dot_dimension_numbers<[1], [0], [0], [1], [0, 0, 1, 1], [], []>} : vector<32x128xbf16>, vector<128x384xbf16>, vector<32x384xf32> -> vector<32x384xf32>
    %c0_13 = arith.constant 0 : index
    %c0_14 = arith.constant 0 : index
    %29 = vector.load %arg6[%c0_13, %c0_14] : memref<1x384xf32, #tpu.memory_space<vmem>>, vector<1x384xf32>
    %30 = vector.broadcast %29 : vector<1x384xf32> to vector<32x384xf32>
    %31 = arith.addf %28, %30 : vector<32x384xf32>
    %32 = arith.truncf %31 : vector<32x384xf32> to vector<32x384xbf16>
    %33 = vector.extract_strided_slice %32 {offsets = [0, 0], sizes = [32, 128], strides = [1, 1]} : vector<32x384xbf16> to vector<32x128xbf16>
    %34 = vector.extract_strided_slice %32 {offsets = [0, 128], sizes = [32, 128], strides = [1, 1]} : vector<32x384xbf16> to vector<32x128xbf16>
    %35 = vector.extract_strided_slice %32 {offsets = [0, 256], sizes = [32, 128], strides = [1, 1]} : vector<32x384xbf16> to vector<32x128xbf16>
    %c0_15 = arith.constant 0 : index
    %c0_16 = arith.constant 0 : index
    %36 = vector.load %arg2[%c0_15, %c0_16] : memref<16x16xf32, #tpu.memory_space<vmem>>, vector<16x16xf32>
    %37 = vector.shape_cast %36 : vector<16x16xf32> to vector<1x16x16xf32>
    %38 = vector.shape_cast %37 : vector<1x16x16xf32> to vector<1x16x16xf32>
    %39 = vector.broadcast %38 : vector<1x16x16xf32> to vector<2x16x16xf32>
    %40 = vector.extract_strided_slice %33 {offsets = [0, 0], sizes = [32, 32], strides = [1, 1]} : vector<32x128xbf16> to vector<32x32xbf16>
    %41 = vector.shape_cast %40 : vector<32x32xbf16> to vector<2x16x32xbf16>
    %42 = vector.extract_strided_slice %34 {offsets = [0, 0], sizes = [32, 32], strides = [1, 1]} : vector<32x128xbf16> to vector<32x32xbf16>
    %43 = vector.shape_cast %42 : vector<32x32xbf16> to vector<2x16x32xbf16>
    %44 = vector.extract_strided_slice %35 {offsets = [0, 0], sizes = [32, 32], strides = [1, 1]} : vector<32x128xbf16> to vector<32x32xbf16>
    %45 = vector.shape_cast %44 : vector<32x32xbf16> to vector<2x16x32xbf16>
    "tpu.trace_start"() <{level = 10 : i32, message = "bqd,bkd->bqk"}> : () -> ()
    %cst_17 = arith.constant dense<0.000000e+00> : vector<2x16x16xf32>
    %46 = tpu.matmul %41, %43, %cst_17 {dimension_numbers = #tpu.dot_dimension_numbers<[2], [2], [1], [1], [0, 0, 0, 1, 1, 1], [0], [0]>} : vector<2x16x32xbf16>, vector<2x16x32xbf16>, vector<2x16x16xf32> -> vector<2x16x16xf32>
    "tpu.trace_stop"() : () -> ()
    %47 = arith.addf %46, %39 : vector<2x16x16xf32>
    %cst_18 = arith.constant dense<0xFF800000> : vector<2x16xf32>
    %48 = vector.multi_reduction <maximumf>, %47, %cst_18 [2] : vector<2x16x16xf32> to vector<2x16xf32>
    %49 = vector.shape_cast %48 : vector<2x16xf32> to vector<2x16x1xf32>
    %50 = vector.broadcast %49 : vector<2x16x1xf32> to vector<2x16x16xf32>
    %51 = arith.subf %47, %50 : vector<2x16x16xf32>
    %52 = math.exp %51 : vector<2x16x16xf32>
    %cst_19 = arith.constant dense<0.000000e+00> : vector<2x16xf32>
    %53 = vector.multi_reduction <add>, %52, %cst_19 [2] : vector<2x16x16xf32> to vector<2x16xf32>
    %54 = vector.shape_cast %53 : vector<2x16xf32> to vector<2x16x1xf32>
    %55 = tpu.reciprocal %54 {approx = true} : vector<2x16x1xf32> -> vector<2x16x1xf32>
    %56 = vector.broadcast %55 : vector<2x16x1xf32> to vector<2x16x16xf32>
    %57 = arith.mulf %52, %56 : vector<2x16x16xf32>
    %58 = arith.truncf %57 : vector<2x16x16xf32> to vector<2x16x16xbf16>
    "tpu.trace_start"() <{level = 10 : i32, message = "bqk,bkd->bqd"}> : () -> ()
    %cst_20 = arith.constant dense<0.000000e+00> : vector<2x16x32xf32>
    %59 = tpu.matmul %58, %45, %cst_20 {dimension_numbers = #tpu.dot_dimension_numbers<[2], [1], [1], [2], [0, 0, 0, 1, 1, 2], [0], [0]>} : vector<2x16x16xbf16>, vector<2x16x32xbf16>, vector<2x16x32xf32> -> vector<2x16x32xf32>
    "tpu.trace_stop"() : () -> ()
    %60 = vector.shape_cast %59 : vector<2x16x32xf32> to vector<32x32xf32>
    %c0_21 = arith.constant 0 : index
    %c0_22 = arith.constant 0 : index
    %61 = vector.load %arg16[%c0_21, %c0_22] : memref<32x128xf32, #tpu.memory_space<vmem>>, vector<32x32xf32>
    tpu.vector_store %arg16[%c0_21, %c0_22], %60 {strides = array<i32>} : memref<32x128xf32, #tpu.memory_space<vmem>>, vector<32x32xf32>,
    %62 = vector.extract_strided_slice %33 {offsets = [0, 32], sizes = [32, 32], strides = [1, 1]} : vector<32x128xbf16> to vector<32x32xbf16>
    %63 = vector.shape_cast %62 : vector<32x32xbf16> to vector<2x16x32xbf16>
    %64 = vector.extract_strided_slice %34 {offsets = [0, 32], sizes = [32, 32], strides = [1, 1]} : vector<32x128xbf16> to vector<32x32xbf16>
    %65 = vector.shape_cast %64 : vector<32x32xbf16> to vector<2x16x32xbf16>
    %66 = vector.extract_strided_slice %35 {offsets = [0, 32], sizes = [32, 32], strides = [1, 1]} : vector<32x128xbf16> to vector<32x32xbf16>
    %67 = vector.shape_cast %66 : vector<32x32xbf16> to vector<2x16x32xbf16>
    "tpu.trace_start"() <{level = 10 : i32, message = "bqd,bkd->bqk"}> : () -> ()
    %cst_23 = arith.constant dense<0.000000e+00> : vector<2x16x16xf32>
    %68 = tpu.matmul %63, %65, %cst_23 {dimension_numbers = #tpu.dot_dimension_numbers<[2], [2], [1], [1], [0, 0, 0, 1, 1, 1], [0], [0]>} : vector<2x16x32xbf16>, vector<2x16x32xbf16>, vector<2x16x16xf32> -> vector<2x16x16xf32>
    "tpu.trace_stop"() : () -> ()
    %69 = arith.addf %68, %39 : vector<2x16x16xf32>
    %cst_24 = arith.constant dense<0xFF800000> : vector<2x16xf32>
    %70 = vector.multi_reduction <maximumf>, %69, %cst_24 [2] : vector<2x16x16xf32> to vector<2x16xf32>
    %71 = vector.shape_cast %70 : vector<2x16xf32> to vector<2x16x1xf32>
    %72 = vector.broadcast %71 : vector<2x16x1xf32> to vector<2x16x16xf32>
    %73 = arith.subf %69, %72 : vector<2x16x16xf32>
    %74 = math.exp %73 : vector<2x16x16xf32>
    %cst_25 = arith.constant dense<0.000000e+00> : vector<2x16xf32>
    %75 = vector.multi_reduction <add>, %74, %cst_25 [2] : vector<2x16x16xf32> to vector<2x16xf32>
    %76 = vector.shape_cast %75 : vector<2x16xf32> to vector<2x16x1xf32>
    %77 = tpu.reciprocal %76 {approx = true} : vector<2x16x1xf32> -> vector<2x16x1xf32>
    %78 = vector.broadcast %77 : vector<2x16x1xf32> to vector<2x16x16xf32>
    %79 = arith.mulf %74, %78 : vector<2x16x16xf32>
    %80 = arith.truncf %79 : vector<2x16x16xf32> to vector<2x16x16xbf16>
    "tpu.trace_start"() <{level = 10 : i32, message = "bqk,bkd->bqd"}> : () -> ()
    %cst_26 = arith.constant dense<0.000000e+00> : vector<2x16x32xf32>
    %81 = tpu.matmul %80, %67, %cst_26 {dimension_numbers = #tpu.dot_dimension_numbers<[2], [1], [1], [2], [0, 0, 0, 1, 1, 2], [0], [0]>} : vector<2x16x16xbf16>, vector<2x16x32xbf16>, vector<2x16x32xf32> -> vector<2x16x32xf32>
    "tpu.trace_stop"() : () -> ()
    %82 = vector.shape_cast %81 : vector<2x16x32xf32> to vector<32x32xf32>
    %c0_27 = arith.constant 0 : index
    %c32 = arith.constant 32 : index
    %83 = vector.load %arg16[%c0_27, %c32] : memref<32x128xf32, #tpu.memory_space<vmem>>, vector<32x32xf32>
    tpu.vector_store %arg16[%c0_27, %c32], %82 {strides = array<i32>} : memref<32x128xf32, #tpu.memory_space<vmem>>, vector<32x32xf32>,
    %84 = vector.extract_strided_slice %33 {offsets = [0, 64], sizes = [32, 32], strides = [1, 1]} : vector<32x128xbf16> to vector<32x32xbf16>
    %85 = vector.shape_cast %84 : vector<32x32xbf16> to vector<2x16x32xbf16>
    %86 = vector.extract_strided_slice %34 {offsets = [0, 64], sizes = [32, 32], strides = [1, 1]} : vector<32x128xbf16> to vector<32x32xbf16>
    %87 = vector.shape_cast %86 : vector<32x32xbf16> to vector<2x16x32xbf16>
    %88 = vector.extract_strided_slice %35 {offsets = [0, 64], sizes = [32, 32], strides = [1, 1]} : vector<32x128xbf16> to vector<32x32xbf16>
    %89 = vector.shape_cast %88 : vector<32x32xbf16> to vector<2x16x32xbf16>
    "tpu.trace_start"() <{level = 10 : i32, message = "bqd,bkd->bqk"}> : () -> ()
    %cst_28 = arith.constant dense<0.000000e+00> : vector<2x16x16xf32>
    %90 = tpu.matmul %85, %87, %cst_28 {dimension_numbers = #tpu.dot_dimension_numbers<[2], [2], [1], [1], [0, 0, 0, 1, 1, 1], [0], [0]>} : vector<2x16x32xbf16>, vector<2x16x32xbf16>, vector<2x16x16xf32> -> vector<2x16x16xf32>
    "tpu.trace_stop"() : () -> ()
    %91 = arith.addf %90, %39 : vector<2x16x16xf32>
    %cst_29 = arith.constant dense<0xFF800000> : vector<2x16xf32>
    %92 = vector.multi_reduction <maximumf>, %91, %cst_29 [2] : vector<2x16x16xf32> to vector<2x16xf32>
    %93 = vector.shape_cast %92 : vector<2x16xf32> to vector<2x16x1xf32>
    %94 = vector.broadcast %93 : vector<2x16x1xf32> to vector<2x16x16xf32>
    %95 = arith.subf %91, %94 : vector<2x16x16xf32>
    %96 = math.exp %95 : vector<2x16x16xf32>
    %cst_30 = arith.constant dense<0.000000e+00> : vector<2x16xf32>
    %97 = vector.multi_reduction <add>, %96, %cst_30 [2] : vector<2x16x16xf32> to vector<2x16xf32>
    %98 = vector.shape_cast %97 : vector<2x16xf32> to vector<2x16x1xf32>
    %99 = tpu.reciprocal %98 {approx = true} : vector<2x16x1xf32> -> vector<2x16x1xf32>
    %100 = vector.broadcast %99 : vector<2x16x1xf32> to vector<2x16x16xf32>
    %101 = arith.mulf %96, %100 : vector<2x16x16xf32>
    %102 = arith.truncf %101 : vector<2x16x16xf32> to vector<2x16x16xbf16>
    "tpu.trace_start"() <{level = 10 : i32, message = "bqk,bkd->bqd"}> : () -> ()
    %cst_31 = arith.constant dense<0.000000e+00> : vector<2x16x32xf32>
    %103 = tpu.matmul %102, %89, %cst_31 {dimension_numbers = #tpu.dot_dimension_numbers<[2], [1], [1], [2], [0, 0, 0, 1, 1, 2], [0], [0]>} : vector<2x16x16xbf16>, vector<2x16x32xbf16>, vector<2x16x32xf32> -> vector<2x16x32xf32>
    "tpu.trace_stop"() : () -> ()
    %104 = vector.shape_cast %103 : vector<2x16x32xf32> to vector<32x32xf32>
    %c0_32 = arith.constant 0 : index
    %c64 = arith.constant 64 : index
    %105 = vector.load %arg16[%c0_32, %c64] : memref<32x128xf32, #tpu.memory_space<vmem>>, vector<32x32xf32>
    tpu.vector_store %arg16[%c0_32, %c64], %104 {strides = array<i32>} : memref<32x128xf32, #tpu.memory_space<vmem>>, vector<32x32xf32>,
    %106 = vector.extract_strided_slice %33 {offsets = [0, 96], sizes = [32, 32], strides = [1, 1]} : vector<32x128xbf16> to vector<32x32xbf16>
    %107 = vector.shape_cast %106 : vector<32x32xbf16> to vector<2x16x32xbf16>
    %108 = vector.extract_strided_slice %34 {offsets = [0, 96], sizes = [32, 32], strides = [1, 1]} : vector<32x128xbf16> to vector<32x32xbf16>
    %109 = vector.shape_cast %108 : vector<32x32xbf16> to vector<2x16x32xbf16>
    %110 = vector.extract_strided_slice %35 {offsets = [0, 96], sizes = [32, 32], strides = [1, 1]} : vector<32x128xbf16> to vector<32x32xbf16>
    %111 = vector.shape_cast %110 : vector<32x32xbf16> to vector<2x16x32xbf16>
    "tpu.trace_start"() <{level = 10 : i32, message = "bqd,bkd->bqk"}> : () -> ()
    %cst_33 = arith.constant dense<0.000000e+00> : vector<2x16x16xf32>
    %112 = tpu.matmul %107, %109, %cst_33 {dimension_numbers = #tpu.dot_dimension_numbers<[2], [2], [1], [1], [0, 0, 0, 1, 1, 1], [0], [0]>} : vector<2x16x32xbf16>, vector<2x16x32xbf16>, vector<2x16x16xf32> -> vector<2x16x16xf32>
    "tpu.trace_stop"() : () -> ()
    %113 = arith.addf %112, %39 : vector<2x16x16xf32>
    %cst_34 = arith.constant dense<0xFF800000> : vector<2x16xf32>
    %114 = vector.multi_reduction <maximumf>, %113, %cst_34 [2] : vector<2x16x16xf32> to vector<2x16xf32>
    %115 = vector.shape_cast %114 : vector<2x16xf32> to vector<2x16x1xf32>
    %116 = vector.broadcast %115 : vector<2x16x1xf32> to vector<2x16x16xf32>
    %117 = arith.subf %113, %116 : vector<2x16x16xf32>
    %118 = math.exp %117 : vector<2x16x16xf32>
    %cst_35 = arith.constant dense<0.000000e+00> : vector<2x16xf32>
    %119 = vector.multi_reduction <add>, %118, %cst_35 [2] : vector<2x16x16xf32> to vector<2x16xf32>
    %120 = vector.shape_cast %119 : vector<2x16xf32> to vector<2x16x1xf32>
    %121 = tpu.reciprocal %120 {approx = true} : vector<2x16x1xf32> -> vector<2x16x1xf32>
    %122 = vector.broadcast %121 : vector<2x16x1xf32> to vector<2x16x16xf32>
    %123 = arith.mulf %118, %122 : vector<2x16x16xf32>
    %124 = arith.truncf %123 : vector<2x16x16xf32> to vector<2x16x16xbf16>
    "tpu.trace_start"() <{level = 10 : i32, message = "bqk,bkd->bqd"}> : () -> ()
    %cst_36 = arith.constant dense<0.000000e+00> : vector<2x16x32xf32>
    %125 = tpu.matmul %124, %111, %cst_36 {dimension_numbers = #tpu.dot_dimension_numbers<[2], [1], [1], [2], [0, 0, 0, 1, 1, 2], [0], [0]>} : vector<2x16x16xbf16>, vector<2x16x32xbf16>, vector<2x16x32xf32> -> vector<2x16x32xf32>
    "tpu.trace_stop"() : () -> ()
    %126 = vector.shape_cast %125 : vector<2x16x32xf32> to vector<32x32xf32>
    %c0_37 = arith.constant 0 : index
    %c96 = arith.constant 96 : index
    %127 = vector.load %arg16[%c0_37, %c96] : memref<32x128xf32, #tpu.memory_space<vmem>>, vector<32x32xf32>
    tpu.vector_store %arg16[%c0_37, %c96], %126 {strides = array<i32>} : memref<32x128xf32, #tpu.memory_space<vmem>>, vector<32x32xf32>,
    %c0_38 = arith.constant 0 : index
    %c0_39 = arith.constant 0 : index
    %128 = vector.load %arg16[%c0_38, %c0_39] : memref<32x128xf32, #tpu.memory_space<vmem>>, vector<32x128xf32>
    %129 = arith.truncf %128 : vector<32x128xf32> to vector<32x128xbf16>
    %c0_40 = arith.constant 0 : index
    %c0_41 = arith.constant 0 : index
    %130 = vector.load %arg7[%c0_40, %c0_41] : memref<128x128xbf16, #tpu.memory_space<vmem>>, vector<128x128xbf16>
    %cst_42 = arith.constant dense<0.000000e+00> : vector<32x128xf32>
    %131 = tpu.matmul %129, %130, %cst_42 {dimension_numbers = #tpu.dot_dimension_numbers<[1], [0], [0], [1], [0, 0, 1, 1], [], []>} : vector<32x128xbf16>, vector<128x128xbf16>, vector<32x128xf32> -> vector<32x128xf32>
    %c0_43 = arith.constant 0 : index
    %c0_44 = arith.constant 0 : index
    %132 = vector.load %arg8[%c0_43, %c0_44] : memref<1x128xf32, #tpu.memory_space<vmem>>, vector<1x128xf32>
    %133 = vector.broadcast %132 : vector<1x128xf32> to vector<32x128xf32>
    %134 = arith.addf %131, %133 : vector<32x128xf32>
    %135 = arith.addf %1, %134 : vector<32x128xf32>
    %c0_45 = arith.constant 0 : index
    %c0_46 = arith.constant 0 : index
    %136 = vector.load %arg9[%c0_45, %c0_46] : memref<1x128xf32, #tpu.memory_space<vmem>>, vector<1x128xf32>
    %c0_47 = arith.constant 0 : index
    %c0_48 = arith.constant 0 : index
    %137 = vector.load %arg10[%c0_47, %c0_48] : memref<1x128xf32, #tpu.memory_space<vmem>>, vector<1x128xf32>
    %cst_49 = arith.constant dense<0.000000e+00> : vector<32xf32>
    %138 = vector.multi_reduction <add>, %135, %cst_49 [1] : vector<32x128xf32> to vector<32xf32>
    %139 = vector.shape_cast %138 : vector<32xf32> to vector<32x1xf32>
    %cst_50 = arith.constant 1.280000e+02 : f32
    %140 = vector.broadcast %cst_50 : f32 to vector<32x1xf32>
    %141 = arith.divf %139, %140 : vector<32x1xf32>
    %142 = vector.broadcast %141 : vector<32x1xf32> to vector<32x128xf32>
    %143 = arith.subf %135, %142 : vector<32x128xf32>
    %144 = arith.mulf %143, %143 : vector<32x128xf32>
    %cst_51 = arith.constant dense<0.000000e+00> : vector<32xf32>
    %145 = vector.multi_reduction <add>, %144, %cst_51 [1] : vector<32x128xf32> to vector<32xf32>
    %146 = vector.shape_cast %145 : vector<32xf32> to vector<32x1xf32>
    %cst_52 = arith.constant 1.280000e+02 : f32
    %147 = vector.broadcast %cst_52 : f32 to vector<32x1xf32>
    %148 = arith.divf %146, %147 : vector<32x1xf32>
    %149 = vector.broadcast %141 : vector<32x1xf32> to vector<32x128xf32>
    %150 = arith.subf %135, %149 : vector<32x128xf32>
    %cst_53 = arith.constant 9.99999974E-6 : f32
    %151 = vector.broadcast %cst_53 : f32 to vector<32x1xf32>
    %152 = arith.addf %148, %151 : vector<32x1xf32>
    %153 = math.rsqrt %152 : vector<32x1xf32>
    %154 = vector.broadcast %153 : vector<32x1xf32> to vector<32x128xf32>
    %155 = arith.mulf %150, %154 : vector<32x128xf32>
    %156 = vector.broadcast %136 : vector<1x128xf32> to vector<32x128xf32>
    %157 = arith.mulf %155, %156 : vector<32x128xf32>
    %158 = vector.broadcast %137 : vector<1x128xf32> to vector<32x128xf32>
    %159 = arith.addf %157, %158 : vector<32x128xf32>
    %160 = arith.truncf %159 : vector<32x128xf32> to vector<32x128xbf16>
    %c0_54 = arith.constant 0 : index
    %c0_55 = arith.constant 0 : index
    %161 = vector.load %arg11[%c0_54, %c0_55] : memref<128x512xbf16, #tpu.memory_space<vmem>>, vector<128x512xbf16>
    %cst_56 = arith.constant dense<0.000000e+00> : vector<32x512xf32>
    %162 = tpu.matmul %160, %161, %cst_56 {dimension_numbers = #tpu.dot_dimension_numbers<[1], [0], [0], [1], [0, 0, 1, 1], [], []>} : vector<32x128xbf16>, vector<128x512xbf16>, vector<32x512xf32> -> vector<32x512xf32>
    %c0_57 = arith.constant 0 : index
    %c0_58 = arith.constant 0 : index
    %163 = vector.load %arg12[%c0_57, %c0_58] : memref<1x512xf32, #tpu.memory_space<vmem>>, vector<1x512xf32>
    %164 = vector.broadcast %163 : vector<1x512xf32> to vector<32x512xf32>
    %165 = arith.addf %162, %164 : vector<32x512xf32>
    %cst_59 = arith.constant -1.702000e+00 : f32
    %166 = vector.broadcast %cst_59 : f32 to vector<32x512xf32>
    %167 = arith.mulf %166, %165 : vector<32x512xf32>
    %168 = math.exp %167 : vector<32x512xf32>
    %cst_60 = arith.constant 1.000000e+00 : f32
    %169 = vector.broadcast %cst_60 : f32 to vector<32x512xf32>
    %170 = arith.addf %169, %168 : vector<32x512xf32>
    %171 = tpu.reciprocal %170 {approx = true} : vector<32x512xf32> -> vector<32x512xf32>
    %172 = arith.mulf %165, %171 : vector<32x512xf32>
    %173 = arith.truncf %172 : vector<32x512xf32> to vector<32x512xbf16>
    %c0_61 = arith.constant 0 : index
    %c0_62 = arith.constant 0 : index
    %174 = vector.load %arg13[%c0_61, %c0_62] : memref<512x128xbf16, #tpu.memory_space<vmem>>, vector<512x128xbf16>
    %cst_63 = arith.constant dense<0.000000e+00> : vector<32x128xf32>
    %175 = tpu.matmul %173, %174, %cst_63 {dimension_numbers = #tpu.dot_dimension_numbers<[1], [0], [0], [1], [0, 0, 1, 1], [], []>} : vector<32x512xbf16>, vector<512x128xbf16>, vector<32x128xf32> -> vector<32x128xf32>
    %c0_64 = arith.constant 0 : index
    %c0_65 = arith.constant 0 : index
    %176 = vector.load %arg14[%c0_64, %c0_65] : memref<1x128xf32, #tpu.memory_space<vmem>>, vector<1x128xf32>
    %177 = vector.broadcast %176 : vector<1x128xf32> to vector<32x128xf32>
    %178 = arith.addf %175, %177 : vector<32x128xf32>
    %179 = arith.addf %135, %178 : vector<32x128xf32>
    %180 = vector.shape_cast %179 : vector<32x128xf32> to vector<2x16x128xf32>
    %c0_66 = arith.constant 0 : index
    %c0_67 = arith.constant 0 : index
    %c0_68 = arith.constant 0 : index
    %181 = vector.load %arg15[%c0_66, %c0_67, %c0_68] : memref<2x16x128xf32, #tpu.memory_space<vmem>>, vector<2x16x128xf32>
    tpu.vector_store %arg15[%c0_66, %c0_67, %c0_68], %180 {strides = array<i32>} : memref<2x16x128xf32, #tpu.memory_space<vmem>>, vector<2x16x128xf32>,
    return
  }
  func.func @transform_0(%arg0: i32) -> (i32, i32, i32) {
    %c0_i32 = arith.constant 0 : i32
    %c0_i32_0 = arith.constant 0 : i32
    %c0_i32_1 = arith.constant 0 : i32
    return %arg0, %c0_i32, %c0_i32_0 : i32, i32, i32
  }
  func.func @transform_1(%arg0: i32) -> (i32, i32) {
    %c0_i32 = arith.constant 0 : i32
    %c0_i32_0 = arith.constant 0 : i32
    %c0_i32_1 = arith.constant 0 : i32
    return %c0_i32, %c0_i32_0 : i32, i32
  }
  func.func @transform_2(%arg0: i32) -> (i32, i32) {
    %c0_i32 = arith.constant 0 : i32
    %c0_i32_0 = arith.constant 0 : i32
    %c0_i32_1 = arith.constant 0 : i32
    return %c0_i32, %c0_i32_0 : i32, i32
  }
  func.func @transform_3(%arg0: i32) -> (i32, i32) {
    %c0_i32 = arith.constant 0 : i32
    %c0_i32_0 = arith.constant 0 : i32
    %c0_i32_1 = arith.constant 0 : i32
    return %c0_i32, %c0_i32_0 : i32, i32
  }
  func.func @transform_4(%arg0: i32) -> (i32, i32) {
    %c0_i32 = arith.constant 0 : i32
    %c0_i32_0 = arith.constant 0 : i32
    %c0_i32_1 = arith.constant 0 : i32
    return %c0_i32, %c0_i32_0 : i32, i32
  }
  func.func @transform_5(%arg0: i32) -> (i32, i32) {
    %c0_i32 = arith.constant 0 : i32
    %c0_i32_0 = arith.constant 0 : i32
    %c0_i32_1 = arith.constant 0 : i32
    return %c0_i32, %c0_i32_0 : i32, i32
  }
  func.func @transform_6(%arg0: i32) -> (i32, i32) {
    %c0_i32 = arith.constant 0 : i32
    %c0_i32_0 = arith.constant 0 : i32
    %c0_i32_1 = arith.constant 0 : i32
    return %c0_i32, %c0_i32_0 : i32, i32
  }
  func.func @transform_7(%arg0: i32) -> (i32, i32) {
    %c0_i32 = arith.constant 0 : i32
    %c0_i32_0 = arith.constant 0 : i32
    %c0_i32_1 = arith.constant 0 : i32
    return %c0_i32, %c0_i32_0 : i32, i32
  }
  func.func @transform_8(%arg0: i32) -> (i32, i32) {
    %c0_i32 = arith.constant 0 : i32
    %c0_i32_0 = arith.constant 0 : i32
    %c0_i32_1 = arith.constant 0 : i32
    return %c0_i32, %c0_i32_0 : i32, i32
  }
  func.func @transform_9(%arg0: i32) -> (i32, i32) {
    %c0_i32 = arith.constant 0 : i32
    %c0_i32_0 = arith.constant 0 : i32
    %c0_i32_1 = arith.constant 0 : i32
    return %c0_i32, %c0_i32_0 : i32, i32
  }
  func.func @transform_10(%arg0: i32) -> (i32, i32) {
    %c0_i32 = arith.constant 0 : i32
    %c0_i32_0 = arith.constant 0 : i32
    %c0_i32_1 = arith.constant 0 : i32
    return %c0_i32, %c0_i32_0 : i32, i32
  }
  func.func @transform_11(%arg0: i32) -> (i32, i32) {
    %c0_i32 = arith.constant 0 : i32
    %c0_i32_0 = arith.constant 0 : i32
    %c0_i32_1 = arith.constant 0 : i32
    return %c0_i32, %c0_i32_0 : i32, i32
  }
  func.func @transform_12(%arg0: i32) -> (i32, i32) {
    %c0_i32 = arith.constant 0 : i32
    %c0_i32_0 = arith.constant 0 : i32
    %c0_i32_1 = arith.constant 0 : i32
    return %c0_i32, %c0_i32_0 : i32, i32
  }
  func.func @transform_13(%arg0: i32) -> (i32, i32) {
    %c0_i32 = arith.constant 0 : i32
    %c0_i32_0 = arith.constant 0 : i32
    %c0_i32_1 = arith.constant 0 : i32
    return %c0_i32, %c0_i32_0 : i32, i32
  }
  func.func @transform_14(%arg0: i32) -> (i32, i32, i32) {
    %c0_i32 = arith.constant 0 : i32
    %c0_i32_0 = arith.constant 0 : i32
    %c0_i32_1 = arith.constant 0 : i32
    return %arg0, %c0_i32, %c0_i32_0 : i32, i32, i32
  }
}

module attributes {stable_mosaic.version = 11 : i64} {
  func.func @clip_layer_kernel(%arg0: i32, %arg1: memref<2x16x128xf32, #tpu.memory_space<vmem>>, %arg2: memref<16x16xf32, #tpu.memory_space<vmem>>, %arg3: memref<1x128xf32, #tpu.memory_space<vmem>>, %arg4: memref<1x128xf32, #tpu.memory_space<vmem>>, %arg5: memref<128x384xbf16, #tpu.memory_space<vmem>>, %arg6: memref<1x384xf32, #tpu.memory_space<vmem>>, %arg7: memref<128x128xbf16, #tpu.memory_space<vmem>>, %arg8: memref<1x128xf32, #tpu.memory_space<vmem>>, %arg9: memref<1x128xf32, #tpu.memory_space<vmem>>, %arg10: memref<1x128xf32, #tpu.memory_space<vmem>>, %arg11: memref<128x512xbf16, #tpu.memory_space<vmem>>, %arg12: memref<1x512xf32, #tpu.memory_space<vmem>>, %arg13: memref<512x128xbf16, #tpu.memory_space<vmem>>, %arg14: memref<1x128xf32, #tpu.memory_space<vmem>>, %arg15: memref<2x16x128xf32, #tpu.memory_space<vmem>>, %arg16: memref<32x128xf32, #tpu.memory_space<vmem>>) attributes {dimension_semantics = [#tpu.dimension_semantics<parallel>], iteration_bounds = array<i64: 2>, scalar_prefetch = 0 : i64, scratch_operands = 1 : i64, tpu.core_type = #tpu.core_type<tc>, window_params = [{transform_indices = @transform_0, window_bounds = array<i64: 2, 16, 128>}, {pipeline_mode = #tpu.pipeline_mode<synchronous>, transform_indices = @transform_1, window_bounds = array<i64: 16, 16>}, {pipeline_mode = #tpu.pipeline_mode<synchronous>, transform_indices = @transform_2, window_bounds = array<i64: 1, 128>}, {pipeline_mode = #tpu.pipeline_mode<synchronous>, transform_indices = @transform_3, window_bounds = array<i64: 1, 128>}, {pipeline_mode = #tpu.pipeline_mode<synchronous>, transform_indices = @transform_4, window_bounds = array<i64: 128, 384>}, {pipeline_mode = #tpu.pipeline_mode<synchronous>, transform_indices = @transform_5, window_bounds = array<i64: 1, 384>}, {pipeline_mode = #tpu.pipeline_mode<synchronous>, transform_indices = @transform_6, window_bounds = array<i64: 128, 128>}, {pipeline_mode = #tpu.pipeline_mode<synchronous>, transform_indices = @transform_7, window_bounds = array<i64: 1, 128>}, {pipeline_mode = #tpu.pipeline_mode<synchronous>, transform_indices = @transform_8, window_bounds = array<i64: 1, 128>}, {pipeline_mode = #tpu.pipeline_mode<synchronous>, transform_indices = @transform_9, window_bounds = array<i64: 1, 128>}, {pipeline_mode = #tpu.pipeline_mode<synchronous>, transform_indices = @transform_10, window_bounds = array<i64: 128, 512>}, {pipeline_mode = #tpu.pipeline_mode<synchronous>, transform_indices = @transform_11, window_bounds = array<i64: 1, 512>}, {pipeline_mode = #tpu.pipeline_mode<synchronous>, transform_indices = @transform_12, window_bounds = array<i64: 512, 128>}, {pipeline_mode = #tpu.pipeline_mode<synchronous>, transform_indices = @transform_13, window_bounds = array<i64: 1, 128>}, {transform_indices = @transform_14, window_bounds = array<i64: 2, 16, 128>}]} {
    %c0 = arith.constant 0 : index
    %c0_0 = arith.constant 0 : index
    %c0_1 = arith.constant 0 : index
    %0 = vector.load %arg1[%c0, %c0_0, %c0_1] : memref<2x16x128xf32, #tpu.memory_space<vmem>>, vector<2x16x128xf32>
    %1 = vector.shape_cast %0 : vector<2x16x128xf32> to vector<32x128xf32>
    %c0_2 = arith.constant 0 : index
    %c0_3 = arith.constant 0 : index
    %2 = vector.load %arg3[%c0_2, %c0_3] : memref<1x128xf32, #tpu.memory_space<vmem>>, vector<1x128xf32>
    %c0_4 = arith.constant 0 : index
    %c0_5 = arith.constant 0 : index
    %3 = vector.load %arg4[%c0_4, %c0_5] : memref<1x128xf32, #tpu.memory_space<vmem>>, vector<1x128xf32>
    %cst = arith.constant dense<0.000000e+00> : vector<32xf32>
    %4 = vector.multi_reduction <add>, %1, %cst [1] : vector<32x128xf32> to vector<32xf32>
    %5 = vector.shape_cast %4 : vector<32xf32> to vector<32x1xf32>
    %cst_6 = arith.constant 1.280000e+02 : f32
    %6 = vector.broadcast %cst_6 : f32 to vector<32x1xf32>
    %7 = arith.divf %5, %6 : vector<32x1xf32>
    %8 = vector.broadcast %7 : vector<32x1xf32> to vector<32x128xf32>
    %9 = arith.subf %1, %8 : vector<32x128xf32>
    %10 = arith.mulf %9, %9 : vector<32x128xf32>
    %cst_7 = arith.constant dense<0.000000e+00> : vector<32xf32>
    %11 = vector.multi_reduction <add>, %10, %cst_7 [1] : vector<32x128xf32> to vector<32xf32>
    %12 = vector.shape_cast %11 : vector<32xf32> to vector<32x1xf32>
    %cst_8 = arith.constant 1.280000e+02 : f32
    %13 = vector.broadcast %cst_8 : f32 to vector<32x1xf32>
    %14 = arith.divf %12, %13 : vector<32x1xf32>
    %15 = vector.broadcast %7 : vector<32x1xf32> to vector<32x128xf32>
    %16 = arith.subf %1, %15 : vector<32x128xf32>
    %cst_9 = arith.constant 9.99999974E-6 : f32
    %17 = vector.broadcast %cst_9 : f32 to vector<32x1xf32>
    %18 = arith.addf %14, %17 : vector<32x1xf32>
    %19 = math.rsqrt %18 : vector<32x1xf32>
    %20 = vector.broadcast %19 : vector<32x1xf32> to vector<32x128xf32>
    %21 = arith.mulf %16, %20 : vector<32x128xf32>
    %22 = vector.broadcast %2 : vector<1x128xf32> to vector<32x128xf32>
    %23 = arith.mulf %21, %22 : vector<32x128xf32>
    %24 = vector.broadcast %3 : vector<1x128xf32> to vector<32x128xf32>
    %25 = arith.addf %23, %24 : vector<32x128xf32>
    %26 = arith.truncf %25 : vector<32x128xf32> to vector<32x128xbf16>
    %c0_10 = arith.constant 0 : index
    %c0_11 = arith.constant 0 : index
    %27 = vector.load %arg5[%c0_10, %c0_11] : memref<128x384xbf16, #tpu.memory_space<vmem>>, vector<128x384xbf16>
    %cst_12 = arith.constant dense<0.000000e+00> : vector<32x384xf32>
    %28 = tpu.matmul %26, %27, %cst_12 {dimension_numbers = #tpu.dot_dimension_numbers<[1], [0], [0], [1], [0, 0, 1, 1], [], []>} : vector<32x128xbf16>, vector<128x384xbf16>, vector<32x384xf32> -> vector<32x384xf32>
    %c0_13 = arith.constant 0 : index
    %c0_14 = arith.constant 0 : index
    %29 = vector.load %arg6[%c0_13, %c0_14] : memref<1x384xf32, #tpu.memory_space<vmem>>, vector<1x384xf32>
    %30 = vector.broadcast %29 : vector<1x384xf32> to vector<32x384xf32>
    %31 = arith.addf %28, %30 : vector<32x384xf32>
    %32 = arith.truncf %31 : vector<32x384xf32> to vector<32x384xbf16>
    %33 = vector.extract_strided_slice %32 {offsets = [0, 0], sizes = [32, 128], strides = [1, 1]} : vector<32x384xbf16> to vector<32x128xbf16>
    %34 = vector.extract_strided_slice %32 {offsets = [0, 128], sizes = [32, 128], strides = [1, 1]} : vector<32x384xbf16> to vector<32x128xbf16>
    %35 = vector.extract_strided_slice %32 {offsets = [0, 256], sizes = [32, 128], strides = [1, 1]} : vector<32x384xbf16> to vector<32x128xbf16>
    %c0_15 = arith.constant 0 : index
    %c0_16 = arith.constant 0 : index
    %36 = vector.load %arg2[%c0_15, %c0_16] : memref<16x16xf32, #tpu.memory_space<vmem>>, vector<16x16xf32>
    %37 = vector.shape_cast %36 : vector<16x16xf32> to vector<1x16x16xf32>
    %38 = vector.shape_cast %37 : vector<1x16x16xf32> to vector<1x16x16xf32>
    %39 = vector.broadcast %38 : vector<1x16x16xf32> to vector<2x16x16xf32>
    %40 = vector.extract_strided_slice %33 {offsets = [0, 0], sizes = [32, 32], strides = [1, 1]} : vector<32x128xbf16> to vector<32x32xbf16>
    %41 = vector.shape_cast %40 : vector<32x32xbf16> to vector<2x16x32xbf16>
    %42 = vector.extract_strided_slice %34 {offsets = [0, 0], sizes = [32, 32], strides = [1, 1]} : vector<32x128xbf16> to vector<32x32xbf16>
    %43 = vector.shape_cast %42 : vector<32x32xbf16> to vector<2x16x32xbf16>
    %44 = vector.extract_strided_slice %35 {offsets = [0, 0], sizes = [32, 32], strides = [1, 1]} : vector<32x128xbf16> to vector<32x32xbf16>
    %45 = vector.shape_cast %44 : vector<32x32xbf16> to vector<2x16x32xbf16>
    "tpu.trace_start"() <{level = 10 : i32, message = "bqd,bkd->bqk"}> : () -> ()
    %cst_17 = arith.constant dense<0.000000e+00> : vector<2x16x16xf32>
    %46 = tpu.matmul %41, %43, %cst_17 {dimension_numbers = #tpu.dot_dimension_numbers<[2], [2], [1], [1], [0, 0, 0, 1, 1, 1], [0], [0]>} : vector<2x16x32xbf16>, vector<2x16x32xbf16>, vector<2x16x16xf32> -> vector<2x16x16xf32>
    "tpu.trace_stop"() : () -> ()
    %47 = arith.addf %46, %39 : vector<2x16x16xf32>
    %cst_18 = arith.constant dense<0xFF800000> : vector<2x16xf32>
    %48 = vector.multi_reduction <maximumf>, %47, %cst_18 [2] : vector<2x16x16xf32> to vector<2x16xf32>
    %49 = vector.shape_cast %48 : vector<2x16xf32> to vector<2x16x1xf32>
    %50 = vector.broadcast %49 : vector<2x16x1xf32> to vector<2x16x16xf32>
    %51 = arith.subf %47, %50 : vector<2x16x16xf32>
    %52 = math.exp %51 : vector<2x16x16xf32>
    %cst_19 = arith.constant dense<0.000000e+00> : vector<2x16xf32>
    %53 = vector.multi_reduction <add>, %52, %cst_19 [2] : vector<2x16x16xf32> to vector<2x16xf32>
    %54 = vector.shape_cast %53 : vector<2x16xf32> to vector<2x16x1xf32>
    %55 = tpu.reciprocal %54 {approx = true} : vector<2x16x1xf32> -> vector<2x16x1xf32>
    %56 = vector.broadcast %55 : vector<2x16x1xf32> to vector<2x16x16xf32>
    %57 = arith.mulf %52, %56 : vector<2x16x16xf32>
    %58 = arith.truncf %57 : vector<2x16x16xf32> to vector<2x16x16xbf16>
    "tpu.trace_start"() <{level = 10 : i32, message = "bqk,bkd->bqd"}> : () -> ()
    %cst_20 = arith.constant dense<0.000000e+00> : vector<2x16x32xf32>
    %59 = tpu.matmul %58, %45, %cst_20 {dimension_numbers = #tpu.dot_dimension_numbers<[2], [1], [1], [2], [0, 0, 0, 1, 1, 2], [0], [0]>} : vector<2x16x16xbf16>, vector<2x16x32xbf16>, vector<2x16x32xf32> -> vector<2x16x32xf32>
    "tpu.trace_stop"() : () -> ()
    %60 = vector.shape_cast %59 : vector<2x16x32xf32> to vector<32x32xf32>
    %c0_21 = arith.constant 0 : index
    %c0_22 = arith.constant 0 : index
    %61 = vector.load %arg16[%c0_21, %c0_22] : memref<32x128xf32, #tpu.memory_space<vmem>>, vector<32x32xf32>
    tpu.vector_store %arg16[%c0_21, %c0_22], %60 {strides = array<i32>} : memref<32x128xf32, #tpu.memory_space<vmem>>, vector<32x32xf32>,
    %62 = vector.extract_strided_slice %33 {offsets = [0, 32], sizes = [32, 32], strides = [1, 1]} : vector<32x128xbf16> to vector<32x32xbf16>
    %63 = vector.shape_cast %62 : vector<32x32xbf16> to vector<2x16x32xbf16>
    %64 = vector.extract_strided_slice %34 {offsets = [0, 32], sizes = [32, 32], strides = [1, 1]} : vector<32x128xbf16> to vector<32x32xbf16>
    %65 = vector.shape_cast %64 : vector<32x32xbf16> to vector<2x16x32xbf16>
    %66 = vector.extract_strided_slice %35 {offsets = [0, 32], sizes = [32, 32], strides = [1, 1]} : vector<32x128xbf16> to vector<32x32xbf16>
    %67 = vector.shape_cast %66 : vector<32x32xbf16> to vector<2x16x32xbf16>
    "tpu.trace_start"() <{level = 10 : i32, message = "bqd,bkd->bqk"}> : () -> ()
    %cst_23 = arith.constant dense<0.000000e+00> : vector<2x16x16xf32>
    %68 = tpu.matmul %63, %65, %cst_23 {dimension_numbers = #tpu.dot_dimension_numbers<[2], [2], [1], [1], [0, 0, 0, 1, 1, 1], [0], [0]>} : vector<2x16x32xbf16>, vector<2x16x32xbf16>, vector<2x16x16xf32> -> vector<2x16x16xf32>
    "tpu.trace_stop"() : () -> ()
    %69 = arith.addf %68, %39 : vector<2x16x16xf32>
    %cst_24 = arith.constant dense<0xFF800000> : vector<2x16xf32>
    %70 = vector.multi_reduction <maximumf>, %69, %cst_24 [2] : vector<2x16x16xf32> to vector<2x16xf32>
    %71 = vector.shape_cast %70 : vector<2x16xf32> to vector<2x16x1xf32>
    %72 = vector.broadcast %71 : vector<2x16x1xf32> to vector<2x16x16xf32>
    %73 = arith.subf %69, %72 : vector<2x16x16xf32>
    %74 = math.exp %73 : vector<2x16x16xf32>
    %cst_25 = arith.constant dense<0.000000e+00> : vector<2x16xf32>
    %75 = vector.multi_reduction <add>, %74, %cst_25 [2] : vector<2x16x16xf32> to vector<2x16xf32>
    %76 = vector.shape_cast %75 : vector<2x16xf32> to vector<2x16x1xf32>
    %77 = tpu.reciprocal %76 {approx = true} : vector<2x16x1xf32> -> vector<2x16x1xf32>
    %78 = vector.broadcast %77 : vector<2x16x1xf32> to vector<2x16x16xf32>
    %79 = arith.mulf %74, %78 : vector<2x16x16xf32>
    %80 = arith.truncf %79 : vector<2x16x16xf32> to vector<2x16x16xbf16>
    "tpu.trace_start"() <{level = 10 : i32, message = "bqk,bkd->bqd"}> : () -> ()
    %cst_26 = arith.constant dense<0.000000e+00> : vector<2x16x32xf32>
    %81 = tpu.matmul %80, %67, %cst_26 {dimension_numbers = #tpu.dot_dimension_numbers<[2], [1], [1], [2], [0, 0, 0, 1, 1, 2], [0], [0]>} : vector<2x16x16xbf16>, vector<2x16x32xbf16>, vector<2x16x32xf32> -> vector<2x16x32xf32>
    "tpu.trace_stop"() : () -> ()
    %82 = vector.shape_cast %81 : vector<2x16x32xf32> to vector<32x32xf32>
    %c0_27 = arith.constant 0 : index
    %c32 = arith.constant 32 : index
    %83 = vector.load %arg16[%c0_27, %c32] : memref<32x128xf32, #tpu.memory_space<vmem>>, vector<32x32xf32>
    tpu.vector_store %arg16[%c0_27, %c32], %82 {strides = array<i32>} : memref<32x128xf32, #tpu.memory_space<vmem>>, vector<32x32xf32>,
    %84 = vector.extract_strided_slice %33 {offsets = [0, 64], sizes = [32, 32], strides = [1, 1]} : vector<32x128xbf16> to vector<32x32xbf16>
    %85 = vector.shape_cast %84 : vector<32x32xbf16> to vector<2x16x32xbf16>
    %86 = vector.extract_strided_slice %34 {offsets = [0, 64], sizes = [32, 32], strides = [1, 1]} : vector<32x128xbf16> to vector<32x32xbf16>
    %87 = vector.shape_cast %86 : vector<32x32xbf16> to vector<2x16x32xbf16>
    %88 = vector.extract_strided_slice %35 {offsets = [0, 64], sizes = [32, 32], strides = [1, 1]} : vector<32x128xbf16> to vector<32x32xbf16>
    %89 = vector.shape_cast %88 : vector<32x32xbf16> to vector<2x16x32xbf16>
    "tpu.trace_start"() <{level = 10 : i32, message = "bqd,bkd->bqk"}> : () -> ()
    %cst_28 = arith.constant dense<0.000000e+00> : vector<2x16x16xf32>
    %90 = tpu.matmul %85, %87, %cst_28 {dimension_numbers = #tpu.dot_dimension_numbers<[2], [2], [1], [1], [0, 0, 0, 1, 1, 1], [0], [0]>} : vector<2x16x32xbf16>, vector<2x16x32xbf16>, vector<2x16x16xf32> -> vector<2x16x16xf32>
    "tpu.trace_stop"() : () -> ()
    %91 = arith.addf %90, %39 : vector<2x16x16xf32>
    %cst_29 = arith.constant dense<0xFF800000> : vector<2x16xf32>
    %92 = vector.multi_reduction <maximumf>, %91, %cst_29 [2] : vector<2x16x16xf32> to vector<2x16xf32>
    %93 = vector.shape_cast %92 : vector<2x16xf32> to vector<2x16x1xf32>
    %94 = vector.broadcast %93 : vector<2x16x1xf32> to vector<2x16x16xf32>
    %95 = arith.subf %91, %94 : vector<2x16x16xf32>
    %96 = math.exp %95 : vector<2x16x16xf32>
    %cst_30 = arith.constant dense<0.000000e+00> : vector<2x16xf32>
    %97 = vector.multi_reduction <add>, %96, %cst_30 [2] : vector<2x16x16xf32> to vector<2x16xf32>
    %98 = vector.shape_cast %97 : vector<2x16xf32> to vector<2x16x1xf32>
    %99 = tpu.reciprocal %98 {approx = true} : vector<2x16x1xf32> -> vector<2x16x1xf32>
    %100 = vector.broadcast %99 : vector<2x16x1xf32> to vector<2x16x16xf32>
    %101 = arith.mulf %96, %100 : vector<2x16x16xf32>
    %102 = arith.truncf %101 : vector<2x16x16xf32> to vector<2x16x16xbf16>
    "tpu.trace_start"() <{level = 10 : i32, message = "bqk,bkd->bqd"}> : () -> ()
    %cst_31 = arith.constant dense<0.000000e+00> : vector<2x16x32xf32>
    %103 = tpu.matmul %102, %89, %cst_31 {dimension_numbers = #tpu.dot_dimension_numbers<[2], [1], [1], [2], [0, 0, 0, 1, 1, 2], [0], [0]>} : vector<2x16x16xbf16>, vector<2x16x32xbf16>, vector<2x16x32xf32> -> vector<2x16x32xf32>
    "tpu.trace_stop"() : () -> ()
    %104 = vector.shape_cast %103 : vector<2x16x32xf32> to vector<32x32xf32>
    %c0_32 = arith.constant 0 : index
    %c64 = arith.constant 64 : index
    %105 = vector.load %arg16[%c0_32, %c64] : memref<32x128xf32, #tpu.memory_space<vmem>>, vector<32x32xf32>
    tpu.vector_store %arg16[%c0_32, %c64], %104 {strides = array<i32>} : memref<32x128xf32, #tpu.memory_space<vmem>>, vector<32x32xf32>,
    %106 = vector.extract_strided_slice %33 {offsets = [0, 96], sizes = [32, 32], strides = [1, 1]} : vector<32x128xbf16> to vector<32x32xbf16>
    %107 = vector.shape_cast %106 : vector<32x32xbf16> to vector<2x16x32xbf16>
    %108 = vector.extract_strided_slice %34 {offsets = [0, 96], sizes = [32, 32], strides = [1, 1]} : vector<32x128xbf16> to vector<32x32xbf16>
    %109 = vector.shape_cast %108 : vector<32x32xbf16> to vector<2x16x32xbf16>
    %110 = vector.extract_strided_slice %35 {offsets = [0, 96], sizes = [32, 32], strides = [1, 1]} : vector<32x128xbf16> to vector<32x32xbf16>
    %111 = vector.shape_cast %110 : vector<32x32xbf16> to vector<2x16x32xbf16>
    "tpu.trace_start"() <{level = 10 : i32, message = "bqd,bkd->bqk"}> : () -> ()
    %cst_33 = arith.constant dense<0.000000e+00> : vector<2x16x16xf32>
    %112 = tpu.matmul %107, %109, %cst_33 {dimension_numbers = #tpu.dot_dimension_numbers<[2], [2], [1], [1], [0, 0, 0, 1, 1, 1], [0], [0]>} : vector<2x16x32xbf16>, vector<2x16x32xbf16>, vector<2x16x16xf32> -> vector<2x16x16xf32>
    "tpu.trace_stop"() : () -> ()
    %113 = arith.addf %112, %39 : vector<2x16x16xf32>
    %cst_34 = arith.constant dense<0xFF800000> : vector<2x16xf32>
    %114 = vector.multi_reduction <maximumf>, %113, %cst_34 [2] : vector<2x16x16xf32> to vector<2x16xf32>
    %115 = vector.shape_cast %114 : vector<2x16xf32> to vector<2x16x1xf32>
    %116 = vector.broadcast %115 : vector<2x16x1xf32> to vector<2x16x16xf32>
    %117 = arith.subf %113, %116 : vector<2x16x16xf32>
    %118 = math.exp %117 : vector<2x16x16xf32>
    %cst_35 = arith.constant dense<0.000000e+00> : vector<2x16xf32>
    %119 = vector.multi_reduction <add>, %118, %cst_35 [2] : vector<2x16x16xf32> to vector<2x16xf32>
    %120 = vector.shape_cast %119 : vector<2x16xf32> to vector<2x16x1xf32>
    %121 = tpu.reciprocal %120 {approx = true} : vector<2x16x1xf32> -> vector<2x16x1xf32>
    %122 = vector.broadcast %121 : vector<2x16x1xf32> to vector<2x16x16xf32>
    %123 = arith.mulf %118, %122 : vector<2x16x16xf32>
    %124 = arith.truncf %123 : vector<2x16x16xf32> to vector<2x16x16xbf16>
    "tpu.trace_start"() <{level = 10 : i32, message = "bqk,bkd->bqd"}> : () -> ()
    %cst_36 = arith.constant dense<0.000000e+00> : vector<2x16x32xf32>
    %125 = tpu.matmul %124, %111, %cst_36 {dimension_numbers = #tpu.dot_dimension_numbers<[2], [1], [1], [2], [0, 0, 0, 1, 1, 2], [0], [0]>} : vector<2x16x16xbf16>, vector<2x16x32xbf16>, vector<2x16x32xf32> -> vector<2x16x32xf32>
    "tpu.trace_stop"() : () -> ()
    %126 = vector.shape_cast %125 : vector<2x16x32xf32> to vector<32x32xf32>
    %c0_37 = arith.constant 0 : index
    %c96 = arith.constant 96 : index
    %127 = vector.load %arg16[%c0_37, %c96] : memref<32x128xf32, #tpu.memory_space<vmem>>, vector<32x32xf32>
    tpu.vector_store %arg16[%c0_37, %c96], %126 {strides = array<i32>} : memref<32x128xf32, #tpu.memory_space<vmem>>, vector<32x32xf32>,
    %c0_38 = arith.constant 0 : index
    %c0_39 = arith.constant 0 : index
    %128 = vector.load %arg16[%c0_38, %c0_39] : memref<32x128xf32, #tpu.memory_space<vmem>>, vector<32x128xf32>
    %129 = arith.truncf %128 : vector<32x128xf32> to vector<32x128xbf16>
    %c0_40 = arith.constant 0 : index
    %c0_41 = arith.constant 0 : index
    %130 = vector.load %arg7[%c0_40, %c0_41] : memref<128x128xbf16, #tpu.memory_space<vmem>>, vector<128x128xbf16>
    %cst_42 = arith.constant dense<0.000000e+00> : vector<32x128xf32>
    %131 = tpu.matmul %129, %130, %cst_42 {dimension_numbers = #tpu.dot_dimension_numbers<[1], [0], [0], [1], [0, 0, 1, 1], [], []>} : vector<32x128xbf16>, vector<128x128xbf16>, vector<32x128xf32> -> vector<32x128xf32>
    %c0_43 = arith.constant 0 : index
    %c0_44 = arith.constant 0 : index
    %132 = vector.load %arg8[%c0_43, %c0_44] : memref<1x128xf32, #tpu.memory_space<vmem>>, vector<1x128xf32>
    %133 = vector.broadcast %132 : vector<1x128xf32> to vector<32x128xf32>
    %134 = arith.addf %131, %133 : vector<32x128xf32>
    %135 = arith.addf %1, %134 : vector<32x128xf32>
    %c0_45 = arith.constant 0 : index
    %c0_46 = arith.constant 0 : index
    %136 = vector.load %arg9[%c0_45, %c0_46] : memref<1x128xf32, #tpu.memory_space<vmem>>, vector<1x128xf32>
    %c0_47 = arith.constant 0 : index
    %c0_48 = arith.constant 0 : index
    %137 = vector.load %arg10[%c0_47, %c0_48] : memref<1x128xf32, #tpu.memory_space<vmem>>, vector<1x128xf32>
    %cst_49 = arith.constant dense<0.000000e+00> : vector<32xf32>
    %138 = vector.multi_reduction <add>, %135, %cst_49 [1] : vector<32x128xf32> to vector<32xf32>
    %139 = vector.shape_cast %138 : vector<32xf32> to vector<32x1xf32>
    %cst_50 = arith.constant 1.280000e+02 : f32
    %140 = vector.broadcast %cst_50 : f32 to vector<32x1xf32>
    %141 = arith.divf %139, %140 : vector<32x1xf32>
    %142 = vector.broadcast %141 : vector<32x1xf32> to vector<32x128xf32>
    %143 = arith.subf %135, %142 : vector<32x128xf32>
    %144 = arith.mulf %143, %143 : vector<32x128xf32>
    %cst_51 = arith.constant dense<0.000000e+00> : vector<32xf32>
    %145 = vector.multi_reduction <add>, %144, %cst_51 [1] : vector<32x128xf32> to vector<32xf32>
    %146 = vector.shape_cast %145 : vector<32xf32> to vector<32x1xf32>
    %cst_52 = arith.constant 1.280000e+02 : f32
    %147 = vector.broadcast %cst_52 : f32 to vector<32x1xf32>
    %148 = arith.divf %146, %147 : vector<32x1xf32>
    %149 = vector.broadcast %141 : vector<32x1xf32> to vector<32x128xf32>
    %150 = arith.subf %135, %149 : vector<32x128xf32>
    %cst_53 = arith.constant 9.99999974E-6 : f32
    %151 = vector.broadcast %cst_53 : f32 to vector<32x1xf32>
    %152 = arith.addf %148, %151 : vector<32x1xf32>
    %153 = math.rsqrt %152 : vector<32x1xf32>
    %154 = vector.broadcast %153 : vector<32x1xf32> to vector<32x128xf32>
    %155 = arith.mulf %150, %154 : vector<32x128xf32>
    %156 = vector.broadcast %136 : vector<1x128xf32> to vector<32x128xf32>
    %157 = arith.mulf %155, %156 : vector<32x128xf32>
    %158 = vector.broadcast %137 : vector<1x128xf32> to vector<32x128xf32>
    %159 = arith.addf %157, %158 : vector<32x128xf32>
    %160 = arith.truncf %159 : vector<32x128xf32> to vector<32x128xbf16>
    %c0_54 = arith.constant 0 : index
    %c0_55 = arith.constant 0 : index
    %161 = vector.load %arg11[%c0_54, %c0_55] : memref<128x512xbf16, #tpu.memory_space<vmem>>, vector<128x512xbf16>
    %cst_56 = arith.constant dense<0.000000e+00> : vector<32x512xf32>
    %162 = tpu.matmul %160, %161, %cst_56 {dimension_numbers = #tpu.dot_dimension_numbers<[1], [0], [0], [1], [0, 0, 1, 1], [], []>} : vector<32x128xbf16>, vector<128x512xbf16>, vector<32x512xf32> -> vector<32x512xf32>
    %c0_57 = arith.constant 0 : index
    %c0_58 = arith.constant 0 : index
    %163 = vector.load %arg12[%c0_57, %c0_58] : memref<1x512xf32, #tpu.memory_space<vmem>>, vector<1x512xf32>
    %164 = vector.broadcast %163 : vector<1x512xf32> to vector<32x512xf32>
    %165 = arith.addf %162, %164 : vector<32x512xf32>
    %cst_59 = arith.constant -1.702000e+00 : f32
    %166 = vector.broadcast %cst_59 : f32 to vector<32x512xf32>
    %167 = arith.mulf %166, %165 : vector<32x512xf32>
    %168 = math.exp %167 : vector<32x512xf32>
    %cst_60 = arith.constant 1.000000e+00 : f32
    %169 = vector.broadcast %cst_60 : f32 to vector<32x512xf32>
    %170 = arith.addf %169, %168 : vector<32x512xf32>
    %171 = tpu.reciprocal %170 {approx = true} : vector<32x512xf32> -> vector<32x512xf32>
    %172 = arith.mulf %165, %171 : vector<32x512xf32>
    %173 = arith.truncf %172 : vector<32x512xf32> to vector<32x512xbf16>
    %c0_61 = arith.constant 0 : index
    %c0_62 = arith.constant 0 : index
    %174 = vector.load %arg13[%c0_61, %c0_62] : memref<512x128xbf16, #tpu.memory_space<vmem>>, vector<512x128xbf16>
    %cst_63 = arith.constant dense<0.000000e+00> : vector<32x128xf32>
    %175 = tpu.matmul %173, %174, %cst_63 {dimension_numbers = #tpu.dot_dimension_numbers<[1], [0], [0], [1], [0, 0, 1, 1], [], []>} : vector<32x512xbf16>, vector<512x128xbf16>, vector<32x128xf32> -> vector<32x128xf32>
    %c0_64 = arith.constant 0 : index
    %c0_65 = arith.constant 0 : index
    %176 = vector.load %arg14[%c0_64, %c0_65] : memref<1x128xf32, #tpu.memory_space<vmem>>, vector<1x128xf32>
    %177 = vector.broadcast %176 : vector<1x128xf32> to vector<32x128xf32>
    %178 = arith.addf %175, %177 : vector<32x128xf32>
    %179 = arith.addf %135, %178 : vector<32x128xf32>
    %180 = vector.shape_cast %179 : vector<32x128xf32> to vector<2x16x128xf32>
    %c0_66 = arith.constant 0 : index
    %c0_67 = arith.constant 0 : index
    %c0_68 = arith.constant 0 : index
    %181 = vector.load %arg15[%c0_66, %c0_67, %c0_68] : memref<2x16x128xf32, #tpu.memory_space<vmem>>, vector<2x16x128xf32>
    tpu.vector_store %arg15[%c0_66, %c0_67, %c0_68], %180 {strides = array<i32>} : memref<2x16x128xf32, #tpu.memory_space<vmem>>, vector<2x16x128xf32>,
    return
  }
  func.func @transform_0(%arg0: i32) -> (i32, i32, i32) {
    %c0_i32 = arith.constant 0 : i32
    %c0_i32_0 = arith.constant 0 : i32
    %c0_i32_1 = arith.constant 0 : i32
    return %arg0, %c0_i32, %c0_i32_0 : i32, i32, i32
  }
  func.func @transform_1(%arg0: i32) -> (i32, i32) {
    %c0_i32 = arith.constant 0 : i32
    %c0_i32_0 = arith.constant 0 : i32
    %c0_i32_1 = arith.constant 0 : i32
    return %c0_i32, %c0_i32_0 : i32, i32
  }
  func.func @transform_2(%arg0: i32) -> (i32, i32) {
    %c0_i32 = arith.constant 0 : i32
    %c0_i32_0 = arith.constant 0 : i32
    %c0_i32_1 = arith.constant 0 : i32
    return %c0_i32, %c0_i32_0 : i32, i32
  }
  func.func @transform_3(%arg0: i32) -> (i32, i32) {
    %c0_i32 = arith.constant 0 : i32
    %c0_i32_0 = arith.constant 0 : i32
    %c0_i32_1 = arith.constant 0 : i32
    return %c0_i32, %c0_i32_0 : i32, i32
  }
  func.func @transform_4(%arg0: i32) -> (i32, i32) {
    %c0_i32 = arith.constant 0 : i32
    %c0_i32_0 = arith.constant 0 : i32
    %c0_i32_1 = arith.constant 0 : i32
    return %c0_i32, %c0_i32_0 : i32, i32
  }
  func.func @transform_5(%arg0: i32) -> (i32, i32) {
    %c0_i32 = arith.constant 0 : i32
    %c0_i32_0 = arith.constant 0 : i32
    %c0_i32_1 = arith.constant 0 : i32
    return %c0_i32, %c0_i32_0 : i32, i32
  }
  func.func @transform_6(%arg0: i32) -> (i32, i32) {
    %c0_i32 = arith.constant 0 : i32
    %c0_i32_0 = arith.constant 0 : i32
    %c0_i32_1 = arith.constant 0 : i32
    return %c0_i32, %c0_i32_0 : i32, i32
  }
  func.func @transform_7(%arg0: i32) -> (i32, i32) {
    %c0_i32 = arith.constant 0 : i32
    %c0_i32_0 = arith.constant 0 : i32
    %c0_i32_1 = arith.constant 0 : i32
    return %c0_i32, %c0_i32_0 : i32, i32
  }
  func.func @transform_8(%arg0: i32) -> (i32, i32) {
    %c0_i32 = arith.constant 0 : i32
    %c0_i32_0 = arith.constant 0 : i32
    %c0_i32_1 = arith.constant 0 : i32
    return %c0_i32, %c0_i32_0 : i32, i32
  }
  func.func @transform_9(%arg0: i32) -> (i32, i32) {
    %c0_i32 = arith.constant 0 : i32
    %c0_i32_0 = arith.constant 0 : i32
    %c0_i32_1 = arith.constant 0 : i32
    return %c0_i32, %c0_i32_0 : i32, i32
  }
  func.func @transform_10(%arg0: i32) -> (i32, i32) {
    %c0_i32 = arith.constant 0 : i32
    %c0_i32_0 = arith.constant 0 : i32
    %c0_i32_1 = arith.constant 0 : i32
    return %c0_i32, %c0_i32_0 : i32, i32
  }
  func.func @transform_11(%arg0: i32) -> (i32, i32) {
    %c0_i32 = arith.constant 0 : i32
    %c0_i32_0 = arith.constant 0 : i32
    %c0_i32_1 = arith.constant 0 : i32
    return %c0_i32, %c0_i32_0 : i32, i32
  }
  func.func @transform_12(%arg0: i32) -> (i32, i32) {
    %c0_i32 = arith.constant 0 : i32
    %c0_i32_0 = arith.constant 0 : i32
    %c0_i32_1 = arith.constant 0 : i32
    return %c0_i32, %c0_i32_0 : i32, i32
  }
  func.func @transform_13(%arg0: i32) -> (i32, i32) {
    %c0_i32 = arith.constant 0 : i32
    %c0_i32_0 = arith.constant 0 : i32
    %c0_i32_1 = arith.constant 0 : i32
    return %c0_i32, %c0_i32_0 : i32, i32
  }
  func.func @transform_14(%arg0: i32) -> (i32, i32, i32) {
    %c0_i32 = arith.constant 0 : i32
    %c0_i32_0 = arith.constant 0 : i32
    %c0_i32_1 = arith.constant 0 : i32
    return %arg0, %c0_i32, %c0_i32_0 : i32, i32, i32
  }
}

</mosaic_0001>

<bundles_post_ra>
// kernel: clip_forward.5
= control target key start
LH: loop header
LB: loop body
LE: loop exit
PB: predicated region body
PF: predicated region fallthrough
CT: control target
= control target key end

     0   :  { %8 = vsyncpa [#allocation3], 0  ;;  %s632_s0 = inlined_call_operand.vmem [shape: f32[4,16,128], index: 0, kind: input, shape index: {}]   ;;  %s633_s1 = inlined_call_operand.vmem [shape: f32[1,128], index: 1, kind: input, shape index: {}]   ;;  %s634_s2 = inlined_call_operand.vmem [shape: f32[1,128], index: 2, kind: input, shape index: {}]   ;;  %s635_s3 = inlined_call_operand.hbm [shape: f32[4,16,128], index: 3, kind: output, shape index: {}]  }
   0x1   :  { %10 = vsyncpa [#allocation3 + $0x1], 0  ;;  %s523_s12 = smov 0   ;;  %s525_s13 = smov 0  }
   0x2   :  { %s527_s14 = smov 0   ;;  %s529_s15 = smov 0  }
   0x3 LB: > { %s544_s16 = sadd.s32 4294967295, %s498_s15   ;;  %s365_s17 = sadd.s32 4294967294, %s498_s15   ;;  %s498_s15 = sphi %s529_s15, %s641_s15   ;;  %s494_s14 = sphi %s527_s14, %s640_s14   ;;  %s490_s13 = sphi %s525_s13, %s639_s13   ;;  %s486_s12 = sphi %s523_s12, %s638_s12  }
   0x4   : > { %s548_s18 = sadd.s32 1, %s498_s15   ;;  %s91_s19 = sadd.s32 1, %s494_s14 }
   0x5   : > { %s88_s20 = ssub.s32 %s498_s15, %s548_s18  ;;  %p101_p0 = scmp.ne.s32.totalorder %s494_s14, %s490_s13 }
   0x6   : > { %p89_p1 = scmp.eq.s32.totalorder %s88_s20, 0  ;;  %p102_p2 = scmp.eq.s32.totalorder %s544_s16, 1 }
   0x7   : > { %p107_p3 = scmp.ne.s32.totalorder %s490_s13, %s486_s12  ;;  %p108_p4 = scmp.eq.s32.totalorder %s365_s17, 1 }
   0x8   : > { %s559_s21 = scalar_select %p89_p1, %s494_s14, %s91_s19  }
   0x9   : > { %p561_p5 = por %p102_p2, %p101_p0  ;;  %p565_p6 = por %p108_p4, %p107_p3 }
   0xa   : > { %p368_p7 = scmp.ge.s32.totalorder %s498_s15, 1  ;;  %p142_p8 = scmp.lt.s32.totalorder %s498_s15, 3 }
   0xc   : > { %p143_p9 = pnand %p368_p7, %p142_p8 }
   0xd   : > { %s370_s24 = sshll.u32 (!%p143_p9), %s544_s16, 1  ;;  %s164_s29 = sand.u32 (!%p143_p9), 1, %s490_s13  }
   0xe   : > { %146 = sbr.rel (%p143_p9) target bundleno = 302 (0x12e), region = 32  ;;  %p168_p10 = scmp.lt.s32.totalorder (!%p143_p9), %s370_s24, 3 }
   0xf   : > { %s369_s7 = sshll.u32 (!%p143_p9), %s164_s29, 5  ;;  %s381_s8 = sshll.u32 (!%p143_p9), %s544_s16, 5 }
  0x10   : > { %s166_s9 = scalar_lea.vmem (!%p143_p9), [#allocation2], %s369_s7  ;;  %s299_s17 = scalar_lea.hbm (!%p143_p9), %s635_s3, %s381_s8 }
  0x11   : > { %s300_s16 = sshll.u32 (!%p143_p9), %s166_s9, 4  ;;  %s302_s19 = sshll.u32 (!%p143_p9), %s299_s17, 4  ;;  %s301_s16 = int_to_ptr.vmem [resolvable:$true] %s300_s16  ;;  %s303_s19 = int_to_ptr.hbm [resolvable:$true] %s302_s19 }
  0x12   : > { %s287_s20 = scalar_lea.sflag (!%p143_p9), [#allocation3], %s164_s29 }
  0x13   : > { %s643_s24 = smov (!%p168_p10, %s370_s24), 3  ;;  %v500_v4 = vmov 128.0   ;;  %v424_v53 = vld [vmem:[%s633_s1] ss:$0 sm:$0xff] }
  0x14   : > { %s379_s25 = sshll.u32 %s643_s24, 4  ;;  %426 = vrcp.f32 %v500_v4  ;;  %v425_v58 = vld [vmem:[%s634_s2] ss:$0 sm:$0xff]  ;;  %s450_s24 = sshra.s32 %s303_s19, 4  ;;  %s451_s24 = int_to_ptr.hbm [resolvable:$true] %s450_s24 }
  0x15   : > { %s172_s28 = scalar_lea.vmem %s632_s0, %s379_s25  ;;  %s452_s25 = scalar_lea.hbm %s451_s24, 32 }
  0x16   : > { %v177_v0 = vld [vmem:[%s172_s28 + $0x10] sm:$0xff]  ;;  %v175_v1 = vld [vmem:[%s172_s28] sm:$0xff]  ;;  %v178_v2 = vld [vmem:[%s172_s28 + $0x18] sm:$0xff]  ;;  %p453_p11 = scmp.ne.s32.totalorder %s451_s24, %s452_s25  ;;  %p457_p0 = scmp.lt.s32.totalorder %s451_s24, %s635_s3 }
  0x17   : > { %185 = vadd.xlane.f32.xlu1 %v177_v0  ;;  %181 = vadd.xlane.f32.xlu0 %v175_v1  ;;  %v176_v3 = vld [vmem:[%s172_s28 + $0x8] sm:$0xff]  ;;  %s456_s28 = scalar_lea.hbm %s635_s3, 64 }
  0x18   : > { %p454_p12 = pnand %p453_p11, %p561_p5  ;;  %p458_p1 = scmp.lt.s32.totalorder %s456_s28, %s452_s25 }
  0x1a   : > { %v427_v5 = vpop.eup %426  ;;  %p455_p13 = pneg %p454_p12  ;;  %p459_p2 = por %p458_p1, %p457_p0 }
  0x1b   : > { %v190_v6 = vmul.f32 128.0, %v427_v5  ;;  %vm194_vm0 = vweird.f32 %v427_v5 }
  0x1c   : > { %p460_p3 = pnand %p459_p2, %p455_p13 }
  0x1d   : > { %v191_v7 = vsub.f32 1.0, %v190_v6 }
  0x1f   : > { %187 = vadd.xlane.f32.xlu1 %v178_v2  ;;  %183 = vadd.xlane.f32.xlu0 %v176_v3  ;;  %v192_v8 = vmul.f32 %v427_v5, %v191_v7 }
  0x21   : > { %v193_v9 = vadd.f32 %v427_v5, %v192_v8 }
  0x23   : > { %v195_v10 = vsel %vm194_vm0, %v427_v5, %v193_v9 }
  0x8a   : > { %v186_v11 = vpop.xlane.xlu1 %185  ;;  %v182_v12 = vpop.xlane.xlu0 %181 }
  0x8b   : > { %v198_v13 = vmul.f32 %v195_v10, %v186_v11  ;;  %v196_v14 = vmul.f32 %v195_v10, %v182_v12 }
  0x8d   : > { %v575_v15 = vsub.f32 %v177_v0, %v198_v13  ;;  %v200_v16 = vsub.f32 %v175_v1, %v196_v14 }
  0x8f   : > { %v206_v17 = vmul.f32 %v575_v15, %v575_v15  ;;  %v204_v18 = vmul.f32 %v200_v16, %v200_v16 }
  0x91   : > { %212 = vadd.xlane.f32.xlu0 %v206_v17  ;;  %208 = vadd.xlane.f32.xlu2 %v204_v18 }
  0x92   : > { %v188_v19 = vpop.xlane.xlu1 %187  ;;  %v184_v20 = vpop.xlane.xlu0 %183 }
  0x93   : > { %v199_v21 = vmul.f32 %v195_v10, %v188_v19  ;;  %v197_v22 = vmul.f32 %v195_v10, %v184_v20 }
  0x95   : > { %v579_v23 = vsub.f32 %v178_v2, %v199_v21  ;;  %v581_v24 = vsub.f32 %v176_v3, %v197_v22 }
  0x97   : > { %v207_v25 = vmul.f32 %v579_v23, %v579_v23  ;;  %v205_v26 = vmul.f32 %v581_v24, %v581_v24 }
  0x99   : > { %214 = vadd.xlane.f32.xlu1 %v207_v25  ;;  %210 = vadd.xlane.f32.xlu2 %v205_v26 }
 0x104   : > { %v209_v27 = vpop.xlane.xlu2 %208  ;;  %v213_v28 = vpop.xlane.xlu0 %212 }
 0x105   : > { %v216_v29 = vmul.f32 %v209_v27, %v195_v10  ;;  %v218_v30 = vmul.f32 %v213_v28, %v195_v10 }
 0x107   : > { %v220_v31 = vadd.f32 1e-05, %v216_v29  ;;  %v222_v32 = vadd.f32 1e-05, %v218_v30 }
 0x109   : > { %428 = vrsqrt.f32 %v220_v31  ;;  %vm230_vm3 = vweird.f32 %v220_v31  ;;  %vm250_vm5 = vweird.f32 %v222_v32 }
 0x10a   : > { %430 = vrsqrt.f32 %v222_v32 }
 0x10c   : > { %v215_v33 = vpop.xlane.xlu1 %214  ;;  %v211_v34 = vpop.xlane.xlu2 %210 }
 0x10d   : > { %v219_v35 = vmul.f32 %v215_v33, %v195_v10  ;;  %v217_v36 = vmul.f32 %v211_v34, %v195_v10 }
 0x10f   : > { %v429_v37 = vpop.eup %428  ;;  %v223_v38 = vadd.f32 1e-05, %v219_v35  ;;  %v221_v39 = vadd.f32 1e-05, %v217_v36 }
 0x110   : > { %v431_v40 = vpop.eup %430  ;;  %v225_v41 = vmul.f32 %v429_v37, %v220_v31  ;;  %vm231_vm1 = vweird.f32 %v429_v37 }
 0x111   : > { %v245_v42 = vmul.f32 %v431_v40, %v222_v32  ;;  %432 = vrsqrt.f32 %v223_v38  ;;  %vm251_vm2 = vweird.f32 %v431_v40  ;;  %vm232_vm4 = vmor %vm230_vm3, %vm231_vm1  ;;  %vm260_vm9 = vweird.f32 %v223_v38 }
 0x112   : > { %v226_v43 = vmul.f32 %v429_v37, %v225_v41  ;;  %434 = vrsqrt.f32 %v221_v39  ;;  %vm252_vm6 = vmor %vm250_vm5, %vm251_vm2  ;;  %vm240_vm11 = vweird.f32 %v221_v39 }
 0x113   : > { %v246_v44 = vmul.f32 %v431_v40, %v245_v42 }
 0x114   : > { %v227_v45 = vmul.f32 0.5, %v226_v43 }
 0x115   : > { %v247_v46 = vmul.f32 0.5, %v246_v44 }
 0x116   : > { %v228_v47 = vsub.f32 1.5, %v227_v45 }
 0x117   : > { %v433_v48 = vpop.eup %432  ;;  %v248_v49 = vsub.f32 1.5, %v247_v46 }
 0x118   : > { %v435_v50 = vpop.eup %434  ;;  %v229_v51 = vmul.f32 %v429_v37, %v228_v47  ;;  %v255_v52 = vmul.f32 %v433_v48, %v223_v38  ;;  %vm261_vm7 = vweird.f32 %v433_v48 }
 0x119   : > { %v249_v54 = vmul.f32 %v431_v40, %v248_v49  ;;  %v235_v55 = vmul.f32 %v435_v50, %v221_v39  ;;  %vm241_vm8 = vweird.f32 %v435_v50  ;;  %vm262_vm10 = vmor %vm260_vm9, %vm261_vm7 }
 0x11a   : > { %v233_v56 = vsel %vm232_vm4, %v429_v37, %v229_v51  ;;  %v256_v57 = vmul.f32 %v433_v48, %v255_v52  ;;  %vm242_vm12 = vmor %vm240_vm11, %vm241_vm8 }
 0x11b   : > { %v264_v59 = vmul.f32 %v233_v56, %v200_v16  ;;  %v253_v60 = vsel %vm252_vm6, %v431_v40, %v249_v54  ;;  %v236_v61 = vmul.f32 %v435_v50, %v235_v55 }
 0x11c   : > { %v266_v62 = vmul.f32 %v253_v60, %v575_v15  ;;  %v257_v63 = vmul.f32 0.5, %v256_v57 }
 0x11d   : > { %v271_v0 = vmul.f32 %v424_v53, %v264_v59  ;;  %v237_v1 = vmul.f32 0.5, %v236_v61 }
 0x11e   : > { %v273_v2 = vmul.f32 %v424_v53, %v266_v62  ;;  %v258_v3 = vsub.f32 1.5, %v257_v63 }
 0x11f   : > { %v278_v4 = vadd.f32 %v425_v58, %v271_v0  ;;  %v238_v5 = vsub.f32 1.5, %v237_v1 }
 0x120   : > { %v280_v6 = vadd.f32 %v425_v58, %v273_v2  ;;  %v259_v7 = vmul.f32 %v433_v48, %v258_v3 }
 0x121   : > { %282 = vst [vmem:[%s166_s9] sm:$0xff] %v278_v4  ;;  %v239_v8 = vmul.f32 %v435_v50, %v238_v5 }
 0x122   : > { %284 = vst [vmem:[%s166_s9 + $0x10] sm:$0xff] %v280_v6  ;;  %v263_v9 = vsel %vm262_vm10, %v433_v48, %v259_v7 }
 0x123   : > { %v267_v10 = vmul.f32 %v263_v9, %v579_v23  ;;  %v243_v11 = vsel %vm242_vm12, %v435_v50, %v239_v8 }
 0x124   : > { %v265_v12 = vmul.f32 %v243_v11, %v581_v24 }
 0x125   : > { %v274_v13 = vmul.f32 %v424_v53, %v267_v10 }
 0x126   : > { %v272_v14 = vmul.f32 %v424_v53, %v265_v12 }
 0x127   : > { %v281_v15 = vadd.f32 %v425_v58, %v274_v13 }
 0x128   : > { %v279_v16 = vadd.f32 %v425_v58, %v272_v14 }
 0x129   : > { %285 = vst [vmem:[%s166_s9 + $0x18] sm:$0xff] %v281_v15 }
 0x12a   : > { %283 = vst [vmem:[%s166_s9 + $0x8] sm:$0xff] %v279_v16 }
 0x12b   : > { %463 = shalt.err (!%p460_p3)
}
 0x12c   : > { %s501_s29 = smov 128   ;;  %s502_s5 = smov 8  }
 0x12d   : > { %382 = dma.vmem_to_hbm [thread:$0]  (%p561_p5), %s301_s16, 512, %s303_s19, %s287_s20, %s501_s29, %s501_s29, %s502_s5  }
 0x12e PF: > { %p388_p4 = scmp.ge.s32.totalorder %s498_s15, 2  ;;  %s317_s6 = sand.u32 1, %s486_s12  }
 0x12f   : > { %s318_s7 = scalar_lea.sflag [#allocation3], %s317_s6 }
 0x130   : > { %p385_p7 = pnand %p388_p4, %p565_p6 }
 0x132   : > { %p386_p8 = pneg %p385_p7 }
 0x134   : > { %481 = dma.done.wait (%p386_p8), %s318_s7, 512  }
 0x135   : > { %483 = vsyncadd (%p386_p8), %s318_s7, 4294966784  ;;  %p13_p9 = scmp.ge.s32.totalorder %s548_s18, 4   ;;  %s638_s12 = smov %s490_s13 }
 0x136   : > { %s639_s13 = smov %s494_s14  ;;  %s640_s14 = smov %s559_s21 }
 0x137   : > { %s641_s15 = smov %s548_s18  ;;  %15 = sbr.rel (!%p13_p9) target bundleno = 3 (0x3), region = 67 }
 0x13c   :  { %324 = vsyncpa [#allocation3], 1 }
 0x13d   :  { %326 = vsyncpa [#allocation3 + $0x1], 1 }

// kernel: clip_forward.4
= control target key start
LH: loop header
LB: loop body
LE: loop exit
PB: predicated region body
PF: predicated region fallthrough
CT: control target
= control target key end

     0   :  { %s4138_s0 = inlined_call_operand.vmem [shape: f32[4,16,128], index: 0, kind: input, shape index: {}]   ;;  %s4139_s1 = inlined_call_operand.vmem [shape: f32[16,16], index: 1, kind: input, shape index: {}]   ;;  %s4140_s2 = inlined_call_operand.vmem [shape: f32[1,128], index: 2, kind: input, shape index: {}]   ;;  %s4141_s3 = inlined_call_operand.vmem [shape: f32[1,128], index: 3, kind: input, shape index: {}]   ;;  %s4142_s4 = inlined_call_operand.hbm [shape: bf16[128,384], index: 4, kind: input, shape index: {}]   ;;  %s4143_s5 = inlined_call_operand.vmem [shape: f32[1,384], index: 5, kind: input, shape index: {}]   ;;  %s4144_s6 = inlined_call_operand.hbm [shape: bf16[128,128], index: 6, kind: input, shape index: {}]   ;;  %s4145_s7 = inlined_call_operand.vmem [shape: f32[1,128], index: 7, kind: input, shape index: {}]   ;;  %s4146_s8 = inlined_call_operand.vmem [shape: f32[1,128], index: 8, kind: input, shape index: {}]   ;;  %s4147_s9 = inlined_call_operand.vmem [shape: f32[1,128], index: 9, kind: input, shape index: {}]   ;;  %s4148_s10 = inlined_call_operand.hbm [shape: bf16[128,512], index: 10, kind: input, shape index: {}]   ;;  %s4149_s11 = inlined_call_operand.vmem [shape: f32[1,512], index: 11, kind: input, shape index: {}]   ;;  %s4150_s12 = inlined_call_operand.hbm [shape: bf16[512,128], index: 12, kind: input, shape index: {}]   ;;  %s4151_s13 = inlined_call_operand.vmem [shape: f32[1,128], index: 13, kind: input, shape index: {}]   ;;  %s4152_s14 = inlined_call_operand.vmem [shape: f32[4,16,128], index: 14, kind: output, shape index: {}]  }
   0x1   :  { %4154 = sst [smem:[#allocation13_spill]] %s4142_s4 }
   0x2   :  { %4155 = sst [smem:[#allocation14_spill]] %s4144_s6 }
   0x3   :  { %4156 = sst [smem:[#allocation15_spill]] %s4149_s11 }
   0x4   :  { %4157 = sst [smem:[#allocation16_spill]] %s4151_s13 }
   0x5   :  { %4158 = sst [smem:[#allocation17_spill]] %s4152_s14 }
   0x6   :  { %19 = vsyncpa [#allocation4], 0 }
   0x7   :  { %20 = vsyncpa [#allocation6], 0 }
   0x8   :  { %21 = vsyncpa [#allocation9], 0  ;;  %s3584_s29 = smov 0  }
   0x9 LB: > { %s4159_s6 = sld [smem:[#allocation14_spill]]  ;;  %s4153_s17 = sadd.s32 4294967295, %s3493_s29   ;;  %s3493_s29 = sphi %s3584_s29, %s27_s29  }
   0xa   : > { %p2623_p0 = scmp.ge.s32.totalorder %s3493_s29, 1  ;;  %p357_p1 = scmp.lt.s32.totalorder %s3493_s29, 3 }
   0xb   : > { %p3597_p2 = scmp.eq.s32.totalorder %s4153_s17, 0  ;;  %s3495_s20 = smov [#allocation5]  }
   0xc   : > { %p3601_p3 = pnand %p2623_p0, %p357_p1  ;;  %s396_s21 = sshll.u32 %s3495_s20, 4  ;;  %s397_s21 = int_to_ptr.vmem [resolvable:$true] %s396_s21 }
   0xd   : > { %s4162_s4 = sld [smem:[#allocation13_spill]]  ;;  %s3496_s26 = smov [#allocation3]  }
   0xe   : > { %p3156_p4 = pneg %p3601_p3  ;;  %s379_s27 = sshll.u32 %s3496_s26, 4  ;;  %s380_s27 = int_to_ptr.vmem [resolvable:$true] %s379_s27 }
   0xf   : > { %s394_s16 = sshll.u32 %s4159_s6, 4  ;;  %s3497_s28 = smov 64   ;;  %s395_s16 = int_to_ptr.hbm [resolvable:$true] %s394_s16 }
  0x10   : > { %p3612_p5 = pnand %p3597_p2, %p3156_p4  ;;  %s3498_s30 = smov 4  }
  0x11   : > { %s417_s22 = sshll.u32 %s4148_s10, 4  ;;  %s3499_s23 = smov 192   ;;  %s418_s22 = int_to_ptr.hbm [resolvable:$true] %s417_s22 }
  0x12   : > { %3162 = dma.hbm_to_vmem [thread:$0]  (!%p3612_p5), %s395_s16, 1024, %s397_s21, [#allocation6], %s3497_s28, %s3497_s28, %s3498_s30  }
  0x13   : > { %s377_s24 = sshll.u32 %s4162_s4, 4  ;;  %s3500_s17 = smov 12   ;;  %s378_s24 = int_to_ptr.hbm [resolvable:$true] %s377_s24 }
  0x14   : > { %3159 = dma.hbm_to_vmem [thread:$0]  (!%p3612_p5), %s378_s24, 3072, %s380_s27, [#allocation4], %s3499_s23, %s3499_s23, %s3500_s17  }
  0x15   : > { %s3501_s4 = smov [#allocation7]   ;;  %s3502_s14 = smov 256  }
  0x16   : > { %s419_s6 = sshll.u32 %s3501_s4, 4  ;;  %s3503_s26 = smov 16   ;;  %s420_s6 = int_to_ptr.vmem [resolvable:$true] %s419_s6 }
  0x17   : > { %3165 = dma.hbm_to_vmem [thread:$0]  (!%p3612_p5), %s418_s22, 4096, %s420_s6, [#allocation6], %s3502_s14, %s3502_s14, %s3503_s26  }
  0x18   : > { %s434_s16 = sshll.u32 %s4150_s12, 4  ;;  %s3504_s21 = smov [#allocation8]   ;;  %s435_s16 = int_to_ptr.hbm [resolvable:$true] %s434_s16 }
  0x19   : > { %s436_s15 = sshll.u32 %s3504_s21, 4  ;;  %465 = sbr.rel (%p3601_p3) target bundleno = 2056 (0x808), region = 76  ;;  %s437_s15 = int_to_ptr.vmem [resolvable:$true] %s436_s15 }
  0x1a   : > { %3168 = dma.hbm_to_vmem [thread:$0]  (!%p3612_p5), %s435_s16, 4096, %s437_s15, [#allocation9], %s3497_s28, %s3497_s28, %s3498_s30  }
  0x1e   : > { %3480 = dma.done.wait (%p3597_p2), [#allocation4], 3072  }
  0x1f   : > { %3482 = vsyncadd (%p3597_p2), [#allocation4], 4294964224 }
  0x20   : > { %3484 = dma.done.wait (%p3597_p2), [#allocation6], 5120  }
  0x21   : > { %3486 = vsyncadd (%p3597_p2), [#allocation6], 4294962176 }
  0x22   : > { %3488 = dma.done.wait (%p3597_p2), [#allocation9], 4096  }
  0x23   : > { %3490 = vsyncadd (%p3597_p2), [#allocation9], 4294963200  ;;  %s4164_s4 = sadd.s32 4294967295, %s3493_s29   ;;  %v3505_v4 = vmov 128.0   ;;  %v2726_v27 = vld [vmem:[#allocation3 + $0xa8] sm:$0xf] }
  0x24   : > { %s2634_s6 = sshll.u32 %s4164_s4, 1  ;;  %3205 = vrcp.f32 %v3505_v4  ;;  %v3066_v28 = vld [vmem:[#allocation3 + $0xb0] sm:$0xf0]  ;;  %v3065_v29 = vld [vmem:[#allocation3 + $0xac] sm:$0xf]  ;;  %s3506_s30 = smov 96  }
  0x25   : > { %p530_p6 = scmp.lt.s32.totalorder %s2634_s6, 3  ;;  %v2727_v30 = vor.u32 %v3066_v28, %v2726_v27  ;;  %v2728_v31 = vld [vmem:[#allocation3 + $0xb4] sm:$0xf0]  ;;  %v2734_v32 = vld [vmem:[#allocation3 + $0xb0] sm:$0xf]  ;;  %s3507_s20 = smov 64  }
  0x26   : > { %v3067_v33 = vld [vmem:[#allocation3 + $0xb8] sm:$0xf0]  ;;  %v2731_v34 = vor.u32 %v3065_v29, %v2728_v31  ;;  %v2714_v36 = vld [vmem:[#allocation3 + $0x90] sm:$0xf]  ;;  %v3062_v38 = vld [vmem:[#allocation3 + $0x94] sm:$0xf] }
  0x27   : > { %s4169_s6 = smov (!%p530_p6, %s2634_s6), 3  ;;  %v2735_v35 = vor.u32 %v3067_v33, %v2734_v32  ;;  %821 = vmatpush.bf16.msra.mxu0 %v2727_v30  ;;  %v3063_v37 = vld [vmem:[#allocation3 + $0x98] sm:$0xf0]  ;;  %v2716_v40 = vld [vmem:[#allocation3 + $0x9c] sm:$0xf0]  ;;  %vm902_vm13 = vcmask 261120  }
  0x28   : > { %s3042_s11 = sshll.u32 %s4169_s6, 4  ;;  %840 = vmatpush.bf16.msra.mxu1 %v2731_v34  ;;  %v2715_v39 = vor.u32 %v3063_v37, %v2714_v36  ;;  %v2722_v41 = vld [vmem:[#allocation3 + $0x98] sm:$0xf]  ;;  %v3064_v42 = vld [vmem:[#allocation3 + $0xa0] sm:$0xf0]  ;;  %v2719_v43 = vor.u32 %v3062_v38, %v2716_v40  ;;  %s3508_s22 = smov 32  }
  0x29   : > { %s3654_s17 = scalar_lea.vmem %s4138_s0, %s3042_s11  ;;  %859 = vmatpush.bf16.msra.mxu2 %v2735_v35  ;;  %v2723_v44 = vor.u32 %v3064_v42, %v2722_v41  ;;  %v2702_v45 = vld [vmem:[#allocation3 + $0x78] sm:$0xf]  ;;  %v3060_v46 = vld [vmem:[#allocation3 + $0x80] sm:$0xf0]  ;;  %v3059_v47 = vld [vmem:[#allocation3 + $0x7c] sm:$0xf] }
  0x2a   : > { %v546_v0 = vld [vmem:[%s3654_s17 + $0x10] sm:$0xff]  ;;  %v544_v1 = vld [vmem:[%s3654_s17] sm:$0xff]  ;;  %v547_v2 = vld [vmem:[%s3654_s17 + $0x18] sm:$0xff]  ;;  %v3206_v5 = vpop.eup %3205  ;;  %v2703_v48 = vor.u32 %v3060_v46, %v2702_v45  ;;  %vm949_vm14 = vcmask 130048   ;;  %vm1234_vm15 = vcmask 523520   ;;  %s4165_s25 = sld [smem:[#allocation15_spill]] }
  0x2b   : > { %554 = vadd.xlane.f32.xlu1 %v546_v0  ;;  %550 = vadd.xlane.f32.xlu0 %v544_v1  ;;  %v545_v3 = vld [vmem:[%s3654_s17 + $0x8] sm:$0xff]  ;;  %v559_v6 = vmul.f32 128.0, %v3206_v5  ;;  %vm563_vm0 = vweird.f32 %v3206_v5  ;;  %v2710_v50 = vld [vmem:[#allocation3 + $0x80] sm:$0xf]  ;;  %v3056_v56 = vld [vmem:[#allocation3 + $0x64] sm:$0xf] }
  0x2c   : > { %822 = vmatpush.bf16.msra.mxu0 %v2715_v39  ;;  %841 = vmatpush.bf16.msra.mxu1 %v2719_v43  ;;  %v2704_v49 = vld [vmem:[#allocation3 + $0x84] sm:$0xf0]  ;;  %v3061_v51 = vld [vmem:[#allocation3 + $0x88] sm:$0xf0]  ;;  %v2690_v54 = vld [vmem:[#allocation3 + $0x60] sm:$0xf] }
  0x2d   : > { %v560_v7 = vsub.f32 1.0, %v559_v6  ;;  %860 = vmatpush.bf16.msra.mxu2 %v2723_v44  ;;  %v2707_v52 = vor.u32 %v3059_v47, %v2704_v49  ;;  %v2711_v53 = vor.u32 %v3061_v51, %v2710_v50  ;;  %v3057_v55 = vld [vmem:[#allocation3 + $0x68] sm:$0xf0]  ;;  %v2692_v58 = vld [vmem:[#allocation3 + $0x6c] sm:$0xf0]  ;;  %s4167_s23 = sld [smem:[#allocation17_spill]] }
  0x2e   : > { %v2691_v57 = vor.u32 %v3057_v55, %v2690_v54  ;;  %v2698_v59 = vld [vmem:[#allocation3 + $0x68] sm:$0xf]  ;;  %v3058_v60 = vld [vmem:[#allocation3 + $0x70] sm:$0xf0]  ;;  %v2695_v61 = vor.u32 %v3056_v56, %v2692_v58  ;;  %v2686_v4 = vld [vmem:[#allocation3 + $0x50] sm:$0xf] }
  0x2f   : > { %v561_v8 = vmul.f32 %v3206_v5, %v560_v7  ;;  %v2699_v62 = vor.u32 %v3058_v60, %v2698_v59  ;;  %v2678_v63 = vld [vmem:[#allocation3 + $0x48] sm:$0xf]  ;;  %v2662_v27 = vld [vmem:[#allocation3 + $0x20] sm:$0xf]  ;;  %v3049_v28 = vld [vmem:[#allocation3 + $0x28] sm:$0xf0] }
  0x30   : > { %823 = vmatpush.bf16.msra.mxu0 %v2703_v48  ;;  %842 = vmatpush.bf16.msra.mxu1 %v2707_v52  ;;  %v2663_v31 = vor.u32 %v3049_v28, %v2662_v27  ;;  %v2642_v32 = vld [vmem:[#allocation3] sm:$0xf]  ;;  %v3045_v33 = vld [vmem:[#allocation3 + $0x8] sm:$0xf0]  ;;  %v3044_v34 = vld [vmem:[#allocation3 + $0x4] sm:$0xf] }
  0x31   : > { %v562_v9 = vadd.f32 %v3206_v5, %v561_v8  ;;  %861 = vmatpush.bf16.msra.mxu2 %v2711_v53  ;;  %v2666_v8 = vld [vmem:[#allocation3 + $0x30] sm:$0xf]  ;;  %v2643_v37 = vor.u32 %v3045_v33, %v2642_v32  ;;  %v2650_v39 = vld [vmem:[#allocation3 + $0x8] sm:$0xf]  ;;  %v3046_v40 = vld [vmem:[#allocation3 + $0x10] sm:$0xf0] }
  0x32   : > { %v2644_v38 = vld [vmem:[#allocation3 + $0xc] sm:$0xf0]  ;;  %v2651_v42 = vor.u32 %v3046_v40, %v2650_v39 }
  0x33   : > { %556 = vadd.xlane.f32.xlu1 %v547_v2  ;;  %552 = vadd.xlane.f32.xlu0 %v545_v3  ;;  %v3660_v10 = vsel %vm563_vm0, %v3206_v5, %v562_v9  ;;  %v3055_v5 = vld [vmem:[#allocation3 + $0x58] sm:$0xf0]  ;;  %v2647_v41 = vor.u32 %v3044_v34, %v2644_v38  ;;  %vm1415_vm0 = vcmask 785920   ;;  %s541_s26 = scalar_lea.vmem %s4167_s23, %s3042_s11 }
  0x34   : > { %824 = vmatpush.bf16.msra.mxu0 %v2691_v57  ;;  %843 = vmatpush.bf16.msra.mxu1 %v2695_v61  ;;  %v2687_v7 = vor.u32 %v3055_v5, %v2686_v4  ;;  %v3051_v9 = vld [vmem:[#allocation3 + $0x38] sm:$0xf0] }
  0x35   : > { %862 = vmatpush.bf16.msra.mxu2 %v2699_v62 }
  0x39   : > { %863 = vmatpush.bf16.msra.mxu2 %v2687_v7 }
  0x9e   : > { %v555_v11 = vpop.xlane.xlu1 %554  ;;  %v551_v12 = vpop.xlane.xlu0 %550 }
  0x9f   : > { %v567_v13 = vmul.f32 %v3660_v10, %v555_v11  ;;  %v565_v14 = vmul.f32 %v3660_v10, %v551_v12  ;;  %v3050_v11 = vld [vmem:[#allocation3 + $0x34] sm:$0xf]  ;;  %v2667_v12 = vor.u32 %v3051_v9, %v2666_v8  ;;  %v3199_v8 = vld [vmem:[%s4140_s2] ss:$0 sm:$0xff] }
  0xa1   : > { %v3664_v15 = vsub.f32 %v546_v0, %v567_v13  ;;  %v3666_v16 = vsub.f32 %v544_v1, %v565_v14  ;;  %v3054_v0 = vld [vmem:[#allocation3 + $0x50] sm:$0xf0]  ;;  %v3053_v1 = vld [vmem:[#allocation3 + $0x4c] sm:$0xf]  ;;  %v2668_v13 = vld [vmem:[#allocation3 + $0x3c] sm:$0xf0] }
  0xa2   : > { %v2674_v14 = vld [vmem:[#allocation3 + $0x38] sm:$0xf] }
  0xa3   : > { %v575_v17 = vmul.f32 %v3664_v15, %v3664_v15  ;;  %v573_v18 = vmul.f32 %v3666_v16, %v3666_v16 }
  0xa5   : > { %581 = vadd.xlane.f32.xlu0 %v575_v17  ;;  %577 = vadd.xlane.f32.xlu2 %v573_v18  ;;  %v3052_v17 = vld [vmem:[#allocation3 + $0x40] sm:$0xf0]  ;;  %v2671_v18 = vor.u32 %v3050_v11, %v2668_v13 }
  0xa6   : > { %v557_v19 = vpop.xlane.xlu1 %556  ;;  %v553_v20 = vpop.xlane.xlu0 %552 }
  0xa7   : > { %v568_v21 = vmul.f32 %v3660_v10, %v557_v19  ;;  %v566_v22 = vmul.f32 %v3660_v10, %v553_v20  ;;  %v2675_v19 = vor.u32 %v3052_v17, %v2674_v14  ;;  %v2654_v20 = vld [vmem:[#allocation3 + $0x18] sm:$0xf] }
  0xa9   : > { %v3674_v23 = vsub.f32 %v547_v2, %v568_v21  ;;  %v3676_v24 = vsub.f32 %v545_v3, %v566_v22  ;;  %v2679_v2 = vor.u32 %v3054_v0, %v2678_v63  ;;  %v2680_v3 = vld [vmem:[#allocation3 + $0x54] sm:$0xf0]  ;;  %864 = vmatpush.bf16.msra.mxu2 %v2675_v19  ;;  %v3048_v21 = vld [vmem:[#allocation3 + $0x20] sm:$0xf0]  ;;  %v3047_v22 = vld [vmem:[#allocation3 + $0x1c] sm:$0xf] }
  0xaa   : > { %v2683_v6 = vor.u32 %v3053_v1, %v2680_v3 }
  0xab   : > { %v576_v25 = vmul.f32 %v3674_v23, %v3674_v23  ;;  %v574_v26 = vmul.f32 %v3676_v24, %v3676_v24  ;;  %825 = vmatpush.bf16.msra.mxu0 %v2679_v2 }
  0xac   : > { %844 = vmatpush.bf16.msra.mxu1 %v2683_v6 }
  0xad   : > { %583 = vadd.xlane.f32.xlu1 %v576_v25  ;;  %579 = vadd.xlane.f32.xlu2 %v574_v26  ;;  %v2655_v25 = vor.u32 %v3048_v21, %v2654_v20  ;;  %v2656_v26 = vld [vmem:[#allocation3 + $0x24] sm:$0xf0] }
  0xae   : > { %v2659_v30 = vor.u32 %v3047_v22, %v2656_v26  ;;  %865 = vmatpush.bf16.msra.mxu2 %v2663_v31 }
  0xaf   : > { %826 = vmatpush.bf16.msra.mxu0 %v2667_v12 }
  0xb0   : > { %845 = vmatpush.bf16.msra.mxu1 %v2671_v18  ;;  %v3200_v18 = vld [vmem:[%s4141_s3] ss:$0 sm:$0xff] }
  0xb2   : > { %866 = vmatpush.bf16.msra.mxu2 %v2651_v42 }
  0xb3   : > { %827 = vmatpush.bf16.msra.mxu0 %v2655_v25 }
  0xb4   : > { %846 = vmatpush.bf16.msra.mxu1 %v2659_v30 }
  0xb7   : > { %828 = vmatpush.bf16.msra.mxu0 %v2643_v37 }
  0xb8   : > { %847 = vmatpush.bf16.msra.mxu1 %v2647_v41 }
 0x118   : > { %v578_v29 = vpop.xlane.xlu2 %577  ;;  %v582_v36 = vpop.xlane.xlu0 %581 }
 0x119   : > { %v585_v35 = vmul.f32 %v578_v29, %v3660_v10  ;;  %v587_v44 = vmul.f32 %v582_v36, %v3660_v10 }
 0x11b   : > { %v589_v43 = vadd.f32 1e-05, %v585_v35  ;;  %v591_v45 = vadd.f32 1e-05, %v587_v44  ;;  %v685_v35 = vld [vmem:[%s4143_s5] sm:$0x7] }
 0x11c   : > { %v687_v36 = vperm.slane %v685_v35, 0  ;;  %v688_v37 = vperm.slane %v685_v35, 1 }
 0x11d   : > { %3207 = vrsqrt.f32 %v589_v43  ;;  %vm599_vm2 = vweird.f32 %v589_v43  ;;  %vm619_vm9 = vweird.f32 %v591_v45 }
 0x11e   : > { %3209 = vrsqrt.f32 %v591_v45 }
 0x120   : > { %v584_v46 = vpop.xlane.xlu1 %583  ;;  %v580_v47 = vpop.xlane.xlu2 %579 }
 0x121   : > { %v588_v48 = vmul.f32 %v584_v46, %v3660_v10  ;;  %v586_v49 = vmul.f32 %v580_v47, %v3660_v10 }
 0x123   : > { %v3208_v50 = vpop.eup %3207  ;;  %v592_v51 = vadd.f32 1e-05, %v588_v48  ;;  %v590_v52 = vadd.f32 1e-05, %v586_v49 }
 0x124   : > { %v594_v53 = vmul.f32 %v3208_v50, %v589_v43  ;;  %v3210_v56 = vpop.eup %3209  ;;  %vm600_vm1 = vweird.f32 %v3208_v50 }
 0x125   : > { %3211 = vrsqrt.f32 %v592_v51  ;;  %v614_v62 = vmul.f32 %v3210_v56, %v591_v45  ;;  %vm601_vm3 = vmor %vm599_vm2, %vm600_vm1  ;;  %vm609_vm5 = vweird.f32 %v590_v52  ;;  %vm629_vm7 = vweird.f32 %v592_v51 }
 0x126   : > { %v595_v54 = vmul.f32 %v3208_v50, %v594_v53  ;;  %3213 = vrsqrt.f32 %v590_v52  ;;  %vm620_vm10 = vweird.f32 %v3210_v56  ;;  %vm1596_vm1 = vcmask 1048320  }
 0x127   : > { %v615_v3 = vmul.f32 %v3210_v56, %v614_v62  ;;  %vm621_vm12 = vmor %vm619_vm9, %vm620_vm10  ;;  %v689_v62 = vperm.slane %v685_v35, 2 }
 0x128   : > { %v596_v55 = vmul.f32 0.5, %v595_v54 }
 0x129   : > { %v616_v9 = vmul.f32 0.5, %v615_v3 }
 0x12a   : > { %v597_v57 = vsub.f32 1.5, %v596_v55 }
 0x12b   : > { %v3212_v58 = vpop.eup %3211  ;;  %v617_v19 = vsub.f32 1.5, %v616_v9 }
 0x12c   : > { %v3214_v59 = vpop.eup %3213  ;;  %v624_v60 = vmul.f32 %v3212_v58, %v592_v51  ;;  %v598_v61 = vmul.f32 %v3208_v50, %v597_v57  ;;  %vm630_vm8 = vweird.f32 %v3212_v58 }
 0x12d   : > { %v604_v63 = vmul.f32 %v3214_v59, %v590_v52  ;;  %vm610_vm4 = vweird.f32 %v3214_v59  ;;  %vm631_vm11 = vmor %vm629_vm7, %vm630_vm8  ;;  %v618_v25 = vmul.f32 %v3210_v56, %v617_v19 }
 0x12e   : > { %v625_v0 = vmul.f32 %v3212_v58, %v624_v60  ;;  %v602_v2 = vsel %vm601_vm3, %v3208_v50, %v598_v61  ;;  %vm611_vm6 = vmor %vm609_vm5, %vm610_vm4 }
 0x12f   : > { %v605_v1 = vmul.f32 %v3214_v59, %v604_v63  ;;  %v633_v7 = vmul.f32 %v602_v2, %v3666_v16 }
 0x130   : > { %v626_v5 = vmul.f32 0.5, %v625_v0 }
 0x131   : > { %v606_v4 = vmul.f32 0.5, %v605_v1  ;;  %v640_v17 = vmul.f32 %v3199_v8, %v633_v7 }
 0x132   : > { %v627_v12 = vsub.f32 1.5, %v626_v5 }
 0x133   : > { %v607_v6 = vsub.f32 1.5, %v606_v4  ;;  %v647_v21 = vadd.f32 %v3200_v18, %v640_v17 }
 0x134   : > { %v628_v20 = vmul.f32 %v3212_v58, %v627_v12 }
 0x135   : > { %v608_v11 = vmul.f32 %v3214_v59, %v607_v6 }
 0x136   : > { %v632_v27 = vsel %vm631_vm11, %v3212_v58, %v628_v20 }
 0x137   : > { %v612_v13 = vsel %vm611_vm6, %v3214_v59, %v608_v11  ;;  %v636_v28 = vmul.f32 %v632_v27, %v3674_v23 }
 0x138   : > { %v634_v14 = vmul.f32 %v612_v13, %v3676_v24  ;;  %v622_v24 = vsel %vm621_vm12, %v3210_v56, %v618_v25 }
 0x139   : > { %v635_v29 = vmul.f32 %v622_v24, %v3664_v15  ;;  %v643_v30 = vmul.f32 %v3199_v8, %v636_v28 }
 0x13a   : > { %v641_v16 = vmul.f32 %v3199_v8, %v634_v14 }
 0x13b   : > { %v642_v31 = vmul.f32 %v3199_v8, %v635_v29  ;;  %v650_v32 = vadd.f32 %v3200_v18, %v643_v30 }
 0x13c   : > { %v648_v22 = vadd.f32 %v3200_v18, %v641_v16 }
 0x13d   : > { %v649_v33 = vadd.f32 %v3200_v18, %v642_v31 }
 0x13e   : > { %v651_v26 = vpack.c.bf16 %v648_v22, %v647_v21 }
 0x13f   : > { %v652_v34 = vpack.c.bf16 %v650_v32, %v649_v33 }
 0x140   : > { %829 = vmatmul.bf16.vlgmr.msra.gmra.mxu0 %v651_v26  ;;  %848 = vmatmul.bf16.vlgmr.msra.gmra.mxu1 %v651_v26 }
 0x141   : > { %867 = vmatmul.bf16.vlgmr.msra.gmra.mxu2 %v651_v26 }
 0x150   : > { %834 = vmatmul.bf16.gmra.mxu0 %v652_v34  ;;  %853 = vmatmul.bf16.gmra.mxu1 %v652_v34 }
 0x151   : > { %872 = vmatmul.bf16.gmra.mxu2 %v652_v34 }
 0x1bd   : > { %v830_v38 = vpop.f32.mrf.mxu0  ;;  %v849_v39 = vpop.f32.mrf.mxu1 }
 0x1be   : > { %v831_v40 = vadd.f32 %v830_v38, %v687_v36  ;;  %v850_v23 = vadd.f32 %v849_v39, %v688_v37 }
 0x1c0   : > { %v3699_v41 = vpack.c.bf16 %v850_v23, %v831_v40 }
 0x1c2   : > { %1058 = vrot.lane.b32.xlu2 %v3699_v41, %s3506_s30  ;;  %v892_v47 = vrot.slane %v3699_v41, 4  ;;  %v896_v48 = vunpack.c.l.b16 %v3699_v41 }
 0x1c4   : > { %v868_v15 = vpop.f32.mrf.mxu2  ;;  %v899_v53 = vunpack.c.l.b16 %v892_v47 }
 0x1c5   : > { %v832_v42 = vpop.f32.mrf.mxu0  ;;  %v851_v43 = vpop.f32.mrf.mxu1  ;;  %v869_v5 = vadd.f32 %v868_v15, %v689_v62 }
 0x1c6   : > { %v833_v44 = vadd.f32 %v832_v42, %v687_v36  ;;  %v852_v45 = vadd.f32 %v851_v43, %v688_v37 }
 0x1c7   : > { %v879_v11 = vpack.c.bf16 %v869_v5, %v869_v5 }
 0x1c8   : > { %v880_v46 = vpack.c.bf16 %v852_v45, %v833_v44 }
 0x1c9   : > { %v1005_v22 = vunpack.c.l.b16 %v879_v11 }
 0x1ca   : > { %1060 = vrot.lane.b32.xlu0 %v880_v46, %s3506_s30  ;;  %1239 = vrot.lane.b32.xlu2 %v3699_v41, %s3507_s20  ;;  %v897_v49 = vunpack.c.l.b16 %v880_v46  ;;  %v893_v50 = vrot.slane %v880_v46, 4 }
 0x1cc   : > { %v870_v51 = vpop.f32.mrf.mxu2  ;;  %v898_v52 = vpack.c.b16 %v897_v49, %v896_v48  ;;  %v900_v54 = vunpack.c.l.b16 %v893_v50 }
 0x1cd   : > { %v835_v55 = vpop.f32.mrf.mxu0  ;;  %v854_v56 = vpop.f32.mrf.mxu1  ;;  %v871_v0 = vadd.f32 %v870_v51, %v689_v62 }
 0x1ce   : > { %v836_v57 = vadd.f32 %v835_v55, %v687_v36  ;;  %v855_v58 = vadd.f32 %v854_v56, %v688_v37  ;;  %1070 = vrot.lane.b32.xlu1 %v898_v52, %s3506_s30  ;;  %v901_v59 = vpack.c.b16 %v900_v54, %v899_v53 }
 0x1cf   : > { %v881_v8 = vpack.c.bf16 %v871_v0, %v871_v0 }
 0x1d0   : > { %v882_v60 = vpack.c.bf16 %v855_v58, %v836_v57  ;;  %v907_v61 = vsel %vm902_vm13, %v901_v59, 0 }
 0x1d1   : > { %916 = vmatpush.bf16.xpose.msra.mxu3 %v907_v61  ;;  %v1006_v18 = vunpack.c.l.b16 %v881_v8 }
 0x1d2   : > { %1062 = vrot.lane.b32.xlu2 %v882_v60, %s3506_s30  ;;  %v894_v7 = vrot.slane %v882_v60, 4  ;;  %v923_v21 = vunpack.c.l.b16 %v882_v60 }
 0x1d3   : > { %v3717_v24 = vpack.c.b16 %v1006_v18, %v1005_v22 }
 0x1d4   : > { %v873_v63 = vpop.f32.mrf.mxu2  ;;  %v926_v13 = vunpack.c.l.b16 %v894_v7 }
 0x1d5   : > { %v837_v1 = vpop.f32.mrf.mxu0  ;;  %v856_v2 = vpop.f32.mrf.mxu1  ;;  %v874_v19 = vadd.f32 %v873_v63, %v689_v62 }
 0x1d6   : > { %v838_v3 = vadd.f32 %v837_v1, %v687_v36  ;;  %v857_v4 = vadd.f32 %v856_v2, %v688_v37  ;;  %1241 = vrot.lane.b32.xlu1 %v880_v46, %s3507_s20 }
 0x1d7   : > { %v883_v28 = vpack.c.bf16 %v874_v19, %v874_v19 }
 0x1d8   : > { %v884_v6 = vpack.c.bf16 %v857_v4, %v838_v3  ;;  %2736 = vmatmul.msk.bf16.vlgmr.msra.gmra.mxu3 %vm902_vm13, %v898_v52 }
 0x1d9   : > { %v1033_v30 = vunpack.c.l.b16 %v883_v28 }
 0x1da   : > { %1064 = vrot.lane.b32.xlu0 %v884_v6, %s3506_s30  ;;  %1251 = vrot.lane.b32.xlu2 %v898_v52, %s3507_s20  ;;  %v895_v9 = vrot.slane %v884_v6, 4  ;;  %v924_v17 = vunpack.c.l.b16 %v884_v6 }
 0x1dc   : > { %v875_v12 = vpop.f32.mrf.mxu2  ;;  %v927_v14 = vunpack.c.l.b16 %v895_v9  ;;  %v925_v27 = vpack.c.b16 %v924_v17, %v923_v21 }
 0x1dd   : > { %v876_v16 = vadd.f32 %v875_v12, %v689_v62  ;;  %v3746_v62 = vld [vmem:[%s4139_s1] sm:$0xff] }
 0x1de   : > { %1243 = vrot.lane.b32.xlu1 %v882_v60, %s3507_s20  ;;  %v928_v20 = vpack.c.b16 %v927_v14, %v926_v13  ;;  %v3755_v13 = vld [vmem:[%s4139_s1 + $0x8] sm:$0xff] }
 0x1df   : > { %v885_v25 = vpack.c.bf16 %v876_v16, %v876_v16 }
 0x1e0   : > { %v933_v26 = vsel %vm902_vm13, %v928_v20, 0 }
 0x1e1   : > { %942 = vmatpush.bf16.xpose.msrb.mxu3 %v933_v26  ;;  %v1034_v29 = vunpack.c.l.b16 %v885_v25 }
 0x1e2   : > { %1420 = vrot.lane.b32.xlu2 %v3699_v41, %s3508_s22  ;;  %1095 = vrot.lane.b32.xlu0 %v925_v27, %s3506_s30 }
 0x1e3   : > { %v3724_v31 = vpack.c.b16 %v1034_v29, %v1033_v30 }
 0x1e6   : > { %1422 = vrot.lane.b32.xlu1 %v880_v46, %s3508_s22 }
 0x1e8   : > { %2737 = vmatmul.msk.bf16.vlgmr.msrb.gmra.mxu3 %vm902_vm13, %v925_v27 }
 0x1e9   : > { %1019 = vmatpush.bf16.msra.mxu3 %v3717_v24 }
 0x1ea   : > { %1432 = vrot.lane.b32.xlu2 %v898_v52, %s3508_s22  ;;  %1245 = vrot.lane.b32.xlu0 %v884_v6, %s3507_s20 }
 0x1ed   : > { %1047 = vmatpush.bf16.msrb.mxu3 %v3724_v31 }
 0x1ee   : > { %1424 = vrot.lane.b32.xlu1 %v882_v60, %s3508_s22 }
 0x1f2   : > { %1457 = vrot.lane.b32.xlu2 %v925_v27, %s3508_s22  ;;  %1276 = vrot.lane.b32.xlu0 %v925_v27, %s3507_s20 }
 0x1fa   : > { %1198 = vrot.lane.b32.xlu2 %v3724_v31, %s3506_s30  ;;  %1426 = vrot.lane.b32.xlu0 %v884_v6, %s3508_s22 }
 0x202   : > { %1173 = vrot.lane.b32.xlu0 %v3717_v24, %s3506_s30 }
 0x21c   : > { %v1059_v32 = vpop.permute.xlu2 %1058 }
 0x21d   : > { %v1066_v34 = vrot.slane %v1059_v32, 4 }
 0x21f   : > { %v1072_v37 = vunpack.c.l.b16 %v1066_v34 }
 0x224   : > { %v1240_v33 = vpop.permute.xlu2 %1239 }
 0x225   : > { %v1247_v15 = vrot.slane %v1240_v33, 4 }
 0x227   : > { %v1253_v45 = vunpack.c.l.b16 %v1247_v15 }
 0x22c   : > { %v1063_v39 = vpop.permute.xlu2 %1062 }
 0x22d   : > { %v1068_v46 = vrot.slane %v1063_v39, 4 }
 0x22f   : > { %v1097_v51 = vunpack.c.l.b16 %v1068_v46 }
 0x234   : > { %v1252_v44 = vpop.permute.xlu2 %1251 }
 0x23c   : > { %v1061_v35 = vpop.permute.xlu0 %1060  ;;  %v1421_v57 = vpop.permute.xlu2 %1420 }
 0x23d   : > { %v1067_v36 = vrot.slane %v1061_v35, 4  ;;  %v1428_v59 = vrot.slane %v1421_v57, 4 }
 0x23f   : > { %v1073_v38 = vunpack.c.l.b16 %v1067_v36  ;;  %v1434_v63 = vunpack.c.l.b16 %v1428_v59 }
 0x240   : > { %v1071_v40 = vpop.permute.xlu1 %1070 }
 0x241   : > { %v1074_v23 = vpack.c.b16 %v1073_v38, %v1072_v37 }
 0x243   : > { %v1079_v41 = vsel %vm902_vm13, %v1074_v23, 0 }
 0x244   : > { %1088 = vmatpush.bf16.xpose.msrb.mxu1 %v1079_v41  ;;  %v1433_v16 = vpop.permute.xlu2 %1432 }
 0x248   : > { %v1242_v42 = vpop.permute.xlu1 %1241 }
 0x249   : > { %v1248_v43 = vrot.slane %v1242_v42, 4 }
 0x24b   : > { %v1254_v47 = vunpack.c.l.b16 %v1248_v43  ;;  %2740 = vmatmul.msk.bf16.vlgmr.msrb.gmra.mxu1 %vm902_vm13, %v1071_v40 }
 0x24c   : > { %v1065_v48 = vpop.permute.xlu0 %1064  ;;  %v1458_v39 = vpop.permute.xlu2 %1457 }
 0x24d   : > { %v1069_v49 = vrot.slane %v1065_v48, 4  ;;  %v1255_v50 = vpack.c.b16 %v1254_v47, %v1253_v45 }
 0x24f   : > { %v1098_v52 = vunpack.c.l.b16 %v1069_v49  ;;  %v1260_v53 = vsel %vm902_vm13, %v1255_v50, 0 }
 0x250   : > { %1269 = vmatpush.bf16.xpose.msrb.mxu0 %v1260_v53  ;;  %v1244_v54 = vpop.permute.xlu1 %1243 }
 0x251   : > { %v1099_v55 = vpack.c.b16 %v1098_v52, %v1097_v51  ;;  %v1249_v0 = vrot.slane %v1244_v54, 4 }
 0x253   : > { %v1104_v56 = vsel %vm902_vm13, %v1099_v55, 0  ;;  %v1278_v8 = vunpack.c.l.b16 %v1249_v0 }
 0x254   : > { %1113 = vmatpush.bf16.xpose.msra.mxu1 %v1104_v56  ;;  %v1096_v58 = vpop.permute.xlu0 %1095  ;;  %v3797_v56 = vpop.permute.xlu2 %1198 }
 0x257   : > { %2744 = vmatmul.msk.bf16.vlgmr.msrb.gmra.mxu0 %vm902_vm13, %v1252_v44 }
 0x258   : > { %v1423_v60 = vpop.permute.xlu1 %1422 }
 0x259   : > { %v1429_v61 = vrot.slane %v1423_v60, 4 }
 0x25b   : > { %v1435_v1 = vunpack.c.l.b16 %v1429_v61  ;;  %v918_v2 = vpop.f32.mrf.mxu3  ;;  %2741 = vmatmul.msk.bf16.vlgmr.msra.gmra.mxu1 %vm902_vm13, %v1096_v58 }
 0x25c   : > { %v919_v3 = vadd.f32 %v918_v2, %v3746_v62  ;;  %v1246_v4 = vpop.permute.xlu0 %1245 }
 0x25d   : > { %v1436_v5 = vpack.c.b16 %v1435_v1, %v1434_v63  ;;  %v1250_v6 = vrot.slane %v1246_v4, 4 }
 0x25e   : > { %v950_v7 = vsel %vm949_vm14, %v919_v3, -inf }
 0x25f   : > { %v1279_v9 = vunpack.c.l.b16 %v1250_v6  ;;  %951 = vmax.xlane.f32.xlu1 %v950_v7  ;;  %v1441_v11 = vsel %vm902_vm13, %v1436_v5, 0 }
 0x260   : > { %1450 = vmatpush.bf16.xpose.msra.mxu0 %v1441_v11  ;;  %v1425_v21 = vpop.permute.xlu1 %1424 }
 0x261   : > { %v1280_v12 = vpack.c.b16 %v1279_v9, %v1278_v8  ;;  %v1430_v22 = vrot.slane %v1425_v21, 4 }
 0x263   : > { %v920_v14 = vpop.f32.mrf.mxu3  ;;  %v1285_v17 = vsel %vm902_vm13, %v1280_v12, 0  ;;  %v1459_v30 = vunpack.c.l.b16 %v1430_v22 }
 0x264   : > { %v3759_v18 = vadd.f32 %v920_v14, %v3755_v13  ;;  %1294 = vmatpush.bf16.xpose.msrb.mxu1 %v1285_v17  ;;  %v1277_v19 = vpop.permute.xlu0 %1276 }
 0x266   : > { %v953_v20 = vsel %vm949_vm14, %v3759_v18, -inf }
 0x267   : > { %2748 = vmatmul.msk.bf16.vlgmr.msra.gmra.mxu0 %vm902_vm13, %v1433_v16  ;;  %954 = vmax.xlane.f32.xlu0 %v953_v20 }
 0x26b   : > { %v944_v25 = vpop.f32.mrf.mxu3  ;;  %2745 = vmatmul.msk.bf16.vlgmr.msrb.gmra.mxu1 %vm902_vm13, %v1277_v19 }
 0x26c   : > { %v3766_v26 = vadd.f32 %v944_v25, %v3746_v62  ;;  %v1427_v27 = vpop.permute.xlu0 %1426 }
 0x26d   : > { %v1431_v28 = vrot.slane %v1427_v27, 4 }
 0x26e   : > { %v956_v29 = vsel %vm949_vm14, %v3766_v26, -inf }
 0x26f   : > { %v1460_v32 = vunpack.c.l.b16 %v1431_v28  ;;  %957 = vmax.xlane.f32.xlu2 %v956_v29 }
 0x271   : > { %v1461_v33 = vpack.c.b16 %v1460_v32, %v1459_v30 }
 0x273   : > { %v946_v34 = vpop.f32.mrf.mxu3  ;;  %v1466_v35 = vsel %vm902_vm13, %v1461_v33, 0 }
 0x274   : > { %v947_v36 = vadd.f32 %v946_v34, %v3755_v13  ;;  %1475 = vmatpush.bf16.xpose.msra.mxu1 %v1466_v35  ;;  %v1174_v37 = vpop.permute.xlu0 %1173 }
 0x275   : > { %1186 = vmatpush.bf16.msrb.mxu2 %v1174_v37 }
 0x276   : > { %v959_v38 = vsel %vm949_vm14, %v947_v36, -inf }
 0x277   : > { %960 = vmax.xlane.f32.xlu1 %v959_v38 }
 0x27b   : > { %2749 = vmatmul.msk.bf16.vlgmr.msra.gmra.mxu1 %vm902_vm13, %v1458_v39 }
 0x2c8   : > { %v1090_v40 = vpop.f32.mrf.mxu1 }
 0x2c9   : > { %v3775_v23 = vadd.f32 %v1090_v40, %v3746_v62 }
 0x2cb   : > { %v1120_v41 = vsel %vm949_vm14, %v3775_v23, -inf }
 0x2cc   : > { %1121 = vmax.xlane.f32.xlu0 %v1120_v41 }
 0x2d0   : > { %v1092_v15 = vpop.f32.mrf.mxu1 }
 0x2d1   : > { %v3785_v49 = vadd.f32 %v1092_v15, %v3755_v13 }
 0x2d2   : > { %v952_v42 = vpop.xlane.xlu1 %951 }
 0x2d3   : > { %v962_v45 = vsub.f32 %v919_v3, %v952_v42  ;;  %v1123_v53 = vsel %vm949_vm14, %v3785_v49, -inf }
 0x2d4   : > { %v1271_v43 = vpop.f32.mrf.mxu0 }
 0x2d5   : > { %v3780_v44 = vadd.f32 %v1271_v43, %v3746_v62  ;;  %v966_v48 = vmul.f32 1.442695, %v962_v45 }
 0x2d7   : > { %v1301_v46 = vsel %vm949_vm14, %v3780_v44, -inf  ;;  %3215 = vpow2.f32 %v966_v48 }
 0x2d8   : > { %1302 = vmax.xlane.f32.xlu2 %v1301_v46  ;;  %v1115_v47 = vpop.f32.mrf.mxu1 }
 0x2d9   : > { %v3800_v57 = vadd.f32 %v1115_v47, %v3746_v62 }
 0x2da   : > { %v955_v58 = vpop.xlane.xlu0 %954 }
 0x2db   : > { %v963_v63 = vsub.f32 %v3759_v18, %v955_v58  ;;  %v1126_v1 = vsel %vm949_vm14, %v3800_v57, -inf }
 0x2dc   : > { %v1273_v50 = vpop.f32.mrf.mxu0 }
 0x2dd   : > { %v3788_v51 = vadd.f32 %v1273_v50, %v3755_v13  ;;  %v3804_v60 = vpop.eup %3215  ;;  %v968_v3 = vmul.f32 1.442695, %v963_v63 }
 0x2de   : > { %v974_v0 = vsel %vm949_vm14, %v3804_v60, 0.0 }
 0x2df   : > { %v1304_v52 = vsel %vm949_vm14, %v3788_v51, -inf  ;;  %3217 = vpow2.f32 %v968_v3 }
 0x2e0   : > { %1305 = vmax.xlane.f32.xlu1 %v1304_v52  ;;  %1124 = vmax.xlane.f32.xlu2 %v1123_v53  ;;  %v1117_v54 = vpop.f32.mrf.mxu1 }
 0x2e1   : > { %v3795_v55 = vadd.f32 %v1117_v54, %v3755_v13 }
 0x2e2   : > { %v958_v4 = vpop.xlane.xlu2 %957 }
 0x2e3   : > { %v1129_v59 = vsel %vm949_vm14, %v3795_v55, -inf  ;;  %v964_v8 = vsub.f32 %v3766_v26, %v958_v4 }
 0x2e4   : > { %v1452_v61 = vpop.f32.mrf.mxu0  ;;  %1130 = vmax.xlane.f32.xlu0 %v1129_v59 }
 0x2e5   : > { %v3812_v5 = vadd.f32 %v1452_v61, %v3746_v62  ;;  %v970_v18 = vmul.f32 1.442695, %v964_v8  ;;  %v3830_v22 = vpop.eup %3217 }
 0x2e6   : > { %v977_v26 = vsel %vm949_vm14, %v3830_v22, 0.0 }
 0x2e7   : > { %v1482_v14 = vsel %vm949_vm14, %v3812_v5, -inf  ;;  %3219 = vpow2.f32 %v970_v18 }
 0x2e8   : > { %975 = vadd.xlane.f32.xlu2 %v974_v0  ;;  %1127 = vmax.xlane.f32.xlu1 %v1126_v1  ;;  %v1296_v2 = vpop.f32.mrf.mxu1 }
 0x2e9   : > { %v3826_v20 = vadd.f32 %v1296_v2, %v3746_v62 }
 0x2ea   : > { %v961_v6 = vpop.xlane.xlu1 %960 }
 0x2eb   : > { %v965_v11 = vsub.f32 %v947_v36, %v961_v6  ;;  %v1307_v25 = vsel %vm949_vm14, %v3826_v20, -inf }
 0x2ec   : > { %v1454_v7 = vpop.f32.mrf.mxu0 }
 0x2ed   : > { %v3816_v9 = vadd.f32 %v1454_v7, %v3755_v13  ;;  %v972_v16 = vmul.f32 1.442695, %v965_v11  ;;  %v3836_v28 = vpop.eup %3219 }
 0x2ee   : > { %v980_v32 = vsel %vm949_vm14, %v3836_v28, 0.0 }
 0x2ef   : > { %v1485_v12 = vsel %vm949_vm14, %v3816_v9, -inf  ;;  %3221 = vpow2.f32 %v972_v16 }
 0x2f0   : > { %1486 = vmax.xlane.f32.xlu0 %v1485_v12  ;;  %1483 = vmax.xlane.f32.xlu1 %v1482_v14  ;;  %v1298_v17 = vpop.f32.mrf.mxu1 }
 0x2f1   : > { %v3823_v19 = vadd.f32 %v1298_v17, %v3755_v13 }
 0x2f3   : > { %v1310_v21 = vsel %vm949_vm14, %v3823_v19, -inf }
 0x2f4   : > { %1311 = vmax.xlane.f32.xlu2 %v1310_v21 }
 0x2f5   : > { %v3838_v29 = vpop.eup %3221 }
 0x2f6   : > { %v983_v30 = vsel %vm949_vm14, %v3838_v29, 0.0 }
 0x2f8   : > { %1308 = vmax.xlane.f32.xlu0 %v1307_v25  ;;  %v1477_v27 = vpop.f32.mrf.mxu1  ;;  %978 = vadd.xlane.f32.xlu1 %v977_v26 }
 0x2f9   : > { %v3848_v35 = vadd.f32 %v1477_v27, %v3746_v62 }
 0x2fb   : > { %v1488_v37 = vsel %vm949_vm14, %v3848_v35, -inf }
 0x300   : > { %984 = vadd.xlane.f32.xlu0 %v983_v30  ;;  %v1479_v33 = vpop.f32.mrf.mxu1  ;;  %981 = vadd.xlane.f32.xlu1 %v980_v32 }
 0x301   : > { %v3845_v34 = vadd.f32 %v1479_v33, %v3755_v13 }
 0x303   : > { %v1491_v36 = vsel %vm949_vm14, %v3845_v34, -inf }
 0x304   : > { %1492 = vmax.xlane.f32.xlu2 %v1491_v36 }
 0x308   : > { %1489 = vmax.xlane.f32.xlu0 %v1488_v37 }
 0x31c   : > { %1354 = vrot.lane.b32.xlu0 %v3717_v24, %s3507_s20 }
 0x33f   : > { %v1122_v38 = vpop.xlane.xlu0 %1121 }
 0x340   : > { %v1132_v39 = vsub.f32 %v3775_v23, %v1122_v38 }
 0x342   : > { %v1136_v40 = vmul.f32 1.442695, %v1132_v39 }
 0x344   : > { %3223 = vpow2.f32 %v1136_v40 }
 0x34a   : > { %v3857_v13 = vpop.eup %3223 }
 0x34b   : > { %v1303_v62 = vpop.xlane.xlu2 %1302  ;;  %v1144_v41 = vsel %vm949_vm14, %v3857_v13, 0.0 }
 0x34c   : > { %v1313_v15 = vsub.f32 %v3780_v44, %v1303_v62  ;;  %1145 = vadd.xlane.f32.xlu2 %v1144_v41 }
 0x34e   : > { %v1317_v42 = vmul.f32 1.442695, %v1313_v15 }
 0x350   : > { %3225 = vpow2.f32 %v1317_v42 }
 0x353   : > { %v1306_v43 = vpop.xlane.xlu1 %1305  ;;  %v1125_v45 = vpop.xlane.xlu2 %1124 }
 0x354   : > { %v1133_v46 = vsub.f32 %v3785_v49, %v1125_v45  ;;  %v1314_v48 = vsub.f32 %v3788_v51, %v1306_v43 }
 0x356   : > { %v3863_v47 = vpop.eup %3225  ;;  %v1138_v23 = vmul.f32 1.442695, %v1133_v46  ;;  %v1319_v52 = vmul.f32 1.442695, %v1314_v48 }
 0x357   : > { %v1325_v50 = vsel %vm949_vm14, %v3863_v47, 0.0  ;;  %v1131_v53 = vpop.xlane.xlu0 %1130 }
 0x358   : > { %1326 = vadd.xlane.f32.xlu2 %v1325_v50  ;;  %3227 = vpow2.f32 %v1138_v23  ;;  %v1135_v58 = vsub.f32 %v3795_v55, %v1131_v53 }
 0x359   : > { %3229 = vpow2.f32 %v1319_v52 }
 0x35a   : > { %v1142_v63 = vmul.f32 1.442695, %v1135_v58 }
 0x35b   : > { %v1128_v44 = vpop.xlane.xlu1 %1127  ;;  %v976_v49 = vpop.xlane.xlu2 %975 }
 0x35c   : > { %v1134_v54 = vsub.f32 %v3800_v57, %v1128_v44 }
 0x35e   : > { %v1140_v59 = vmul.f32 1.442695, %v1134_v54  ;;  %v3870_v61 = vpop.eup %3227 }
 0x35f   : > { %v1147_v51 = vsel %vm949_vm14, %v3870_v61, 0.0  ;;  %v3874_v2 = vpop.eup %3229 }
 0x360   : > { %3231 = vpow2.f32 %v1140_v59  ;;  %1148 = vadd.xlane.f32.xlu1 %v1147_v51  ;;  %v1328_v6 = vsel %vm949_vm14, %v3874_v2, 0.0 }
 0x361   : > { %3233 = vpow2.f32 %v1142_v63 }
 0x362   : > { %3235 = vrcp.f32 %v976_v49 }
 0x363   : > { %v1484_v0 = vpop.xlane.xlu1 %1483  ;;  %v1487_v1 = vpop.xlane.xlu0 %1486 }
 0x364   : > { %v1494_v16 = vsub.f32 %v3812_v5, %v1484_v0  ;;  %v1495_v37 = vsub.f32 %v3816_v9, %v1487_v1 }
 0x366   : > { %v3876_v3 = vpop.eup %3231  ;;  %v1498_v27 = vmul.f32 1.442695, %v1494_v16  ;;  %v1500_v45 = vmul.f32 1.442695, %v1495_v37 }
 0x367   : > { %v1312_v55 = vpop.xlane.xlu2 %1311  ;;  %v1150_v57 = vsel %vm949_vm14, %v3876_v3, 0.0  ;;  %v3883_v12 = vpop.eup %3233 }
 0x368   : > { %v1316_v4 = vsub.f32 %v3823_v19, %v1312_v55  ;;  %1151 = vadd.xlane.f32.xlu2 %v1150_v57  ;;  %1329 = vadd.xlane.f32.xlu1 %v1328_v6  ;;  %v3236_v17 = vpop.eup %3235  ;;  %v1153_v21 = vsel %vm949_vm14, %v3883_v12, 0.0 }
 0x369   : > { %v990_v19 = vmul.f32 %v3236_v17, %v3804_v60 }
 0x36a   : > { %v1323_v7 = vmul.f32 1.442695, %v1316_v4 }
 0x36b   : > { %v979_v8 = vpop.xlane.xlu1 %978  ;;  %v1309_v11 = vpop.xlane.xlu0 %1308  ;;  %v994_v33 = vpack.c.bf16 %v990_v19, %v990_v19 }
 0x36c   : > { %3237 = vpow2.f32 %v1323_v7  ;;  %v1315_v14 = vsub.f32 %v3826_v20, %v1309_v11 }
 0x36d   : > { %3239 = vrcp.f32 %v979_v8  ;;  %v1000_v40 = vunpack.c.l.b16 %v994_v33 }
 0x36e   : > { %v1321_v18 = vmul.f32 1.442695, %v1315_v14 }
 0x370   : > { %3241 = vpow2.f32 %v1321_v18  ;;  %1154 = vadd.xlane.f32.xlu1 %v1153_v21 }
 0x372   : > { %v3890_v25 = vpop.eup %3237 }
 0x373   : > { %v3240_v26 = vpop.eup %3239  ;;  %v982_v30 = vpop.xlane.xlu1 %981  ;;  %v1334_v20 = vsel %vm949_vm14, %v3890_v25, 0.0 }
 0x374   : > { %v985_v32 = vpop.xlane.xlu0 %984  ;;  %v991_v36 = vmul.f32 %v3240_v26, %v3830_v22  ;;  %3243 = vrcp.f32 %v982_v30  ;;  %1335 = vadd.xlane.f32.xlu0 %v1334_v20 }
 0x375   : > { %3245 = vrcp.f32 %v985_v32 }
 0x376   : > { %v3895_v60 = vpop.eup %3241  ;;  %v995_v5 = vpack.c.bf16 %v991_v36, %v991_v36  ;;  %3247 = vpow2.f32 %v1498_v27 }
 0x377   : > { %v1493_v38 = vpop.xlane.xlu2 %1492  ;;  %v1331_v39 = vsel %vm949_vm14, %v3895_v60, 0.0 }
 0x378   : > { %v1001_v62 = vunpack.c.l.b16 %v995_v5  ;;  %v1497_v41 = vsub.f32 %v3845_v34, %v1493_v38  ;;  %1332 = vadd.xlane.f32.xlu1 %v1331_v39 }
 0x37a   : > { %v3244_v15 = vpop.eup %3243  ;;  %v1002_v22 = vpack.c.b16 %v1001_v62, %v1000_v40  ;;  %v1504_v42 = vmul.f32 1.442695, %v1497_v41 }
 0x37b   : > { %v3246_v43 = vpop.eup %3245  ;;  %v992_v9 = vmul.f32 %v3244_v15, %v3836_v28 }
 0x37c   : > { %3249 = vpow2.f32 %v1504_v42  ;;  %2738 = vmatmul.msk.bf16.vlgmr.msra.gmra.mxu3 %vm949_vm14, %v1002_v22  ;;  %v3902_v46 = vpop.eup %3247  ;;  %v993_v23 = vmul.f32 %v3246_v43, %v3838_v29  ;;  %v1490_v44 = vpop.xlane.xlu0 %1489 }
 0x37d   : > { %1211 = vmatpush.bf16.msra.mxu3 %v3797_v56  ;;  %3251 = vpow2.f32 %v1500_v45  ;;  %v1506_v34 = vsel %vm949_vm14, %v3902_v46, 0.0  ;;  %v996_v50 = vpack.c.bf16 %v992_v9, %v992_v9  ;;  %v1496_v49 = vsub.f32 %v3848_v35, %v1490_v44 }
 0x37e   : > { %v997_v52 = vpack.c.bf16 %v993_v23, %v993_v23 }
 0x37f   : > { %v1028_v28 = vunpack.c.l.b16 %v996_v50  ;;  %v1502_v51 = vmul.f32 1.442695, %v1496_v49 }
 0x380   : > { %1379 = vrot.lane.b32.xlu2 %v3724_v31, %s3507_s20  ;;  %1507 = vadd.xlane.f32.xlu1 %v1506_v34  ;;  %v1029_v29 = vunpack.c.l.b16 %v997_v52 }
 0x381   : > { %3253 = vpow2.f32 %v1502_v51 }
 0x382   : > { %v3911_v48 = vpop.eup %3249  ;;  %v1030_v58 = vpack.c.b16 %v1029_v29, %v1028_v28 }
 0x383   : > { %v1515_v53 = vsel %vm949_vm14, %v3911_v48, 0.0  ;;  %v3915_v56 = vpop.eup %3251 }
 0x384   : > { %1516 = vadd.xlane.f32.xlu0 %v1515_v53  ;;  %v1509_v54 = vsel %vm949_vm14, %v3915_v56, 0.0 }
 0x387   : > { %v3923_v63 = vpop.eup %3253 }
 0x388   : > { %1510 = vadd.xlane.f32.xlu1 %v1509_v54  ;;  %v1512_v0 = vsel %vm949_vm14, %v3923_v63, 0.0 }
 0x38c   : > { %2739 = vmatmul.msk.bf16.vlgmr.msrb.gmra.mxu3 %vm949_vm14, %v1030_v58 }
 0x38e   : > { %v1355_v59 = vpop.permute.xlu0 %1354 }
 0x38f   : > { %1367 = vmatpush.bf16.msra.mxu2 %v1355_v59 }
 0x3a1   : > { %1535 = vrot.lane.b32.xlu1 %v3717_v24, %s3508_s22 }
 0x3a9   : > { %1513 = vadd.xlane.f32.xlu2 %v1512_v0  ;;  %1560 = vrot.lane.b32.xlu1 %v3724_v31, %s3508_s22 }
 0x3bf   : > { %v1146_v1 = vpop.xlane.xlu2 %1145 }
 0x3c0   : > { %3255 = vrcp.f32 %v1146_v1 }
 0x3c6   : > { %v3256_v4 = vpop.eup %3255 }
 0x3c7   : > { %v1160_v35 = vmul.f32 %v3256_v4, %v3857_v13 }
 0x3c9   : > { %v1164_v24 = vpack.c.bf16 %v1160_v35, %v1160_v35 }
 0x3cb   : > { %v1327_v55 = vpop.xlane.xlu2 %1326  ;;  %v1170_v17 = vunpack.c.l.b16 %v1164_v24 }
 0x3d3   : > { %v1149_v57 = vpop.xlane.xlu1 %1148 }
 0x3d4   : > { %3257 = vrcp.f32 %v1149_v57 }
 0x3da   : > { %v3258_v6 = vpop.eup %3257 }
 0x3db   : > { %v1152_v7 = vpop.xlane.xlu2 %1151  ;;  %v1161_v8 = vmul.f32 %v3258_v6, %v3870_v61  ;;  %v1330_v11 = vpop.xlane.xlu1 %1329 }
 0x3dc   : > { %3259 = vrcp.f32 %v1330_v11 }
 0x3dd   : > { %3261 = vrcp.f32 %v1327_v55  ;;  %v1165_v14 = vpack.c.bf16 %v1161_v8, %v1161_v8 }
 0x3de   : > { %3263 = vrcp.f32 %v1152_v7 }
 0x3df   : > { %v1171_v31 = vunpack.c.l.b16 %v1165_v14 }
 0x3e1   : > { %v1172_v18 = vpack.c.b16 %v1171_v31, %v1170_v17 }
 0x3e2   : > { %v3260_v16 = vpop.eup %3259 }
 0x3e3   : > { %v1380_v19 = vpop.permute.xlu2 %1379  ;;  %v3262_v21 = vpop.eup %3261  ;;  %2742 = vmatmul.msk.bf16.vlgmr.msrb.gmra.mxu2 %vm949_vm14, %v1172_v18  ;;  %v1342_v27 = vmul.f32 %v3260_v16, %v3874_v2 }
 0x3e4   : > { %v1155_v26 = vpop.xlane.xlu1 %1154  ;;  %1392 = vmatpush.bf16.msrb.mxu3 %v1380_v19  ;;  %v3264_v13 = vpop.eup %3263  ;;  %v1341_v61 = vmul.f32 %v3262_v21, %v3863_v47 }
 0x3e5   : > { %3265 = vrcp.f32 %v1155_v26  ;;  %v1162_v30 = vmul.f32 %v3264_v13, %v3876_v3  ;;  %v1346_v32 = vpack.c.bf16 %v1342_v27, %v1342_v27 }
 0x3e6   : > { %v1345_v33 = vpack.c.bf16 %v1341_v61, %v1341_v61 }
 0x3e7   : > { %v1166_v36 = vpack.c.bf16 %v1162_v30, %v1162_v30  ;;  %v1336_v37 = vpop.xlane.xlu0 %1335  ;;  %v1352_v39 = vunpack.c.l.b16 %v1346_v32  ;;  %v3075_v32 = vld [vmem:[#allocation5 + $0x38] sm:$0xff] }
 0x3e8   : > { %v1351_v62 = vunpack.c.l.b16 %v1345_v33  ;;  %1675 = vmatpush.bf16.msrb.mxu0 %v3075_v32  ;;  %v3073_v33 = vld [vmem:[#allocation5 + $0x28] sm:$0xff]  ;;  %v2900_v32 = vld [vmem:[#allocation7 + $0xf0] sm:$0xf0] }
 0x3e9   : > { %v1195_v41 = vunpack.c.l.b16 %v1166_v36 }
 0x3ea   : > { %v1353_v2 = vpack.c.b16 %v1352_v39, %v1351_v62  ;;  %v3072_v39 = vld [vmem:[#allocation5 + $0x20] sm:$0xff]  ;;  %v3070_v62 = vld [vmem:[#allocation5 + $0x10] sm:$0xff] }
 0x3eb   : > { %v3266_v20 = vpop.eup %3265 }
 0x3ec   : > { %v1163_v5 = vmul.f32 %v3266_v20, %v3883_v12  ;;  %v1333_v38 = vpop.xlane.xlu1 %1332  ;;  %v3074_v20 = vld [vmem:[#allocation5 + $0x30] sm:$0xff] }
 0x3ed   : > { %3267 = vrcp.f32 %v1333_v38  ;;  %1676 = vmatpush.bf16.msrb.mxu0 %v3074_v20  ;;  %v2906_v20 = vld [vmem:[#allocation7 + $0xe8] sm:$0xf] }
 0x3ee   : > { %v1167_v40 = vpack.c.bf16 %v1163_v5, %v1163_v5  ;;  %3269 = vrcp.f32 %v1336_v37 }
 0x3f0   : > { %v1196_v15 = vunpack.c.l.b16 %v1167_v40  ;;  %v3071_v40 = vld [vmem:[#allocation5 + $0x18] sm:$0xff] }
 0x3f1   : > { %1677 = vmatpush.bf16.msrb.mxu0 %v3073_v33  ;;  %v3107_v33 = vld [vmem:[#allocation7 + $0xf4] sm:$0xf0] }
 0x3f2   : > { %v1197_v22 = vpack.c.b16 %v1196_v15, %v1195_v41  ;;  %v3069_v15 = vld [vmem:[#allocation5 + $0x8] sm:$0xff] }
 0x3f3   : > { %v3268_v47 = vpop.eup %3267  ;;  %2746 = vmatmul.msk.bf16.vlgmr.msra.gmra.mxu2 %vm949_vm14, %v1353_v2  ;;  %v3068_v2 = vld [vmem:[#allocation5] sm:$0xff] }
 0x3f4   : > { %v1508_v42 = vpop.xlane.xlu1 %1507  ;;  %2743 = vmatmul.msk.bf16.vlgmr.msra.gmra.mxu3 %vm949_vm14, %v1197_v22  ;;  %v3270_v3 = vpop.eup %3269  ;;  %v1343_v12 = vmul.f32 %v3268_v47, %v3895_v60 }
 0x3f5   : > { %v1344_v43 = vmul.f32 %v3270_v3, %v3890_v25  ;;  %1678 = vmatpush.bf16.msrb.mxu0 %v3072_v39 }
 0x3f6   : > { %v1347_v45 = vpack.c.bf16 %v1343_v12, %v1343_v12 }
 0x3f7   : > { %v1348_v9 = vpack.c.bf16 %v1344_v43, %v1344_v43  ;;  %v1517_v0 = vpop.xlane.xlu0 %1516 }
 0x3f8   : > { %v1376_v23 = vunpack.c.l.b16 %v1347_v45 }
 0x3f9   : > { %v1377_v52 = vunpack.c.l.b16 %v1348_v9  ;;  %1679 = vmatpush.bf16.msrb.mxu0 %v3071_v40  ;;  %v2882_v40 = vld [vmem:[#allocation7 + $0xc0] sm:$0xf] }
 0x3fb   : > { %v1378_v53 = vpack.c.b16 %v1377_v52, %v1376_v23 }
 0x3fc   : > { %v1511_v34 = vpop.xlane.xlu1 %1510 }
 0x3fd   : > { %3271 = vrcp.f32 %v1511_v34  ;;  %1680 = vmatpush.bf16.msrb.mxu0 %v3070_v62  ;;  %v3102_v62 = vld [vmem:[#allocation7 + $0xcc] sm:$0xf0] }
 0x3fe   : > { %3273 = vrcp.f32 %v1508_v42 }
 0x3ff   : > { %v1021_v50 = vpop.f32.mrf.mxu3  ;;  %3275 = vrcp.f32 %v1517_v0 }
 0x400   : > { %1054 = vst.msk [vmem:[#allocation2] sm:$0xff] %vm902_vm13, %v1021_v50 }
 0x401   : > { %1681 = vmatpush.bf16.msrb.mxu0 %v3069_v15  ;;  %v2883_v15 = vor.u32 %v3102_v62, %v2882_v40 }
 0x403   : > { %v3272_v28 = vpop.eup %3271 }
 0x404   : > { %2747 = vmatmul.msk.bf16.vlgmr.msrb.gmra.mxu3 %vm949_vm14, %v1378_v53  ;;  %v3274_v60 = vpop.eup %3273  ;;  %v1523_v25 = vmul.f32 %v3272_v28, %v3915_v56  ;;  %v3201_v28 = vld [vmem:[%s4145_s7] ss:$0 sm:$0xff] }
 0x405   : > { %v1522_v44 = vmul.f32 %v3274_v60, %v3902_v46  ;;  %v3276_v46 = vpop.eup %3275  ;;  %1682 = vmatpush.bf16.msrb.mxu0 %v3068_v2  ;;  %v2884_v2 = vld [vmem:[#allocation7 + $0xd0] sm:$0xf0] }
 0x406   : > { %v1527_v54 = vpack.c.bf16 %v1523_v25, %v1523_v25  ;;  %v1525_v35 = vmul.f32 %v3276_v46, %v3911_v48  ;;  %v3351_v25 = vld [vmem:[%s3654_s17] sm:$0xff] }
 0x407   : > { %v1023_v29 = vpop.f32.mrf.mxu3  ;;  %v1526_v59 = vpack.c.bf16 %v1522_v44, %v1522_v44 }
 0x408   : > { %1055 = vst.msk [vmem:[#allocation2 + $0x8] sm:$0xff] %vm902_vm13, %v1023_v29  ;;  %v1533_v49 = vunpack.c.l.b16 %v1527_v54  ;;  %v1529_v7 = vpack.c.bf16 %v1525_v35, %v1525_v35 }
 0x409   : > { %v1532_v51 = vunpack.c.l.b16 %v1526_v59  ;;  %v3352_v59 = vld [vmem:[%s3654_s17 + $0x8] sm:$0xff] }
 0x40a   : > { %v1558_v11 = vunpack.c.l.b16 %v1529_v7 }
 0x40b   : > { %v1534_v55 = vpack.c.b16 %v1533_v49, %v1532_v51 }
 0x40f   : > { %v1049_v58 = vpop.f32.mrf.mxu3 }
 0x410   : > { %1056 = vst.msk [vmem:[#allocation2 + $0x10] sm:$0xff] %vm902_vm13, %v1049_v58 }
 0x413   : > { %v1536_v1 = vpop.permute.xlu1 %1535 }
 0x414   : > { %1548 = vmatpush.bf16.msrb.mxu2 %v1536_v1  ;;  %v3353_v1 = vld [vmem:[%s3654_s17 + $0x10] sm:$0xff] }
 0x417   : > { %v1051_v57 = vpop.f32.mrf.mxu3  ;;  %2750 = vmatmul.msk.bf16.vlgmr.msrb.gmra.mxu2 %vm949_vm14, %v1534_v55 }
 0x418   : > { %1057 = vst.msk [vmem:[#allocation2 + $0x18] sm:$0xff] %vm902_vm13, %v1051_v57 }
 0x41b   : > { %v1561_v56 = vpop.permute.xlu1 %1560 }
 0x41c   : > { %v1514_v4 = vpop.xlane.xlu2 %1513  ;;  %1573 = vmatpush.bf16.msra.mxu3 %v1561_v56 }
 0x41d   : > { %3277 = vrcp.f32 %v1514_v4  ;;  %v3354_v4 = vld [vmem:[%s3654_s17 + $0x18] sm:$0xff] }
 0x423   : > { %v3278_v6 = vpop.eup %3277 }
 0x424   : > { %v1524_v24 = vmul.f32 %v3278_v6, %v3923_v63 }
 0x426   : > { %v1528_v8 = vpack.c.bf16 %v1524_v24, %v1524_v24 }
 0x428   : > { %v1557_v14 = vunpack.c.l.b16 %v1528_v8 }
 0x42a   : > { %v1559_v17 = vpack.c.b16 %v1558_v11, %v1557_v14 }
 0x42c   : > { %2751 = vmatmul.msk.bf16.vlgmr.msra.gmra.mxu3 %vm949_vm14, %v1559_v17 }
 0x466   : > { %v1188_v31 = vpop.f32.mrf.mxu2 }
 0x467   : > { %1222 = vrot.lane.b32.xlu0 %v1188_v31, %s3508_s22 }
 0x46e   : > { %v1190_v18 = vpop.f32.mrf.mxu2 }
 0x46f   : > { %1224 = vrot.lane.b32.xlu1 %v1190_v18, %s3508_s22 }
 0x476   : > { %v1369_v16 = vpop.f32.mrf.mxu2 }
 0x477   : > { %1403 = vrot.lane.b32.xlu1 %v1369_v16, %s3507_s20  ;;  %v1213_v48 = vpop.f32.mrf.mxu3 }
 0x47e   : > { %v1371_v19 = vpop.f32.mrf.mxu2 }
 0x47f   : > { %1226 = vrot.lane.b32.xlu1 %v1213_v48, %s3508_s22  ;;  %1405 = vrot.lane.b32.xlu2 %v1371_v19, %s3507_s20  ;;  %v1215_v63 = vpop.f32.mrf.mxu3 }
 0x487   : > { %v1394_v26 = vpop.f32.mrf.mxu3 }
 0x48f   : > { %v1396_v27 = vpop.f32.mrf.mxu3 }
 0x49a   : > { %v1550_v21 = vpop.f32.mrf.mxu2 }
 0x49b   : > { %1584 = vrot.lane.b32.xlu1 %v1550_v21, %s3506_s30 }
 0x4a2   : > { %v1552_v13 = vpop.f32.mrf.mxu2 }
 0x4a3   : > { %1586 = vrot.lane.b32.xlu0 %v1552_v13, %s3506_s30  ;;  %1407 = vrot.lane.b32.xlu1 %v1394_v26, %s3507_s20  ;;  %v2898_v13 = vld [vmem:[#allocation7 + $0xe0] sm:$0xf] }
 0x4ab   : > { %1228 = vrot.lane.b32.xlu0 %v1215_v63, %s3508_s22 }
 0x4af   : > { %v1575_v61 = vpop.f32.mrf.mxu3 }
 0x4b0   : > { %1588 = vrot.lane.b32.xlu2 %v1575_v61, %s3506_s30  ;;  %v3104_v61 = vld [vmem:[#allocation7 + $0xe4] sm:$0xf] }
 0x4b3   : > { %1409 = vrot.lane.b32.xlu0 %v1396_v27, %s3507_s20  ;;  %v3106_v27 = vld [vmem:[#allocation7 + $0xec] sm:$0xf0] }
 0x4b7   : > { %v1577_v30 = vpop.f32.mrf.mxu3 }
 0x4b8   : > { %1590 = vrot.lane.b32.xlu1 %v1577_v30, %s3506_s30  ;;  %v2899_v30 = vor.u32 %v3106_v27, %v2898_v13  ;;  %s4166_s30 = sld [smem:[#allocation16_spill]] }
 0x4ba   : > { %1998 = vmatpush.bf16.msrb.mxu1 %v2899_v30  ;;  %v2844_v30 = vld [vmem:[#allocation7 + $0x78] sm:$0xf0] }
 0x4be   : > { %1999 = vmatpush.bf16.msrb.mxu1 %v2883_v15  ;;  %v2828_v15 = vld [vmem:[#allocation7 + $0x58] sm:$0xf0] }
 0x4d9   : > { %v1223_v36 = vpop.permute.xlu0 %1222  ;;  %v1406_v37 = vpop.permute.xlu2 %1405 }
 0x4da   : > { %1235 = vst.msk [vmem:[#allocation2] sm:$0xff] %vm1234_vm15, %v1223_v36  ;;  %v2903_v36 = vor.u32 %v3104_v61, %v2900_v32  ;;  %v3089_v61 = vld [vmem:[#allocation7 + $0x6c] sm:$0xf] }
 0x4db   : > { %v2847_v32 = vor.u32 %v3089_v61, %v2844_v30 }
 0x4dc   : > { %2017 = vmatpush.bf16.msra.mxu2 %v2903_v36  ;;  %v3084_v36 = vld [vmem:[#allocation7 + $0x44] sm:$0xf] }
 0x4e1   : > { %v1225_v5 = vpop.permute.xlu1 %1224 }
 0x4e2   : > { %1236 = vst.msk [vmem:[#allocation2 + $0x8] sm:$0xff] %vm1234_vm15, %v1225_v5  ;;  %v2907_v5 = vor.u32 %v3107_v33, %v2906_v20  ;;  %v2818_v20 = vld [vmem:[#allocation7 + $0x40] sm:$0xf]  ;;  %v3086_v33 = vld [vmem:[#allocation7 + $0x4c] sm:$0xf0] }
 0x4e3   : > { %1417 = vst.msk [vmem:[#allocation2 + $0x8] sm:$0xff] %vm1415_vm0, %v1406_v37  ;;  %v3105_v37 = vld [vmem:[#allocation7 + $0xec] sm:$0xf] }
 0x4e4   : > { %2036 = vmatpush.bf16.msrb.mxu3 %v2907_v5  ;;  %v2819_v5 = vor.u32 %v3086_v33, %v2818_v20 }
 0x4e9   : > { %v1404_v38 = vpop.permute.xlu1 %1403 }
 0x4ea   : > { %1416 = vst.msk [vmem:[#allocation2] sm:$0xff] %vm1415_vm0, %v1404_v38  ;;  %v2908_v38 = vld [vmem:[#allocation7 + $0xf8] sm:$0xf0] }
 0x4eb   : > { %v2911_v39 = vor.u32 %v3105_v37, %v2908_v38  ;;  %v2820_v37 = vld [vmem:[#allocation7 + $0x50] sm:$0xf0]  ;;  %v2826_v38 = vld [vmem:[#allocation7 + $0x48] sm:$0xf] }
 0x4ec   : > { %v2823_v40 = vor.u32 %v3084_v36, %v2820_v37 }
 0x4ed   : > { %2055 = vmatpush.bf16.msra.mxu0 %v2911_v39  ;;  %v3087_v39 = vld [vmem:[#allocation7 + $0x54] sm:$0xf0] }
 0x4ee   : > { %v2827_v62 = vor.u32 %v3087_v39, %v2826_v38  ;;  %v3202_v38 = vld [vmem:[%s4146_s8] ss:$0 sm:$0xff] }
 0x4f1   : > { %v1227_v41 = vpop.permute.xlu1 %1226 }
 0x4f2   : > { %1237 = vst.msk [vmem:[#allocation2 + $0x10] sm:$0xff] %vm1234_vm15, %v1227_v41  ;;  %v3100_v41 = vld [vmem:[#allocation7 + $0xc4] sm:$0xf] }
 0x50a   : > { %v1589_v3 = vpop.permute.xlu2 %1588 }
 0x50d   : > { %v1585_v22 = vpop.permute.xlu1 %1584 }
 0x50e   : > { %1597 = vst.msk [vmem:[#allocation2] sm:$0xff] %vm1596_vm1, %v1585_v22  ;;  %v2890_v22 = vld [vmem:[#allocation7 + $0xc8] sm:$0xf] }
 0x515   : > { %v1408_v47 = vpop.permute.xlu1 %1407  ;;  %v1587_v42 = vpop.permute.xlu0 %1586  ;;  %v1601_v43 = vld [vmem:[#allocation2] sm:$0xff] }
 0x516   : > { %1418 = vst.msk [vmem:[#allocation2 + $0x10] sm:$0xff] %vm1415_vm0, %v1408_v47  ;;  %v3103_v47 = vld [vmem:[#allocation7 + $0xd4] sm:$0xf0] }
 0x517   : > { %1599 = vst.msk [vmem:[#allocation2 + $0x10] sm:$0xff] %vm1596_vm1, %v1589_v3  ;;  %v2891_v3 = vor.u32 %v3103_v47, %v2890_v22  ;;  %v2802_v22 = vld [vmem:[#allocation7 + $0x20] sm:$0xf]  ;;  %v3082_v47 = vld [vmem:[#allocation7 + $0x2c] sm:$0xf0] }
 0x518   : > { %1598 = vst.msk [vmem:[#allocation2 + $0x8] sm:$0xff] %vm1596_vm1, %v1587_v42  ;;  %v2887_v42 = vor.u32 %v3100_v41, %v2884_v2  ;;  %v3085_v41 = vld [vmem:[#allocation7 + $0x4c] sm:$0xf] }
 0x519   : > { %2037 = vmatpush.bf16.msrb.mxu3 %v2891_v3  ;;  %v2831_v2 = vor.u32 %v3085_v41, %v2828_v15  ;;  %v2803_v3 = vor.u32 %v3082_v47, %v2802_v22 }
 0x51a   : > { %2018 = vmatpush.bf16.msra.mxu2 %v2887_v42  ;;  %v3080_v42 = vld [vmem:[#allocation7 + $0x24] sm:$0xf] }
 0x51d   : > { %v1229_v12 = vpop.permute.xlu0 %1228 }
 0x51e   : > { %1238 = vst.msk [vmem:[#allocation2 + $0x18] sm:$0xff] %vm1234_vm15, %v1229_v12  ;;  %v1603_v50 = vld [vmem:[#allocation2 + $0x10] sm:$0xff]  ;;  %v3101_v12 = vld [vmem:[#allocation7 + $0xcc] sm:$0xf] }
 0x51f   : > { %v1602_v45 = vld [vmem:[#allocation2 + $0x8] sm:$0xff] }
 0x520   : > { %v1605_v9 = vpack.c.bf16 %v1602_v45, %v1601_v43  ;;  %v2892_v43 = vld [vmem:[#allocation7 + $0xd8] sm:$0xf0] }
 0x521   : > { %v2895_v45 = vor.u32 %v3101_v12, %v2892_v43  ;;  %v2804_v12 = vld [vmem:[#allocation7 + $0x30] sm:$0xf0]  ;;  %v2810_v43 = vld [vmem:[#allocation7 + $0x28] sm:$0xf] }
 0x522   : > { %1683 = vmatmul.bf16.vlgmr.msrb.gmra.mxu0 %v1605_v9  ;;  %v2866_v9 = vld [vmem:[#allocation7 + $0xa0] sm:$0xf] }
 0x523   : > { %2056 = vmatpush.bf16.msra.mxu0 %v2895_v45  ;;  %v3083_v45 = vld [vmem:[#allocation7 + $0x34] sm:$0xf0] }
 0x525   : > { %v1410_v23 = vpop.permute.xlu0 %1409 }
 0x526   : > { %1419 = vst.msk [vmem:[#allocation2 + $0x18] sm:$0xff] %vm1415_vm0, %v1410_v23  ;;  %v3098_v23 = vld [vmem:[#allocation7 + $0xac] sm:$0xf0] }
 0x52a   : > { %v1591_v34 = vpop.permute.xlu1 %1590 }
 0x52b   : > { %1600 = vst.msk [vmem:[#allocation2 + $0x18] sm:$0xff] %vm1596_vm1, %v1591_v34  ;;  %v3096_v34 = vld [vmem:[#allocation7 + $0xa4] sm:$0xf] }
 0x532   : > { %v1604_v52 = vld [vmem:[#allocation2 + $0x18] sm:$0xff] }
 0x533   : > { %v1606_v53 = vpack.c.bf16 %v1604_v52, %v1603_v50  ;;  %v2867_v50 = vor.u32 %v3098_v23, %v2866_v9  ;;  %v2868_v52 = vld [vmem:[#allocation7 + $0xb0] sm:$0xf0]  ;;  %v2807_v9 = vor.u32 %v3080_v42, %v2804_v12  ;;  %v2811_v23 = vor.u32 %v3083_v45, %v2810_v43 }
 0x535   : > { %1688 = vmatmul.bf16.gmra.mxu0 %v1606_v53  ;;  %v2874_v53 = vld [vmem:[#allocation7 + $0xa8] sm:$0xf]  ;;  %2000 = vmatpush.bf16.msrb.mxu1 %v2867_v50  ;;  %v2812_v50 = vld [vmem:[#allocation7 + $0x38] sm:$0xf0] }
 0x59f   : > { %v1684_v29 = vpop.f32.mrf.mxu0 }
 0x5a0   : > { %v1685_v60 = vadd.f32 %v3201_v28, %v1684_v29  ;;  %v2871_v29 = vor.u32 %v3096_v34, %v2868_v52  ;;  %v3081_v34 = vld [vmem:[#allocation7 + $0x2c] sm:$0xf] }
 0x5a2   : > { %v3979_v44 = vadd.f32 %v3351_v25, %v1685_v60  ;;  %v3097_v25 = vld [vmem:[#allocation7 + $0xac] sm:$0xf]  ;;  %2019 = vmatpush.bf16.msra.mxu2 %v2871_v29  ;;  %v2786_v29 = vld [vmem:[#allocation7] sm:$0xf] }
 0x5a4   : > { %1700 = vadd.xlane.f32.xlu0 %v3979_v44 }
 0x5a7   : > { %v1686_v54 = vpop.f32.mrf.mxu0 }
 0x5a8   : > { %v1687_v58 = vadd.f32 %v3201_v28, %v1686_v54  ;;  %v2876_v54 = vld [vmem:[#allocation7 + $0xb8] sm:$0xf0] }
 0x5aa   : > { %v3983_v49 = vadd.f32 %v3352_v59, %v1687_v58  ;;  %v2879_v58 = vor.u32 %v3097_v25, %v2876_v54  ;;  %v2850_v59 = vld [vmem:[#allocation7 + $0x80] sm:$0xf]  ;;  %v3076_v25 = vld [vmem:[#allocation7 + $0x4] sm:$0xf] }
 0x5ac   : > { %1702 = vadd.xlane.f32.xlu2 %v3983_v49  ;;  %2057 = vmatpush.bf16.msra.mxu0 %v2879_v58  ;;  %v2788_v58 = vld [vmem:[#allocation7 + $0x10] sm:$0xf0] }
 0x5b2   : > { %v1689_v51 = vpop.f32.mrf.mxu0 }
 0x5b3   : > { %v1690_v0 = vadd.f32 %v3201_v28, %v1689_v51  ;;  %v3094_v51 = vld [vmem:[#allocation7 + $0x8c] sm:$0xf0] }
 0x5b5   : > { %v3987_v55 = vadd.f32 %v3353_v1, %v1690_v0  ;;  %v3092_v0 = vld [vmem:[#allocation7 + $0x84] sm:$0xf]  ;;  %v2851_v1 = vor.u32 %v3094_v51, %v2850_v59  ;;  %v2794_v59 = vld [vmem:[#allocation7 + $0x8] sm:$0xf]  ;;  %v3079_v51 = vld [vmem:[#allocation7 + $0x14] sm:$0xf0] }
 0x5b7   : > { %1704 = vadd.xlane.f32.xlu1 %v3987_v55  ;;  %2001 = vmatpush.bf16.msrb.mxu1 %v2851_v1  ;;  %v2791_v1 = vor.u32 %v3076_v25, %v2788_v58 }
 0x5ba   : > { %v1691_v57 = vpop.f32.mrf.mxu0 }
 0x5bb   : > { %v1692_v56 = vadd.f32 %v3201_v28, %v1691_v57  ;;  %v3099_v28 = vld [vmem:[#allocation7 + $0xb4] sm:$0xf0]  ;;  %v2852_v57 = vld [vmem:[#allocation7 + $0x90] sm:$0xf0] }
 0x5bc   : > { %v2875_v60 = vor.u32 %v3099_v28, %v2874_v53  ;;  %v2815_v53 = vor.u32 %v3081_v34, %v2812_v50 }
 0x5bd   : > { %v3991_v46 = vadd.f32 %v3354_v4, %v1692_v56  ;;  %v2858_v56 = vld [vmem:[#allocation7 + $0x88] sm:$0xf]  ;;  %v3095_v4 = vld [vmem:[#allocation7 + $0x94] sm:$0xf0] }
 0x5be   : > { %2038 = vmatpush.bf16.msrb.mxu3 %v2875_v60  ;;  %v3078_v60 = vld [vmem:[#allocation7 + $0xc] sm:$0xf0] }
 0x5bf   : > { %1706 = vadd.xlane.f32.xlu0 %v3991_v46  ;;  %v2787_v54 = vor.u32 %v3078_v60, %v2786_v29 }
 0x617   : > { %v1701_v35 = vpop.xlane.xlu0 %1700 }
 0x618   : > { %v1708_v6 = vmul.f32 %v1701_v35, %v3660_v10  ;;  %v2855_v35 = vor.u32 %v3092_v0, %v2852_v57  ;;  %v2795_v57 = vor.u32 %v3079_v51, %v2794_v59 }
 0x61a   : > { %v3996_v7 = vsub.f32 %v3979_v44, %v1708_v6  ;;  %v2859_v6 = vor.u32 %v3095_v4, %v2858_v56  ;;  %2020 = vmatpush.bf16.msra.mxu2 %v2855_v35  ;;  %v3077_v56 = vld [vmem:[#allocation7 + $0xc] sm:$0xf]  ;;  %v2796_v4 = vld [vmem:[#allocation7 + $0x18] sm:$0xf0] }
 0x61b   : > { %v2799_v35 = vor.u32 %v3077_v56, %v2796_v4  ;;  %v3138_v56 = vld [vmem:[#allocation8 + $0xf0] sm:$0xff]  ;;  %v3123_v4 = vld [vmem:[#allocation8 + $0x78] sm:$0xff] }
 0x61c   : > { %v1716_v24 = vmul.f32 %v3996_v7, %v3996_v7  ;;  %2039 = vmatpush.bf16.msrb.mxu3 %v2859_v6 }
 0x61e   : > { %1720 = vadd.xlane.f32.xlu2 %v1716_v24  ;;  %v3093_v24 = vld [vmem:[#allocation7 + $0x8c] sm:$0xf] }
 0x61f   : > { %v1703_v8 = vpop.xlane.xlu2 %1702 }
 0x620   : > { %v1709_v11 = vmul.f32 %v1703_v8, %v3660_v10  ;;  %v2860_v8 = vld [vmem:[#allocation7 + $0x98] sm:$0xf0] }
 0x622   : > { %v4002_v14 = vsub.f32 %v3983_v49, %v1709_v11  ;;  %v2863_v11 = vor.u32 %v3093_v24, %v2860_v8 }
 0x624   : > { %v1717_v17 = vmul.f32 %v4002_v14, %v4002_v14  ;;  %2058 = vmatpush.bf16.msra.mxu0 %v2863_v11 }
 0x626   : > { %1722 = vadd.xlane.f32.xlu1 %v1717_v17  ;;  %v2834_v17 = vld [vmem:[#allocation7 + $0x60] sm:$0xf] }
 0x628   : > { %2059 = vmatpush.bf16.msra.mxu0 %v2847_v32 }
 0x62a   : > { %v1705_v31 = vpop.xlane.xlu1 %1704 }
 0x62b   : > { %v1710_v18 = vmul.f32 %v1705_v31, %v3660_v10  ;;  %v3090_v31 = vld [vmem:[#allocation7 + $0x6c] sm:$0xf0] }
 0x62c   : > { %2060 = vmatpush.bf16.msra.mxu0 %v2831_v2 }
 0x62d   : > { %v4008_v16 = vsub.f32 %v3987_v55, %v1710_v18  ;;  %v3088_v18 = vld [vmem:[#allocation7 + $0x64] sm:$0xf] }
 0x62f   : > { %v1718_v48 = vmul.f32 %v4008_v16, %v4008_v16 }
 0x630   : > { %2061 = vmatpush.bf16.msra.mxu0 %v2815_v53 }
 0x631   : > { %1724 = vadd.xlane.f32.xlu0 %v1718_v48  ;;  %v2835_v48 = vor.u32 %v3090_v31, %v2834_v17 }
 0x632   : > { %v1707_v19 = vpop.xlane.xlu0 %1706 }
 0x633   : > { %v1711_v63 = vmul.f32 %v1707_v19, %v3660_v10  ;;  %v2836_v19 = vld [vmem:[#allocation7 + $0x70] sm:$0xf0]  ;;  %2002 = vmatpush.bf16.msrb.mxu1 %v2835_v48 }
 0x634   : > { %v2839_v13 = vor.u32 %v3088_v18, %v2836_v19  ;;  %2062 = vmatpush.bf16.msra.mxu0 %v2799_v35  ;;  %v3131_v35 = vld [vmem:[#allocation8 + $0xb8] sm:$0xff] }
 0x635   : > { %v4014_v21 = vsub.f32 %v3991_v46, %v1711_v63  ;;  %v2842_v63 = vld [vmem:[#allocation7 + $0x68] sm:$0xf] }
 0x636   : > { %2021 = vmatpush.bf16.msra.mxu2 %v2839_v13 }
 0x637   : > { %v1719_v26 = vmul.f32 %v4014_v21, %v4014_v21  ;;  %2003 = vmatpush.bf16.msrb.mxu1 %v2819_v5 }
 0x639   : > { %1726 = vadd.xlane.f32.xlu2 %v1719_v26  ;;  %v3091_v26 = vld [vmem:[#allocation7 + $0x74] sm:$0xf0] }
 0x63a   : > { %v2843_v27 = vor.u32 %v3091_v26, %v2842_v63  ;;  %2022 = vmatpush.bf16.msra.mxu2 %v2823_v40 }
 0x63b   : > { %2004 = vmatpush.bf16.msrb.mxu1 %v2803_v3 }
 0x63c   : > { %2040 = vmatpush.bf16.msrb.mxu3 %v2843_v27 }
 0x63e   : > { %2023 = vmatpush.bf16.msra.mxu2 %v2807_v9 }
 0x63f   : > { %2005 = vmatpush.bf16.msrb.mxu1 %v2787_v54 }
 0x640   : > { %2041 = vmatpush.bf16.msrb.mxu3 %v2827_v62 }
 0x642   : > { %2024 = vmatpush.bf16.msra.mxu2 %v2791_v1  ;;  %v3115_v1 = vld [vmem:[#allocation8 + $0x38] sm:$0xff] }
 0x643   : > { %2438 = vmatpush.bf16.msra.mxu1 %v3115_v1 }
 0x644   : > { %2042 = vmatpush.bf16.msrb.mxu3 %v2811_v23 }
 0x646   : > { %2457 = vmatpush.bf16.msrb.mxu2 %v3123_v4 }
 0x648   : > { %2043 = vmatpush.bf16.msrb.mxu3 %v2795_v57  ;;  %v3139_v57 = vld [vmem:[#allocation8 + $0xf8] sm:$0xff] }
 0x649   : > { %2495 = vmatpush.bf16.msrb.mxu0 %v3139_v57 }
 0x64c   : > { %2476 = vmatpush.bf16.msra.mxu3 %v3131_v35 }
 0x64d   : > { %2496 = vmatpush.bf16.msrb.mxu0 %v3138_v56 }
 0x691   : > { %v1721_v52 = vpop.xlane.xlu2 %1720 }
 0x692   : > { %v1728_v28 = vmul.f32 %v1721_v52, %v3660_v10 }
 0x694   : > { %v1732_v0 = vadd.f32 1e-05, %v1728_v28 }
 0x696   : > { %3279 = vrsqrt.f32 %v1732_v0  ;;  %vm1742_vm3 = vweird.f32 %v1732_v0 }
 0x699   : > { %v1723_v6 = vpop.xlane.xlu1 %1722 }
 0x69a   : > { %v1729_v24 = vmul.f32 %v1723_v6, %v3660_v10  ;;  %v3137_v6 = vld [vmem:[#allocation8 + $0xe8] sm:$0xff] }
 0x69b   : > { %2497 = vmatpush.bf16.msrb.mxu0 %v3137_v6 }
 0x69c   : > { %v3280_v8 = vpop.eup %3279  ;;  %v1733_v11 = vadd.f32 1e-05, %v1729_v24  ;;  %v3122_v24 = vld [vmem:[#allocation8 + $0x70] sm:$0xff] }
 0x69d   : > { %v1737_v17 = vmul.f32 %v3280_v8, %v1732_v0  ;;  %vm1743_vm2 = vweird.f32 %v3280_v8  ;;  %2458 = vmatpush.bf16.msrb.mxu2 %v3122_v24 }
 0x69e   : > { %3281 = vrsqrt.f32 %v1733_v11  ;;  %vm1744_vm4 = vmor %vm1742_vm3, %vm1743_vm2  ;;  %vm1752_vm6 = vweird.f32 %v1733_v11 }
 0x69f   : > { %v1738_v31 = vmul.f32 %v3280_v8, %v1737_v17  ;;  %v3136_v17 = vld [vmem:[#allocation8 + $0xe0] sm:$0xff] }
 0x6a0   : > { %2498 = vmatpush.bf16.msrb.mxu0 %v3136_v17 }
 0x6a1   : > { %v1739_v18 = vmul.f32 0.5, %v1738_v31  ;;  %v3121_v31 = vld [vmem:[#allocation8 + $0x68] sm:$0xff] }
 0x6a2   : > { %2459 = vmatpush.bf16.msrb.mxu2 %v3121_v31 }
 0x6a3   : > { %v1740_v48 = vsub.f32 1.5, %v1739_v18  ;;  %v3129_v18 = vld [vmem:[#allocation8 + $0xa8] sm:$0xff] }
 0x6a4   : > { %v1725_v19 = vpop.xlane.xlu0 %1724  ;;  %v3282_v63 = vpop.eup %3281 }
 0x6a5   : > { %v1730_v26 = vmul.f32 %v1725_v19, %v3660_v10  ;;  %v1741_v13 = vmul.f32 %v3280_v8, %v1740_v48  ;;  %v1747_v27 = vmul.f32 %v3282_v63, %v1733_v11  ;;  %vm1753_vm5 = vweird.f32 %v3282_v63  ;;  %v3112_v11 = vld [vmem:[#allocation8 + $0x20] sm:$0xff]  ;;  %v3111_v48 = vld [vmem:[#allocation8 + $0x18] sm:$0xff] }
 0x6a6   : > { %vm1754_vm7 = vmor %vm1752_vm6, %vm1753_vm5  ;;  %v3135_v19 = vld [vmem:[#allocation8 + $0xd8] sm:$0xff] }
 0x6a7   : > { %v1734_v61 = vadd.f32 1e-05, %v1730_v26  ;;  %v1748_v30 = vmul.f32 %v3282_v63, %v1747_v27  ;;  %v1745_v32 = vsel %vm1744_vm4, %v3280_v8, %v1741_v13  ;;  %v3130_v8 = vld [vmem:[#allocation8 + $0xb0] sm:$0xff]  ;;  %2499 = vmatpush.bf16.msrb.mxu0 %v3135_v19  ;;  %v3128_v26 = vld [vmem:[#allocation8 + $0xa0] sm:$0xff] }
 0x6a8   : > { %v1776_v5 = vmul.f32 %v1745_v32, %v3996_v7  ;;  %v3203_v7 = vld [vmem:[%s4147_s9] ss:$0 sm:$0xff]  ;;  %2477 = vmatpush.bf16.msra.mxu3 %v3130_v8  ;;  %v3110_v27 = vld [vmem:[#allocation8 + $0x10] sm:$0xff]  ;;  %v3127_v32 = vld [vmem:[#allocation8 + $0x98] sm:$0xff] }
 0x6a9   : > { %3283 = vrsqrt.f32 %v1734_v61  ;;  %v1749_v20 = vmul.f32 0.5, %v1748_v30  ;;  %vm1762_vm9 = vweird.f32 %v1734_v61  ;;  %v1828_v13 = vld [vmem:[%s4165_s25] sm:$0xf]  ;;  %v3119_v30 = vld [vmem:[#allocation8 + $0x58] sm:$0xff] }
 0x6aa   : > { %v1783_v22 = vmul.f32 %v3202_v38, %v1776_v5  ;;  %v3133_v5 = vld [vmem:[#allocation8 + $0xc8] sm:$0xff] }
 0x6ab   : > { %v1750_v33 = vsub.f32 1.5, %v1749_v20  ;;  %v4035_v20 = vperm.slane %v1828_v13, 0 }
 0x6ac   : > { %v1727_v36 = vpop.xlane.xlu2 %1726  ;;  %v1790_v3 = vadd.f32 %v3203_v7, %v1783_v22  ;;  %2478 = vmatpush.bf16.msra.mxu3 %v3129_v18 }
 0x6ad   : > { %v1731_v37 = vmul.f32 %v1727_v36, %v3660_v10  ;;  %v1751_v39 = vmul.f32 %v3282_v63, %v1750_v33  ;;  %v4037_v33 = vperm.slane %v1828_v13, 3  ;;  %v3109_v36 = vld [vmem:[#allocation8 + $0x8] sm:$0xff] }
 0x6af   : > { %v3284_v40 = vpop.eup %3283  ;;  %v1735_v62 = vadd.f32 1e-05, %v1731_v37  ;;  %v1755_v41 = vsel %vm1754_vm7, %v3282_v63, %v1751_v39  ;;  %v3120_v63 = vld [vmem:[#allocation8 + $0x60] sm:$0xff]  ;;  %v3126_v39 = vld [vmem:[#allocation8 + $0x90] sm:$0xff] }
 0x6b0   : > { %v1757_v15 = vmul.f32 %v3284_v40, %v1734_v61  ;;  %v1777_v2 = vmul.f32 %v1755_v41, %v4002_v14  ;;  %vm1763_vm8 = vweird.f32 %v3284_v40  ;;  %2460 = vmatpush.bf16.msrb.mxu2 %v3120_v63  ;;  %2479 = vmatpush.bf16.msra.mxu3 %v3128_v26  ;;  %v3134_v61 = vld [vmem:[#allocation8 + $0xd0] sm:$0xff] }
 0x6b1   : > { %3285 = vrsqrt.f32 %v1735_v62  ;;  %vm1764_vm10 = vmor %vm1762_vm9, %vm1763_vm8  ;;  %vm1772_vm12 = vweird.f32 %v1735_v62  ;;  %2500 = vmatpush.bf16.msrb.mxu0 %v3134_v61 }
 0x6b2   : > { %v1758_v10 = vmul.f32 %v3284_v40, %v1757_v15  ;;  %v1784_v47 = vmul.f32 %v3202_v38, %v1777_v2  ;;  %v3108_v15 = vld [vmem:[#allocation8] sm:$0xff] }
 0x6b3   : > { %v3132_v2 = vld [vmem:[#allocation8 + $0xc0] sm:$0xff] }
 0x6b4   : > { %v1759_v42 = vmul.f32 0.5, %v1758_v10  ;;  %v1791_v12 = vadd.f32 %v3203_v7, %v1784_v47  ;;  %2461 = vmatpush.bf16.msrb.mxu2 %v3119_v30  ;;  %2480 = vmatpush.bf16.msra.mxu3 %v3127_v32  ;;  %v4049_v47 = vperm.slane %v1828_v13, 2 }
 0x6b5   : > { %2501 = vmatpush.bf16.msrb.mxu0 %v3133_v5 }
 0x6b6   : > { %v1760_v43 = vsub.f32 1.5, %v1759_v42  ;;  %v1794_v9 = vpack.c.bf16 %v1791_v12, %v1790_v3  ;;  %v3117_v42 = vld [vmem:[#allocation8 + $0x48] sm:$0xff] }
 0x6b7   : > { %v3286_v45 = vpop.eup %3285  ;;  %v3125_v3 = vld [vmem:[#allocation8 + $0x88] sm:$0xff] }
 0x6b8   : > { %v1761_v23 = vmul.f32 %v3284_v40, %v1760_v43  ;;  %v1767_v34 = vmul.f32 %v3286_v45, %v1735_v62  ;;  %2006 = vmatmul.bf16.vlgmr.msrb.gmra.mxu1 %v1794_v9  ;;  %2025 = vmatmul.bf16.vlgmr.msra.gmra.mxu2 %v1794_v9  ;;  %vm1773_vm11 = vweird.f32 %v3286_v45 }
 0x6b9   : > { %2044 = vmatmul.bf16.vlgmr.msrb.gmra.mxu3 %v1794_v9  ;;  %2063 = vmatmul.bf16.vlgmr.msra.gmra.mxu0 %v1794_v9  ;;  %vm1774_vm13 = vmor %vm1772_vm12, %vm1773_vm11 }
 0x6ba   : > { %v1768_v14 = vmul.f32 %v3286_v45, %v1767_v34  ;;  %v1765_v50 = vsel %vm1764_vm10, %v3284_v40, %v1761_v23  ;;  %2481 = vmatpush.bf16.msra.mxu3 %v3126_v39  ;;  %2502 = vmatpush.bf16.msrb.mxu0 %v3132_v2 }
 0x6bb   : > { %v1778_v28 = vmul.f32 %v1765_v50, %v4008_v16  ;;  %v3114_v16 = vld [vmem:[#allocation8 + $0x30] sm:$0xff]  ;;  %v3116_v50 = vld [vmem:[#allocation8 + $0x40] sm:$0xff] }
 0x6bc   : > { %v1769_v52 = vmul.f32 0.5, %v1768_v14  ;;  %2439 = vmatpush.bf16.msra.mxu1 %v3114_v16 }
 0x6bd   : > { %v1785_v54 = vmul.f32 %v3202_v38, %v1778_v28 }
 0x6be   : > { %v1770_v53 = vsub.f32 1.5, %v1769_v52  ;;  %2482 = vmatpush.bf16.msra.mxu3 %v3125_v3  ;;  %v3124_v52 = vld [vmem:[#allocation8 + $0x80] sm:$0xff] }
 0x6bf   : > { %v1792_v59 = vadd.f32 %v3203_v7, %v1785_v54 }
 0x6c0   : > { %v1771_v29 = vmul.f32 %v3286_v45, %v1770_v53 }
 0x6c2   : > { %v1775_v60 = vsel %vm1774_vm13, %v3286_v45, %v1771_v29  ;;  %2483 = vmatpush.bf16.msra.mxu3 %v3124_v52 }
 0x6c3   : > { %v1779_v25 = vmul.f32 %v1775_v60, %v4014_v21  ;;  %v3113_v21 = vld [vmem:[#allocation8 + $0x28] sm:$0xff] }
 0x6c4   : > { %2440 = vmatpush.bf16.msra.mxu1 %v3113_v21 }
 0x6c5   : > { %v1786_v58 = vmul.f32 %v3202_v38, %v1779_v25  ;;  %v3118_v38 = vld [vmem:[#allocation8 + $0x50] sm:$0xff] }
 0x6c6   : > { %2462 = vmatpush.bf16.msrb.mxu2 %v3118_v38 }
 0x6c7   : > { %v1793_v51 = vadd.f32 %v3203_v7, %v1786_v58  ;;  %v4046_v7 = vperm.slane %v1828_v13, 1 }
 0x6c8   : > { %2441 = vmatpush.bf16.msra.mxu1 %v3112_v11 }
 0x6c9   : > { %v1795_v0 = vpack.c.bf16 %v1793_v51, %v1792_v59 }
 0x6ca   : > { %2463 = vmatpush.bf16.msrb.mxu2 %v3117_v42 }
 0x6cb   : > { %2011 = vmatmul.bf16.gmra.mxu1 %v1795_v0  ;;  %2030 = vmatmul.bf16.gmra.mxu2 %v1795_v0 }
 0x6cc   : > { %2049 = vmatmul.bf16.gmra.mxu3 %v1795_v0  ;;  %2068 = vmatmul.bf16.gmra.mxu0 %v1795_v0 }
 0x6cd   : > { %2442 = vmatpush.bf16.msra.mxu1 %v3111_v48 }
 0x6ce   : > { %2464 = vmatpush.bf16.msrb.mxu2 %v3116_v50 }
 0x6d1   : > { %2443 = vmatpush.bf16.msra.mxu1 %v3110_v27 }
 0x6d5   : > { %2444 = vmatpush.bf16.msra.mxu1 %v3109_v36 }
 0x6d9   : > { %2445 = vmatpush.bf16.msra.mxu1 %v3108_v15 }
 0x735   : > { %v2007_v37 = vpop.f32.mrf.mxu1 }
 0x736   : > { %v4040_v40 = vadd.f32 %v2007_v37, %v4035_v20  ;;  %v2064_v62 = vpop.f32.mrf.mxu0 }
 0x737   : > { %v4043_v41 = vadd.f32 %v2064_v62, %v4037_v33 }
 0x738   : > { %v2074_v22 = vmul.f32 -1.702, %v4040_v40 }
 0x739   : > { %v2077_v10 = vmul.f32 -1.702, %v4043_v41 }
 0x73a   : > { %v2090_v12 = vmul.f32 1.442695, %v2074_v22 }
 0x73b   : > { %v2096_v43 = vmul.f32 1.442695, %v2077_v10  ;;  %v2026_v45 = vpop.f32.mrf.mxu2 }
 0x73c   : > { %3287 = vpow2.f32 %v2090_v12  ;;  %v4052_v9 = vadd.f32 %v2026_v45, %v4046_v7  ;;  %v2045_v23 = vpop.f32.mrf.mxu3 }
 0x73d   : > { %v4055_v34 = vadd.f32 %v2045_v23, %v4049_v47  ;;  %v2009_v14 = vpop.f32.mrf.mxu1  ;;  %3289 = vpow2.f32 %v2096_v43 }
 0x73e   : > { %v2075_v53 = vmul.f32 -1.702, %v4052_v9  ;;  %v4059_v28 = vadd.f32 %v2009_v14, %v4035_v20  ;;  %v2066_v29 = vpop.f32.mrf.mxu0 }
 0x73f   : > { %v2076_v60 = vmul.f32 -1.702, %v4055_v34  ;;  %v4063_v25 = vadd.f32 %v2066_v29, %v4037_v33 }
 0x740   : > { %v2092_v54 = vmul.f32 1.442695, %v2075_v53  ;;  %v2078_v58 = vmul.f32 -1.702, %v4059_v28 }
 0x741   : > { %v2081_v59 = vmul.f32 -1.702, %v4063_v25  ;;  %v2094_v0 = vmul.f32 1.442695, %v2076_v60 }
 0x742   : > { %v3288_v51 = vpop.eup %3287  ;;  %3291 = vpow2.f32 %v2092_v54  ;;  %v2098_v1 = vmul.f32 1.442695, %v2078_v58 }
 0x743   : > { %v2104_v57 = vmul.f32 1.442695, %v2081_v59  ;;  %v2028_v16 = vpop.f32.mrf.mxu2  ;;  %v3290_v56 = vpop.eup %3289  ;;  %v2122_v21 = vadd.f32 1.0, %v3288_v51 }
 0x744   : > { %3293 = vpow2.f32 %v2098_v1  ;;  %v4068_v4 = vadd.f32 %v2028_v16, %v4046_v7  ;;  %v2047_v35 = vpop.f32.mrf.mxu3  ;;  %v2125_v8 = vadd.f32 1.0, %v3290_v56 }
 0x745   : > { %v4071_v6 = vadd.f32 %v2047_v35, %v4049_v47  ;;  %3295 = vpow2.f32 %v2094_v0 }
 0x746   : > { %v2079_v24 = vmul.f32 -1.702, %v4068_v4  ;;  %3297 = vpow2.f32 %v2104_v57 }
 0x747   : > { %v2080_v11 = vmul.f32 -1.702, %v4071_v6  ;;  %3299 = vrcp.f32 %v2122_v21 }
 0x748   : > { %v2012_v17 = vpop.f32.mrf.mxu1  ;;  %v3292_v31 = vpop.eup %3291  ;;  %v2100_v18 = vmul.f32 1.442695, %v2079_v24 }
 0x749   : > { %v4076_v48 = vadd.f32 %v2012_v17, %v4035_v20  ;;  %v2069_v19 = vpop.f32.mrf.mxu0  ;;  %v2123_v63 = vadd.f32 1.0, %v3292_v31  ;;  %v2102_v27 = vmul.f32 1.442695, %v2080_v11 }
 0x74a   : > { %v4079_v26 = vadd.f32 %v2069_v19, %v4037_v33  ;;  %v3294_v13 = vpop.eup %3293  ;;  %3301 = vpow2.f32 %v2100_v18 }
 0x74b   : > { %v2082_v61 = vmul.f32 -1.702, %v4076_v48  ;;  %3303 = vrcp.f32 %v2125_v8  ;;  %v2126_v30 = vadd.f32 1.0, %v3294_v13  ;;  %v3296_v36 = vpop.eup %3295 }
 0x74c   : > { %v2085_v32 = vmul.f32 -1.702, %v4079_v26  ;;  %3305 = vrcp.f32 %v2123_v63  ;;  %v3298_v37 = vpop.eup %3297  ;;  %v2124_v12 = vadd.f32 1.0, %v3296_v36 }
 0x74d   : > { %v2106_v5 = vmul.f32 1.442695, %v2082_v61  ;;  %3307 = vrcp.f32 %v2126_v30  ;;  %v2129_v62 = vadd.f32 1.0, %v3298_v37  ;;  %v3300_v22 = vpop.eup %3299 }
 0x74e   : > { %v2112_v38 = vmul.f32 1.442695, %v2085_v32  ;;  %v2031_v39 = vpop.f32.mrf.mxu2  ;;  %3309 = vpow2.f32 %v2102_v27 }
 0x74f   : > { %v4084_v15 = vadd.f32 %v2031_v39, %v4046_v7  ;;  %v2050_v2 = vpop.f32.mrf.mxu3  ;;  %3311 = vpow2.f32 %v2106_v5 }
 0x750   : > { %v4087_v10 = vadd.f32 %v2050_v2, %v4049_v47  ;;  %v2014_v42 = vpop.f32.mrf.mxu1  ;;  %v3302_v3 = vpop.eup %3301  ;;  %3313 = vrcp.f32 %v2129_v62 }
 0x751   : > { %v2083_v43 = vmul.f32 -1.702, %v4084_v15  ;;  %v4091_v45 = vadd.f32 %v2014_v42, %v4035_v20  ;;  %v2071_v23 = vpop.f32.mrf.mxu0  ;;  %v3304_v14 = vpop.eup %3303  ;;  %v2127_v50 = vadd.f32 1.0, %v3302_v3  ;;  %3315 = vpow2.f32 %v2112_v38 }
 0x752   : > { %v4094_v52 = vadd.f32 %v2071_v23, %v4037_v33  ;;  %v3306_v53 = vpop.eup %3305  ;;  %v2084_v60 = vmul.f32 -1.702, %v4087_v10  ;;  %v2154_v20 = vmul.f32 %v3300_v22, %v4040_v40  ;;  %v2157_v40 = vmul.f32 %v3304_v14, %v4043_v41 }
 0x753   : > { %v2108_v29 = vmul.f32 1.442695, %v2083_v43  ;;  %v2086_v54 = vmul.f32 -1.702, %v4091_v45  ;;  %v3308_v58 = vpop.eup %3307  ;;  %3317 = vrcp.f32 %v2127_v50  ;;  %v2155_v18 = vmul.f32 %v3306_v53, %v4052_v9 }
 0x754   : > { %v2089_v59 = vmul.f32 -1.702, %v4094_v52  ;;  %v3310_v51 = vpop.eup %3309  ;;  %3319 = vrcp.f32 %v2124_v12  ;;  %v2158_v0 = vmul.f32 %v3308_v58, %v4059_v28  ;;  %v2110_v24 = vmul.f32 1.442695, %v2084_v60 }
 0x755   : > { %v2114_v1 = vmul.f32 1.442695, %v2086_v54  ;;  %v3312_v57 = vpop.eup %3311  ;;  %v2128_v33 = vadd.f32 1.0, %v3310_v51  ;;  %3321 = vpow2.f32 %v2108_v29 }
 0x756   : > { %v2120_v16 = vmul.f32 1.442695, %v2089_v59  ;;  %v2033_v56 = vpop.f32.mrf.mxu2  ;;  %v3314_v35 = vpop.eup %3313  ;;  %v2170_v21 = vpack.c.bf16 %v2158_v0, %v2154_v20  ;;  %v2130_v27 = vadd.f32 1.0, %v3312_v57 }
 0x757   : > { %3323 = vpow2.f32 %v2114_v1  ;;  %v4102_v8 = vadd.f32 %v2033_v56, %v4046_v7  ;;  %v2052_v11 = vpop.f32.mrf.mxu3  ;;  %v3316_v17 = vpop.eup %3315  ;;  %v2161_v31 = vmul.f32 %v3314_v35, %v4063_v25  ;;  %v3204_v35 = vld [vmem:[%s4166_s30] ss:$0 sm:$0xff] }
 0x758   : > { %3325 = vrcp.f32 %v2128_v33  ;;  %v4107_v28 = vadd.f32 %v2052_v11, %v4049_v47  ;;  %2446 = vmatmul.bf16.vlgmr.msra.gmra.mxu1 %v2170_v21  ;;  %v2133_v30 = vadd.f32 1.0, %v3316_v17 }
 0x759   : > { %v2087_v19 = vmul.f32 -1.702, %v4102_v8  ;;  %v3318_v63 = vpop.eup %3317  ;;  %v2173_v13 = vpack.c.bf16 %v2161_v31, %v2157_v40  ;;  %3327 = vpow2.f32 %v2120_v16 }
 0x75a   : > { %v2088_v7 = vmul.f32 -1.702, %v4107_v28  ;;  %v3320_v61 = vpop.eup %3319  ;;  %v2159_v41 = vmul.f32 %v3318_v63, %v4068_v4  ;;  %3329 = vpow2.f32 %v2110_v24 }
 0x75b   : > { %v2116_v25 = vmul.f32 1.442695, %v2087_v19  ;;  %v3322_v32 = vpop.eup %3321  ;;  %2503 = vmatmul.bf16.vlgmr.msrb.gmra.mxu0 %v2173_v13  ;;  %v2156_v38 = vmul.f32 %v3320_v61, %v4055_v34 }
 0x75c   : > { %v2171_v36 = vpack.c.bf16 %v2159_v41, %v2155_v18  ;;  %v2118_v9 = vmul.f32 1.442695, %v2088_v7  ;;  %v2131_v4 = vadd.f32 1.0, %v3322_v32 }
 0x75d   : > { %v3324_v47 = vpop.eup %3323  ;;  %3331 = vpow2.f32 %v2116_v25 }
 0x75e   : > { %v3326_v5 = vpop.eup %3325  ;;  %3333 = vrcp.f32 %v2130_v27  ;;  %v2134_v37 = vadd.f32 1.0, %v3324_v47  ;;  %2465 = vmatmul.bf16.vlgmr.msrb.gmra.mxu2 %v2171_v36 }
 0x75f   : > { %v2160_v39 = vmul.f32 %v3326_v5, %v4071_v6  ;;  %3335 = vrcp.f32 %v2133_v30  ;;  %v3328_v62 = vpop.eup %3327 }
 0x760   : > { %3337 = vrcp.f32 %v2134_v37  ;;  %v3330_v2 = vpop.eup %3329  ;;  %v2137_v42 = vadd.f32 1.0, %v3328_v62 }
 0x761   : > { %v2172_v22 = vpack.c.bf16 %v2160_v39, %v2156_v38  ;;  %3339 = vpow2.f32 %v2118_v9  ;;  %v2132_v43 = vadd.f32 1.0, %v3330_v2 }
 0x762   : > { %3341 = vrcp.f32 %v2137_v42 }
 0x763   : > { %v3332_v3 = vpop.eup %3331  ;;  %2484 = vmatmul.bf16.vlgmr.msra.gmra.mxu3 %v2172_v22  ;;  %3343 = vrcp.f32 %v2131_v4 }
 0x764   : > { %v3334_v12 = vpop.eup %3333  ;;  %v2135_v23 = vadd.f32 1.0, %v3332_v3 }
 0x765   : > { %v3336_v14 = vpop.eup %3335  ;;  %v2162_v50 = vmul.f32 %v3334_v12, %v4076_v48 }
 0x766   : > { %v3338_v34 = vpop.eup %3337  ;;  %3345 = vrcp.f32 %v2135_v23  ;;  %v2165_v59 = vmul.f32 %v3336_v14, %v4079_v26 }
 0x767   : > { %v3340_v6 = vpop.eup %3339  ;;  %v2166_v53 = vmul.f32 %v3338_v34, %v4091_v45  ;;  %3347 = vrcp.f32 %v2132_v43 }
 0x768   : > { %v2136_v29 = vadd.f32 1.0, %v3340_v6  ;;  %v3342_v60 = vpop.eup %3341 }
 0x769   : > { %v2174_v54 = vpack.c.bf16 %v2166_v53, %v2162_v50  ;;  %v3344_v58 = vpop.eup %3343  ;;  %v2169_v51 = vmul.f32 %v3342_v60, %v4094_v52 }
 0x76a   : > { %3349 = vrcp.f32 %v2136_v29  ;;  %v2163_v1 = vmul.f32 %v3344_v58, %v4084_v15 }
 0x76b   : > { %2451 = vmatmul.bf16.gmra.mxu1 %v2174_v54  ;;  %v2177_v0 = vpack.c.bf16 %v2169_v51, %v2165_v59 }
 0x76c   : > { %v3346_v20 = vpop.eup %3345 }
 0x76d   : > { %v2167_v57 = vmul.f32 %v3346_v20, %v4102_v8  ;;  %v3348_v48 = vpop.eup %3347  ;;  %2508 = vmatmul.bf16.gmra.mxu0 %v2177_v0 }
 0x76e   : > { %v2164_v16 = vmul.f32 %v3348_v48, %v4087_v10 }
 0x76f   : > { %v2175_v45 = vpack.c.bf16 %v2167_v57, %v2163_v1 }
 0x770   : > { %v3350_v33 = vpop.eup %3349 }
 0x771   : > { %v2168_v56 = vmul.f32 %v3350_v33, %v4107_v28  ;;  %2470 = vmatmul.bf16.gmra.mxu2 %v2175_v45 }
 0x773   : > { %v2176_v26 = vpack.c.bf16 %v2168_v56, %v2164_v16 }
 0x775   : > { %2489 = vmatmul.bf16.gmra.mxu3 %v2176_v26 }
 0x7d5   : > { %v2447_v52 = vpop.f32.mrf.mxu1 }
 0x7d6   : > { %v2448_v15 = vadd.f32 %v3204_v35, %v2447_v52 }
 0x7d8   : > { %v2504_v8 = vpop.f32.mrf.mxu0 }
 0x7dd   : > { %v2449_v11 = vpop.f32.mrf.mxu1 }
 0x7de   : > { %v2450_v31 = vadd.f32 %v3204_v35, %v2449_v11 }
 0x7e0   : > { %v2506_v27 = vpop.f32.mrf.mxu0 }
 0x7e1   : > { %v2466_v21 = vpop.f32.mrf.mxu2 }
 0x7e2   : > { %v2467_v24 = vadd.f32 %v2466_v21, %v2448_v15 }
 0x7e6   : > { %v2485_v17 = vpop.f32.mrf.mxu3 }
 0x7e7   : > { %v2486_v40 = vadd.f32 %v2485_v17, %v2467_v24 }
 0x7e8   : > { %v2452_v13 = vpop.f32.mrf.mxu1 }
 0x7e9   : > { %v2505_v10 = vadd.f32 %v2504_v8, %v2486_v40  ;;  %v2468_v28 = vpop.f32.mrf.mxu2  ;;  %v2453_v30 = vadd.f32 %v3204_v35, %v2452_v13 }
 0x7ea   : > { %v2469_v19 = vadd.f32 %v2468_v28, %v2450_v31  ;;  %v2509_v47 = vpop.f32.mrf.mxu0 }
 0x7eb   : > { %v2514_v18 = vadd.f32 %v2505_v10, %v3979_v44 }
 0x7ed   : > { %2518 = vst [vmem:[%s541_s26] sm:$0xff] %v2514_v18 }
 0x7ee   : > { %v2487_v63 = vpop.f32.mrf.mxu3 }
 0x7ef   : > { %v2488_v7 = vadd.f32 %v2487_v63, %v2469_v19 }
 0x7f0   : > { %v2454_v36 = vpop.f32.mrf.mxu1 }
 0x7f1   : > { %v2507_v61 = vadd.f32 %v2506_v27, %v2488_v7  ;;  %v2455_v37 = vadd.f32 %v3204_v35, %v2454_v36 }
 0x7f2   : > { %v2511_v22 = vpop.f32.mrf.mxu0 }
 0x7f3   : > { %v2515_v41 = vadd.f32 %v2507_v61, %v3983_v49 }
 0x7f4   : > { %v2471_v25 = vpop.f32.mrf.mxu2 }
 0x7f5   : > { %2519 = vst [vmem:[%s541_s26 + $0x8] sm:$0xff] %v2515_v41  ;;  %v2472_v32 = vadd.f32 %v2471_v25, %v2453_v30 }
 0x7f8   : > { %v2490_v9 = vpop.f32.mrf.mxu3 }
 0x7f9   : > { %v2491_v5 = vadd.f32 %v2490_v9, %v2472_v32 }
 0x7fb   : > { %v2510_v38 = vadd.f32 %v2509_v47, %v2491_v5 }
 0x7fc   : > { %v2473_v44 = vpop.f32.mrf.mxu2 }
 0x7fd   : > { %v2516_v39 = vadd.f32 %v2510_v38, %v3987_v55  ;;  %v2474_v62 = vadd.f32 %v2473_v44, %v2455_v37 }
 0x7ff   : > { %2520 = vst [vmem:[%s541_s26 + $0x10] sm:$0xff] %v2516_v39 }
 0x800   : > { %v2492_v4 = vpop.f32.mrf.mxu3 }
 0x801   : > { %v2493_v2 = vadd.f32 %v2492_v4, %v2474_v62 }
 0x803   : > { %v2512_v42 = vadd.f32 %v2511_v22, %v2493_v2 }
 0x805   : > { %v2517_v49 = vadd.f32 %v2512_v42, %v3991_v46 }
 0x807   : > { %2521 = vst [vmem:[%s541_s26 + $0x18] sm:$0xff] %v2517_v49 }
 0x808 PF: > { %s27_s29 = sadd.s32 1, %s3493_s29  }
 0x809   : > { %p24_p7 = scmp.ge.s32.totalorder %s27_s29, 4  }
 0x80b   :  { %26 = sbr.rel (!%p24_p7) target bundleno = 9 (0x9), region = 123 }
 0x810   :  { %2546 = vsyncpa [#allocation4], 1 }
 0x811   :  { %2548 = vsyncpa [#allocation4 + $0x1], 1 }
 0x812   :  { %2549 = vsyncpa [#allocation6], 1 }
 0x813   :  { %2550 = vsyncpa [#allocation9], 1 }

// kernel: clip_forward.3
= control target key start
LH: loop header
LB: loop body
LE: loop exit
PB: predicated region body
PF: predicated region fallthrough
CT: control target
= control target key end

     0   :  { %s4455_s0 = inlined_call_operand.vmem [shape: f32[4,16,128], index: 0, kind: input, shape index: {}]   ;;  %s4456_s1 = inlined_call_operand.vmem [shape: f32[16,16], index: 1, kind: input, shape index: {}]   ;;  %s4457_s2 = inlined_call_operand.vmem [shape: f32[1,128], index: 2, kind: input, shape index: {}]   ;;  %s4458_s3 = inlined_call_operand.vmem [shape: f32[1,128], index: 3, kind: input, shape index: {}]   ;;  %s4459_s4 = inlined_call_operand.vmem [shape: bf16[128,384], index: 4, kind: input, shape index: {}]   ;;  %s4460_s5 = inlined_call_operand.vmem [shape: f32[1,384], index: 5, kind: input, shape index: {}]   ;;  %s4461_s6 = inlined_call_operand.hbm [shape: bf16[128,128], index: 6, kind: input, shape index: {}]   ;;  %s4462_s7 = inlined_call_operand.hbm [shape: f32[1,128], index: 7, kind: input, shape index: {}]   ;;  %s4463_s8 = inlined_call_operand.vmem [shape: f32[1,128], index: 8, kind: input, shape index: {}]   ;;  %s4464_s9 = inlined_call_operand.vmem [shape: f32[1,128], index: 9, kind: input, shape index: {}]   ;;  %s4465_s10 = inlined_call_operand.vmem [shape: bf16[128,512], index: 10, kind: input, shape index: {}]   ;;  %s4466_s11 = inlined_call_operand.vmem [shape: f32[1,512], index: 11, kind: input, shape index: {}]   ;;  %s4467_s12 = inlined_call_operand.vmem [shape: bf16[512,128], index: 12, kind: input, shape index: {}]   ;;  %s4468_s13 = inlined_call_operand.hbm [shape: f32[1,128], index: 13, kind: input, shape index: {}]   ;;  %s4469_s14 = inlined_call_operand.vmem [shape: f32[4,16,128], index: 14, kind: output, shape index: {}]  }
   0x1   :  { %4470 = sst [smem:[#allocation10_spill]] %s4462_s7 }
   0x2   :  { %19 = vsyncpa [#allocation4], 0 }
   0x3   :  { %20 = vsyncpa [#allocation6], 0  ;;  %s3498_s29 = smov 0  }
   0x4 LB: > { %s4471_s7 = sld [smem:[#allocation10_spill]]  ;;  %s2590_s17 = sadd.s32 4294967295, %s3412_s29   ;;  %s3412_s29 = sphi %s3498_s29, %s26_s29  }
   0x5   : > { %p2592_p0 = scmp.ge.s32.totalorder %s3412_s29, 1  ;;  %p356_p1 = scmp.lt.s32.totalorder %s3412_s29, 3 }
   0x6   : > { %p3509_p2 = scmp.eq.s32.totalorder %s2590_s17, 0  ;;  %s3414_s20 = smov [#allocation5]  }
   0x7   : > { %p3513_p3 = pnand %p2592_p0, %p356_p1  ;;  %s399_s21 = sshll.u32 %s3414_s20, 4  ;;  %s400_s21 = int_to_ptr.vmem [resolvable:$true] %s399_s21 }
   0x8   : > { %s382_s24 = sshll.u32 %s4461_s6, 4  ;;  %s3415_s25 = smov [#allocation3]   ;;  %s383_s24 = int_to_ptr.hbm [resolvable:$true] %s382_s24 }
   0x9   : > { %p3119_p4 = pneg %p3513_p3  ;;  %s384_s26 = sshll.u32 %s3415_s25, 4  ;;  %s385_s26 = int_to_ptr.vmem [resolvable:$true] %s384_s26 }
   0xa   : > { %s397_s16 = sshll.u32 %s4471_s7, 4  ;;  %s424_s30 = sshll.u32 %s4468_s13, 4  ;;  %s398_s16 = int_to_ptr.hbm [resolvable:$true] %s397_s16  ;;  %s425_s30 = int_to_ptr.hbm [resolvable:$true] %s424_s30 }
   0xb   : > { %p3120_p5 = pnand %p3509_p2, %p3119_p4  ;;  %s3416_s15 = smov 64  }
   0xc   : > { %s3417_s20 = smov 4   ;;  %s3418_s7 = smov [#allocation7]  }
   0xd   : > { %3125 = dma.hbm_to_vmem [thread:$0]  (!%p3120_p5), %s398_s16, 16, %s400_s21, [#allocation6]  }
   0xe   : > { %3122 = dma.hbm_to_vmem [thread:$0]  (!%p3120_p5), %s383_s24, 1024, %s385_s26, [#allocation4], %s3416_s15, %s3416_s15, %s3417_s20  }
   0xf   : > { %s426_s22 = sshll.u32 %s3418_s7, 4  ;;  %449 = sbr.rel (%p3513_p3) target bundleno = 2043 (0x7fb), region = 76  ;;  %s427_s22 = int_to_ptr.vmem [resolvable:$true] %s426_s22 }
  0x10   : > { %3128 = dma.hbm_to_vmem [thread:$0]  (!%p3120_p5), %s425_s30, 16, %s427_s22, [#allocation6]  }
  0x14   : > { %3403 = dma.done.wait (%p3509_p2), [#allocation4], 1024  }
  0x15   : > { %3405 = vsyncadd (%p3509_p2), [#allocation4], 4294966272 }
  0x16   : > { %3407 = dma.done.wait (%p3509_p2), [#allocation6], 32  }
  0x17   : > { %3409 = vsyncadd (%p3509_p2), [#allocation6], 4294967264  ;;  %s2601_s16 = sshll.u32 %s2590_s17, 1  ;;  %v3419_v4 = vmov 128.0   ;;  %v2693_v27 = vld [vmem:[%s4459_s4 + $0xa8] sm:$0xf] }
  0x18   : > { %p509_p6 = scmp.lt.s32.totalorder %s2601_s16, 3  ;;  %3158 = vrcp.f32 %v3419_v4  ;;  %v3033_v28 = vld [vmem:[%s4459_s4 + $0xb0] sm:$0xf0]  ;;  %v3032_v29 = vld [vmem:[%s4459_s4 + $0xac] sm:$0xf]  ;;  %s3420_s19 = smov 96  }
  0x19   : > { %v2694_v30 = vor.u32 %v3033_v28, %v2693_v27  ;;  %v2695_v31 = vld [vmem:[%s4459_s4 + $0xb4] sm:$0xf0]  ;;  %v2701_v32 = vld [vmem:[%s4459_s4 + $0xb0] sm:$0xf]  ;;  %v3034_v33 = vld [vmem:[%s4459_s4 + $0xb8] sm:$0xf0] }
  0x1a   : > { %s4475_s16 = smov (!%p509_p6, %s2601_s16), 3  ;;  %v2698_v34 = vor.u32 %v3032_v29, %v2695_v31  ;;  %v2702_v35 = vor.u32 %v3034_v33, %v2701_v32  ;;  %v2681_v36 = vld [vmem:[%s4459_s4 + $0x90] sm:$0xf]  ;;  %v3030_v37 = vld [vmem:[%s4459_s4 + $0x98] sm:$0xf0]  ;;  %s3421_s21 = smov 64  }
  0x1b   : > { %s3009_s7 = sshll.u32 %s4475_s16, 4  ;;  %800 = vmatpush.bf16.msra.mxu0 %v2694_v30  ;;  %v3029_v38 = vld [vmem:[%s4459_s4 + $0x94] sm:$0xf]  ;;  %v2682_v39 = vor.u32 %v3030_v37, %v2681_v36  ;;  %v2683_v40 = vld [vmem:[%s4459_s4 + $0x9c] sm:$0xf0]  ;;  %vm881_vm13 = vcmask 261120  }
  0x1c   : > { %s3545_s23 = scalar_lea.vmem %s4455_s0, %s3009_s7  ;;  %819 = vmatpush.bf16.msra.mxu1 %v2698_v34  ;;  %838 = vmatpush.bf16.msra.mxu2 %v2702_v35  ;;  %v2689_v41 = vld [vmem:[%s4459_s4 + $0x98] sm:$0xf]  ;;  %v3031_v42 = vld [vmem:[%s4459_s4 + $0xa0] sm:$0xf0]  ;;  %v2686_v43 = vor.u32 %v3029_v38, %v2683_v40  ;;  %v3026_v47 = vld [vmem:[%s4459_s4 + $0x7c] sm:$0xf]  ;;  %s520_s15 = scalar_lea.vmem %s4469_s14, %s3009_s7 }
  0x1d   : > { %v525_v0 = vld [vmem:[%s3545_s23 + $0x10] sm:$0xff]  ;;  %v523_v1 = vld [vmem:[%s3545_s23] sm:$0xff]  ;;  %v526_v2 = vld [vmem:[%s3545_s23 + $0x18] sm:$0xff]  ;;  %v2690_v44 = vor.u32 %v3031_v42, %v2689_v41  ;;  %s3422_s17 = smov 32   ;;  %vm928_vm14 = vcmask 130048   ;;  %vm1213_vm15 = vcmask 523520  }
  0x1e   : > { %533 = vadd.xlane.f32.xlu1 %v525_v0  ;;  %529 = vadd.xlane.f32.xlu0 %v523_v1  ;;  %v524_v3 = vld [vmem:[%s3545_s23 + $0x8] sm:$0xff]  ;;  %v3159_v5 = vpop.eup %3158  ;;  %v2669_v45 = vld [vmem:[%s4459_s4 + $0x78] sm:$0xf]  ;;  %v3027_v46 = vld [vmem:[%s4459_s4 + $0x80] sm:$0xf0] }
  0x1f   : > { %v538_v6 = vmul.f32 128.0, %v3159_v5  ;;  %vm542_vm0 = vweird.f32 %v3159_v5  ;;  %801 = vmatpush.bf16.msra.mxu0 %v2682_v39  ;;  %v2670_v48 = vor.u32 %v3027_v46, %v2669_v45  ;;  %v2671_v49 = vld [vmem:[%s4459_s4 + $0x84] sm:$0xf0]  ;;  %v2677_v50 = vld [vmem:[%s4459_s4 + $0x80] sm:$0xf] }
  0x20   : > { %820 = vmatpush.bf16.msra.mxu1 %v2686_v43  ;;  %839 = vmatpush.bf16.msra.mxu2 %v2690_v44  ;;  %v3028_v51 = vld [vmem:[%s4459_s4 + $0x88] sm:$0xf0]  ;;  %v2674_v52 = vor.u32 %v3026_v47, %v2671_v49  ;;  %v2657_v54 = vld [vmem:[%s4459_s4 + $0x60] sm:$0xf]  ;;  %v3023_v56 = vld [vmem:[%s4459_s4 + $0x64] sm:$0xf] }
  0x21   : > { %v539_v7 = vsub.f32 1.0, %v538_v6  ;;  %v2678_v53 = vor.u32 %v3028_v51, %v2677_v50  ;;  %v3024_v55 = vld [vmem:[%s4459_s4 + $0x68] sm:$0xf0]  ;;  %v2659_v58 = vld [vmem:[%s4459_s4 + $0x6c] sm:$0xf0] }
  0x22   : > { %v2658_v57 = vor.u32 %v3024_v55, %v2657_v54  ;;  %v2665_v59 = vld [vmem:[%s4459_s4 + $0x68] sm:$0xf]  ;;  %v3025_v60 = vld [vmem:[%s4459_s4 + $0x70] sm:$0xf0]  ;;  %v2662_v61 = vor.u32 %v3023_v56, %v2659_v58  ;;  %v2653_v4 = vld [vmem:[%s4459_s4 + $0x50] sm:$0xf] }
  0x23   : > { %v540_v8 = vmul.f32 %v3159_v5, %v539_v7  ;;  %802 = vmatpush.bf16.msra.mxu0 %v2670_v48  ;;  %v2666_v62 = vor.u32 %v3025_v60, %v2665_v59  ;;  %v2645_v63 = vld [vmem:[%s4459_s4 + $0x48] sm:$0xf]  ;;  %v2629_v27 = vld [vmem:[%s4459_s4 + $0x20] sm:$0xf]  ;;  %v3016_v28 = vld [vmem:[%s4459_s4 + $0x28] sm:$0xf0] }
  0x24   : > { %821 = vmatpush.bf16.msra.mxu1 %v2674_v52  ;;  %840 = vmatpush.bf16.msra.mxu2 %v2678_v53  ;;  %v2630_v31 = vor.u32 %v3016_v28, %v2629_v27  ;;  %v2609_v32 = vld [vmem:[%s4459_s4] sm:$0xf]  ;;  %v3012_v33 = vld [vmem:[%s4459_s4 + $0x8] sm:$0xf0]  ;;  %v3011_v34 = vld [vmem:[%s4459_s4 + $0x4] sm:$0xf] }
  0x25   : > { %v541_v9 = vadd.f32 %v3159_v5, %v540_v8  ;;  %v2633_v8 = vld [vmem:[%s4459_s4 + $0x30] sm:$0xf]  ;;  %v2610_v37 = vor.u32 %v3012_v33, %v2609_v32  ;;  %v2617_v39 = vld [vmem:[%s4459_s4 + $0x8] sm:$0xf]  ;;  %v3013_v40 = vld [vmem:[%s4459_s4 + $0x10] sm:$0xf0] }
  0x26   : > { %535 = vadd.xlane.f32.xlu1 %v526_v2  ;;  %531 = vadd.xlane.f32.xlu0 %v524_v3  ;;  %v2611_v38 = vld [vmem:[%s4459_s4 + $0xc] sm:$0xf0]  ;;  %v2618_v42 = vor.u32 %v3013_v40, %v2617_v39 }
  0x27   : > { %v3551_v10 = vsel %vm542_vm0, %v3159_v5, %v541_v9  ;;  %803 = vmatpush.bf16.msra.mxu0 %v2658_v57  ;;  %v3022_v5 = vld [vmem:[%s4459_s4 + $0x58] sm:$0xf0]  ;;  %v2614_v41 = vor.u32 %v3011_v34, %v2611_v38  ;;  %vm1394_vm0 = vcmask 785920  }
  0x28   : > { %822 = vmatpush.bf16.msra.mxu1 %v2662_v61  ;;  %841 = vmatpush.bf16.msra.mxu2 %v2666_v62  ;;  %v2654_v7 = vor.u32 %v3022_v5, %v2653_v4  ;;  %v3018_v9 = vld [vmem:[%s4459_s4 + $0x38] sm:$0xf0] }
  0x2c   : > { %842 = vmatpush.bf16.msra.mxu2 %v2654_v7 }
  0x91   : > { %v534_v11 = vpop.xlane.xlu1 %533  ;;  %v530_v12 = vpop.xlane.xlu0 %529 }
  0x92   : > { %v546_v13 = vmul.f32 %v3551_v10, %v534_v11  ;;  %v544_v14 = vmul.f32 %v3551_v10, %v530_v12  ;;  %v3017_v11 = vld [vmem:[%s4459_s4 + $0x34] sm:$0xf]  ;;  %v2634_v12 = vor.u32 %v3018_v9, %v2633_v8  ;;  %v3152_v8 = vld [vmem:[%s4457_s2] ss:$0 sm:$0xff] }
  0x94   : > { %v3555_v15 = vsub.f32 %v525_v0, %v546_v13  ;;  %v3557_v16 = vsub.f32 %v523_v1, %v544_v14  ;;  %v3021_v0 = vld [vmem:[%s4459_s4 + $0x50] sm:$0xf0]  ;;  %v3020_v1 = vld [vmem:[%s4459_s4 + $0x4c] sm:$0xf]  ;;  %v2635_v13 = vld [vmem:[%s4459_s4 + $0x3c] sm:$0xf0] }
  0x95   : > { %v2641_v14 = vld [vmem:[%s4459_s4 + $0x38] sm:$0xf] }
  0x96   : > { %v554_v17 = vmul.f32 %v3555_v15, %v3555_v15  ;;  %v552_v18 = vmul.f32 %v3557_v16, %v3557_v16 }
  0x98   : > { %560 = vadd.xlane.f32.xlu0 %v554_v17  ;;  %556 = vadd.xlane.f32.xlu2 %v552_v18  ;;  %v3019_v17 = vld [vmem:[%s4459_s4 + $0x40] sm:$0xf0]  ;;  %v2638_v18 = vor.u32 %v3017_v11, %v2635_v13 }
  0x99   : > { %v536_v19 = vpop.xlane.xlu1 %535  ;;  %v532_v20 = vpop.xlane.xlu0 %531 }
  0x9a   : > { %v547_v21 = vmul.f32 %v3551_v10, %v536_v19  ;;  %v545_v22 = vmul.f32 %v3551_v10, %v532_v20  ;;  %v2642_v19 = vor.u32 %v3019_v17, %v2641_v14  ;;  %v2621_v20 = vld [vmem:[%s4459_s4 + $0x18] sm:$0xf] }
  0x9c   : > { %v3565_v23 = vsub.f32 %v526_v2, %v547_v21  ;;  %v3567_v24 = vsub.f32 %v524_v3, %v545_v22  ;;  %v2646_v2 = vor.u32 %v3021_v0, %v2645_v63  ;;  %v2647_v3 = vld [vmem:[%s4459_s4 + $0x54] sm:$0xf0]  ;;  %843 = vmatpush.bf16.msra.mxu2 %v2642_v19  ;;  %v3015_v21 = vld [vmem:[%s4459_s4 + $0x20] sm:$0xf0]  ;;  %v3014_v22 = vld [vmem:[%s4459_s4 + $0x1c] sm:$0xf] }
  0x9d   : > { %v2650_v6 = vor.u32 %v3020_v1, %v2647_v3 }
  0x9e   : > { %v555_v25 = vmul.f32 %v3565_v23, %v3565_v23  ;;  %v553_v26 = vmul.f32 %v3567_v24, %v3567_v24  ;;  %804 = vmatpush.bf16.msra.mxu0 %v2646_v2 }
  0x9f   : > { %823 = vmatpush.bf16.msra.mxu1 %v2650_v6 }
  0xa0   : > { %562 = vadd.xlane.f32.xlu1 %v555_v25  ;;  %558 = vadd.xlane.f32.xlu2 %v553_v26  ;;  %v2622_v25 = vor.u32 %v3015_v21, %v2621_v20  ;;  %v2623_v26 = vld [vmem:[%s4459_s4 + $0x24] sm:$0xf0] }
  0xa1   : > { %v2626_v30 = vor.u32 %v3014_v22, %v2623_v26  ;;  %844 = vmatpush.bf16.msra.mxu2 %v2630_v31 }
  0xa2   : > { %805 = vmatpush.bf16.msra.mxu0 %v2634_v12 }
  0xa3   : > { %824 = vmatpush.bf16.msra.mxu1 %v2638_v18  ;;  %v3153_v18 = vld [vmem:[%s4458_s3] ss:$0 sm:$0xff] }
  0xa5   : > { %845 = vmatpush.bf16.msra.mxu2 %v2618_v42 }
  0xa6   : > { %806 = vmatpush.bf16.msra.mxu0 %v2622_v25 }
  0xa7   : > { %825 = vmatpush.bf16.msra.mxu1 %v2626_v30 }
  0xaa   : > { %807 = vmatpush.bf16.msra.mxu0 %v2610_v37 }
  0xab   : > { %826 = vmatpush.bf16.msra.mxu1 %v2614_v41 }
 0x10b   : > { %v557_v29 = vpop.xlane.xlu2 %556  ;;  %v561_v36 = vpop.xlane.xlu0 %560 }
 0x10c   : > { %v564_v35 = vmul.f32 %v557_v29, %v3551_v10  ;;  %v566_v44 = vmul.f32 %v561_v36, %v3551_v10 }
 0x10e   : > { %v568_v43 = vadd.f32 1e-05, %v564_v35  ;;  %v570_v45 = vadd.f32 1e-05, %v566_v44  ;;  %v664_v35 = vld [vmem:[%s4460_s5] sm:$0x7] }
 0x10f   : > { %v666_v36 = vperm.slane %v664_v35, 0  ;;  %v667_v37 = vperm.slane %v664_v35, 1 }
 0x110   : > { %3160 = vrsqrt.f32 %v568_v43  ;;  %vm578_vm2 = vweird.f32 %v568_v43  ;;  %vm598_vm9 = vweird.f32 %v570_v45 }
 0x111   : > { %3162 = vrsqrt.f32 %v570_v45 }
 0x113   : > { %v563_v46 = vpop.xlane.xlu1 %562  ;;  %v559_v47 = vpop.xlane.xlu2 %558 }
 0x114   : > { %v567_v48 = vmul.f32 %v563_v46, %v3551_v10  ;;  %v565_v49 = vmul.f32 %v559_v47, %v3551_v10 }
 0x116   : > { %v3161_v50 = vpop.eup %3160  ;;  %v571_v51 = vadd.f32 1e-05, %v567_v48  ;;  %v569_v52 = vadd.f32 1e-05, %v565_v49 }
 0x117   : > { %v573_v53 = vmul.f32 %v3161_v50, %v568_v43  ;;  %v3163_v56 = vpop.eup %3162  ;;  %vm579_vm1 = vweird.f32 %v3161_v50 }
 0x118   : > { %3164 = vrsqrt.f32 %v571_v51  ;;  %v593_v62 = vmul.f32 %v3163_v56, %v570_v45  ;;  %vm580_vm3 = vmor %vm578_vm2, %vm579_vm1  ;;  %vm588_vm5 = vweird.f32 %v569_v52  ;;  %vm608_vm7 = vweird.f32 %v571_v51 }
 0x119   : > { %v574_v54 = vmul.f32 %v3161_v50, %v573_v53  ;;  %3166 = vrsqrt.f32 %v569_v52  ;;  %vm599_vm10 = vweird.f32 %v3163_v56  ;;  %vm1575_vm1 = vcmask 1048320  }
 0x11a   : > { %v594_v3 = vmul.f32 %v3163_v56, %v593_v62  ;;  %vm600_vm12 = vmor %vm598_vm9, %vm599_vm10  ;;  %v668_v62 = vperm.slane %v664_v35, 2 }
 0x11b   : > { %v575_v55 = vmul.f32 0.5, %v574_v54 }
 0x11c   : > { %v595_v9 = vmul.f32 0.5, %v594_v3 }
 0x11d   : > { %v576_v57 = vsub.f32 1.5, %v575_v55 }
 0x11e   : > { %v3165_v58 = vpop.eup %3164  ;;  %v596_v19 = vsub.f32 1.5, %v595_v9 }
 0x11f   : > { %v3167_v59 = vpop.eup %3166  ;;  %v603_v60 = vmul.f32 %v3165_v58, %v571_v51  ;;  %v577_v61 = vmul.f32 %v3161_v50, %v576_v57  ;;  %vm609_vm8 = vweird.f32 %v3165_v58 }
 0x120   : > { %v583_v63 = vmul.f32 %v3167_v59, %v569_v52  ;;  %vm589_vm4 = vweird.f32 %v3167_v59  ;;  %vm610_vm11 = vmor %vm608_vm7, %vm609_vm8  ;;  %v597_v25 = vmul.f32 %v3163_v56, %v596_v19 }
 0x121   : > { %v604_v0 = vmul.f32 %v3165_v58, %v603_v60  ;;  %v581_v2 = vsel %vm580_vm3, %v3161_v50, %v577_v61  ;;  %vm590_vm6 = vmor %vm588_vm5, %vm589_vm4 }
 0x122   : > { %v584_v1 = vmul.f32 %v3167_v59, %v583_v63  ;;  %v612_v7 = vmul.f32 %v581_v2, %v3557_v16 }
 0x123   : > { %v605_v5 = vmul.f32 0.5, %v604_v0 }
 0x124   : > { %v585_v4 = vmul.f32 0.5, %v584_v1  ;;  %v619_v17 = vmul.f32 %v3152_v8, %v612_v7 }
 0x125   : > { %v606_v12 = vsub.f32 1.5, %v605_v5 }
 0x126   : > { %v586_v6 = vsub.f32 1.5, %v585_v4  ;;  %v626_v21 = vadd.f32 %v3153_v18, %v619_v17 }
 0x127   : > { %v607_v20 = vmul.f32 %v3165_v58, %v606_v12 }
 0x128   : > { %v587_v11 = vmul.f32 %v3167_v59, %v586_v6 }
 0x129   : > { %v611_v27 = vsel %vm610_vm11, %v3165_v58, %v607_v20 }
 0x12a   : > { %v591_v13 = vsel %vm590_vm6, %v3167_v59, %v587_v11  ;;  %v615_v28 = vmul.f32 %v611_v27, %v3565_v23 }
 0x12b   : > { %v613_v14 = vmul.f32 %v591_v13, %v3567_v24  ;;  %v601_v24 = vsel %vm600_vm12, %v3163_v56, %v597_v25 }
 0x12c   : > { %v614_v29 = vmul.f32 %v601_v24, %v3555_v15  ;;  %v622_v30 = vmul.f32 %v3152_v8, %v615_v28 }
 0x12d   : > { %v620_v16 = vmul.f32 %v3152_v8, %v613_v14 }
 0x12e   : > { %v621_v31 = vmul.f32 %v3152_v8, %v614_v29  ;;  %v629_v32 = vadd.f32 %v3153_v18, %v622_v30 }
 0x12f   : > { %v627_v22 = vadd.f32 %v3153_v18, %v620_v16 }
 0x130   : > { %v628_v33 = vadd.f32 %v3153_v18, %v621_v31 }
 0x131   : > { %v630_v26 = vpack.c.bf16 %v627_v22, %v626_v21 }
 0x132   : > { %v631_v34 = vpack.c.bf16 %v629_v32, %v628_v33 }
 0x133   : > { %808 = vmatmul.bf16.vlgmr.msra.gmra.mxu0 %v630_v26  ;;  %827 = vmatmul.bf16.vlgmr.msra.gmra.mxu1 %v630_v26 }
 0x134   : > { %846 = vmatmul.bf16.vlgmr.msra.gmra.mxu2 %v630_v26 }
 0x143   : > { %813 = vmatmul.bf16.gmra.mxu0 %v631_v34  ;;  %832 = vmatmul.bf16.gmra.mxu1 %v631_v34 }
 0x144   : > { %851 = vmatmul.bf16.gmra.mxu2 %v631_v34 }
 0x1b0   : > { %v809_v38 = vpop.f32.mrf.mxu0  ;;  %v828_v39 = vpop.f32.mrf.mxu1 }
 0x1b1   : > { %v810_v40 = vadd.f32 %v809_v38, %v666_v36  ;;  %v829_v23 = vadd.f32 %v828_v39, %v667_v37 }
 0x1b3   : > { %v3734_v41 = vpack.c.bf16 %v829_v23, %v810_v40 }
 0x1b5   : > { %1037 = vrot.lane.b32.xlu2 %v3734_v41, %s3420_s19  ;;  %v871_v47 = vrot.slane %v3734_v41, 4  ;;  %v875_v48 = vunpack.c.l.b16 %v3734_v41 }
 0x1b7   : > { %v847_v15 = vpop.f32.mrf.mxu2  ;;  %v878_v53 = vunpack.c.l.b16 %v871_v47 }
 0x1b8   : > { %v811_v42 = vpop.f32.mrf.mxu0  ;;  %v830_v43 = vpop.f32.mrf.mxu1  ;;  %v848_v5 = vadd.f32 %v847_v15, %v668_v62 }
 0x1b9   : > { %v812_v44 = vadd.f32 %v811_v42, %v666_v36  ;;  %v831_v45 = vadd.f32 %v830_v43, %v667_v37 }
 0x1ba   : > { %v858_v11 = vpack.c.bf16 %v848_v5, %v848_v5 }
 0x1bb   : > { %v859_v46 = vpack.c.bf16 %v831_v45, %v812_v44 }
 0x1bc   : > { %v984_v22 = vunpack.c.l.b16 %v858_v11 }
 0x1bd   : > { %1039 = vrot.lane.b32.xlu0 %v859_v46, %s3420_s19  ;;  %1218 = vrot.lane.b32.xlu2 %v3734_v41, %s3421_s21  ;;  %v876_v49 = vunpack.c.l.b16 %v859_v46  ;;  %v872_v50 = vrot.slane %v859_v46, 4 }
 0x1bf   : > { %v849_v51 = vpop.f32.mrf.mxu2  ;;  %v877_v52 = vpack.c.b16 %v876_v49, %v875_v48  ;;  %v879_v54 = vunpack.c.l.b16 %v872_v50 }
 0x1c0   : > { %v814_v55 = vpop.f32.mrf.mxu0  ;;  %v833_v56 = vpop.f32.mrf.mxu1  ;;  %v850_v0 = vadd.f32 %v849_v51, %v668_v62 }
 0x1c1   : > { %v815_v57 = vadd.f32 %v814_v55, %v666_v36  ;;  %v834_v58 = vadd.f32 %v833_v56, %v667_v37  ;;  %1049 = vrot.lane.b32.xlu1 %v877_v52, %s3420_s19  ;;  %v880_v59 = vpack.c.b16 %v879_v54, %v878_v53 }
 0x1c2   : > { %v860_v8 = vpack.c.bf16 %v850_v0, %v850_v0 }
 0x1c3   : > { %v861_v60 = vpack.c.bf16 %v834_v58, %v815_v57  ;;  %v886_v61 = vsel %vm881_vm13, %v880_v59, 0 }
 0x1c4   : > { %895 = vmatpush.bf16.xpose.msra.mxu3 %v886_v61  ;;  %v985_v18 = vunpack.c.l.b16 %v860_v8 }
 0x1c5   : > { %1041 = vrot.lane.b32.xlu2 %v861_v60, %s3420_s19  ;;  %v873_v7 = vrot.slane %v861_v60, 4  ;;  %v902_v21 = vunpack.c.l.b16 %v861_v60 }
 0x1c6   : > { %v3752_v24 = vpack.c.b16 %v985_v18, %v984_v22 }
 0x1c7   : > { %v852_v63 = vpop.f32.mrf.mxu2  ;;  %v905_v13 = vunpack.c.l.b16 %v873_v7 }
 0x1c8   : > { %v816_v1 = vpop.f32.mrf.mxu0  ;;  %v835_v2 = vpop.f32.mrf.mxu1  ;;  %v853_v19 = vadd.f32 %v852_v63, %v668_v62 }
 0x1c9   : > { %v817_v3 = vadd.f32 %v816_v1, %v666_v36  ;;  %v836_v4 = vadd.f32 %v835_v2, %v667_v37  ;;  %1220 = vrot.lane.b32.xlu1 %v859_v46, %s3421_s21 }
 0x1ca   : > { %v862_v28 = vpack.c.bf16 %v853_v19, %v853_v19 }
 0x1cb   : > { %v863_v6 = vpack.c.bf16 %v836_v4, %v817_v3  ;;  %2703 = vmatmul.msk.bf16.vlgmr.msra.gmra.mxu3 %vm881_vm13, %v877_v52 }
 0x1cc   : > { %v1012_v30 = vunpack.c.l.b16 %v862_v28 }
 0x1cd   : > { %1043 = vrot.lane.b32.xlu0 %v863_v6, %s3420_s19  ;;  %1230 = vrot.lane.b32.xlu2 %v877_v52, %s3421_s21  ;;  %v874_v9 = vrot.slane %v863_v6, 4  ;;  %v903_v17 = vunpack.c.l.b16 %v863_v6 }
 0x1cf   : > { %v854_v12 = vpop.f32.mrf.mxu2  ;;  %v906_v14 = vunpack.c.l.b16 %v874_v9  ;;  %v904_v27 = vpack.c.b16 %v903_v17, %v902_v21 }
 0x1d0   : > { %v855_v16 = vadd.f32 %v854_v12, %v668_v62  ;;  %v3781_v62 = vld [vmem:[%s4456_s1] sm:$0xff] }
 0x1d1   : > { %1222 = vrot.lane.b32.xlu1 %v861_v60, %s3421_s21  ;;  %v907_v20 = vpack.c.b16 %v906_v14, %v905_v13  ;;  %v3790_v13 = vld [vmem:[%s4456_s1 + $0x8] sm:$0xff] }
 0x1d2   : > { %v864_v25 = vpack.c.bf16 %v855_v16, %v855_v16 }
 0x1d3   : > { %v912_v26 = vsel %vm881_vm13, %v907_v20, 0 }
 0x1d4   : > { %921 = vmatpush.bf16.xpose.msrb.mxu3 %v912_v26  ;;  %v1013_v29 = vunpack.c.l.b16 %v864_v25 }
 0x1d5   : > { %1399 = vrot.lane.b32.xlu2 %v3734_v41, %s3422_s17  ;;  %1074 = vrot.lane.b32.xlu0 %v904_v27, %s3420_s19 }
 0x1d6   : > { %v3759_v31 = vpack.c.b16 %v1013_v29, %v1012_v30 }
 0x1d9   : > { %1401 = vrot.lane.b32.xlu1 %v859_v46, %s3422_s17 }
 0x1db   : > { %2704 = vmatmul.msk.bf16.vlgmr.msrb.gmra.mxu3 %vm881_vm13, %v904_v27 }
 0x1dc   : > { %998 = vmatpush.bf16.msra.mxu3 %v3752_v24 }
 0x1dd   : > { %1411 = vrot.lane.b32.xlu2 %v877_v52, %s3422_s17  ;;  %1224 = vrot.lane.b32.xlu0 %v863_v6, %s3421_s21 }
 0x1e0   : > { %1026 = vmatpush.bf16.msrb.mxu3 %v3759_v31 }
 0x1e1   : > { %1403 = vrot.lane.b32.xlu1 %v861_v60, %s3422_s17 }
 0x1e5   : > { %1436 = vrot.lane.b32.xlu2 %v904_v27, %s3422_s17  ;;  %1255 = vrot.lane.b32.xlu0 %v904_v27, %s3421_s21 }
 0x1ed   : > { %1177 = vrot.lane.b32.xlu2 %v3759_v31, %s3420_s19  ;;  %1405 = vrot.lane.b32.xlu0 %v863_v6, %s3422_s17 }
 0x1f5   : > { %1152 = vrot.lane.b32.xlu0 %v3752_v24, %s3420_s19 }
 0x20f   : > { %v1038_v32 = vpop.permute.xlu2 %1037 }
 0x210   : > { %v1045_v34 = vrot.slane %v1038_v32, 4 }
 0x212   : > { %v1051_v37 = vunpack.c.l.b16 %v1045_v34 }
 0x217   : > { %v1219_v33 = vpop.permute.xlu2 %1218 }
 0x218   : > { %v1226_v15 = vrot.slane %v1219_v33, 4 }
 0x21a   : > { %v1232_v45 = vunpack.c.l.b16 %v1226_v15 }
 0x21f   : > { %v1042_v39 = vpop.permute.xlu2 %1041 }
 0x220   : > { %v1047_v46 = vrot.slane %v1042_v39, 4 }
 0x222   : > { %v1076_v51 = vunpack.c.l.b16 %v1047_v46 }
 0x227   : > { %v1231_v44 = vpop.permute.xlu2 %1230 }
 0x22f   : > { %v1040_v35 = vpop.permute.xlu0 %1039  ;;  %v1400_v57 = vpop.permute.xlu2 %1399 }
 0x230   : > { %v1046_v36 = vrot.slane %v1040_v35, 4  ;;  %v1407_v59 = vrot.slane %v1400_v57, 4 }
 0x232   : > { %v1052_v38 = vunpack.c.l.b16 %v1046_v36  ;;  %v1413_v63 = vunpack.c.l.b16 %v1407_v59 }
 0x233   : > { %v1050_v40 = vpop.permute.xlu1 %1049 }
 0x234   : > { %v1053_v23 = vpack.c.b16 %v1052_v38, %v1051_v37 }
 0x236   : > { %v1058_v41 = vsel %vm881_vm13, %v1053_v23, 0 }
 0x237   : > { %1067 = vmatpush.bf16.xpose.msrb.mxu1 %v1058_v41  ;;  %v1412_v16 = vpop.permute.xlu2 %1411 }
 0x23b   : > { %v1221_v42 = vpop.permute.xlu1 %1220 }
 0x23c   : > { %v1227_v43 = vrot.slane %v1221_v42, 4 }
 0x23e   : > { %v1233_v47 = vunpack.c.l.b16 %v1227_v43  ;;  %2707 = vmatmul.msk.bf16.vlgmr.msrb.gmra.mxu1 %vm881_vm13, %v1050_v40 }
 0x23f   : > { %v1044_v48 = vpop.permute.xlu0 %1043  ;;  %v1437_v39 = vpop.permute.xlu2 %1436 }
 0x240   : > { %v1048_v49 = vrot.slane %v1044_v48, 4  ;;  %v1234_v50 = vpack.c.b16 %v1233_v47, %v1232_v45 }
 0x242   : > { %v1077_v52 = vunpack.c.l.b16 %v1048_v49  ;;  %v1239_v53 = vsel %vm881_vm13, %v1234_v50, 0 }
 0x243   : > { %1248 = vmatpush.bf16.xpose.msrb.mxu0 %v1239_v53  ;;  %v1223_v54 = vpop.permute.xlu1 %1222 }
 0x244   : > { %v1078_v55 = vpack.c.b16 %v1077_v52, %v1076_v51  ;;  %v1228_v0 = vrot.slane %v1223_v54, 4 }
 0x246   : > { %v1083_v56 = vsel %vm881_vm13, %v1078_v55, 0  ;;  %v1257_v8 = vunpack.c.l.b16 %v1228_v0 }
 0x247   : > { %1092 = vmatpush.bf16.xpose.msra.mxu1 %v1083_v56  ;;  %v1075_v58 = vpop.permute.xlu0 %1074  ;;  %v3832_v56 = vpop.permute.xlu2 %1177 }
 0x24a   : > { %2711 = vmatmul.msk.bf16.vlgmr.msrb.gmra.mxu0 %vm881_vm13, %v1231_v44 }
 0x24b   : > { %v1402_v60 = vpop.permute.xlu1 %1401 }
 0x24c   : > { %v1408_v61 = vrot.slane %v1402_v60, 4 }
 0x24e   : > { %v1414_v1 = vunpack.c.l.b16 %v1408_v61  ;;  %v897_v2 = vpop.f32.mrf.mxu3  ;;  %2708 = vmatmul.msk.bf16.vlgmr.msra.gmra.mxu1 %vm881_vm13, %v1075_v58 }
 0x24f   : > { %v898_v3 = vadd.f32 %v897_v2, %v3781_v62  ;;  %v1225_v4 = vpop.permute.xlu0 %1224 }
 0x250   : > { %v1415_v5 = vpack.c.b16 %v1414_v1, %v1413_v63  ;;  %v1229_v6 = vrot.slane %v1225_v4, 4 }
 0x251   : > { %v929_v7 = vsel %vm928_vm14, %v898_v3, -inf }
 0x252   : > { %v1258_v9 = vunpack.c.l.b16 %v1229_v6  ;;  %930 = vmax.xlane.f32.xlu1 %v929_v7  ;;  %v1420_v11 = vsel %vm881_vm13, %v1415_v5, 0 }
 0x253   : > { %1429 = vmatpush.bf16.xpose.msra.mxu0 %v1420_v11  ;;  %v1404_v21 = vpop.permute.xlu1 %1403 }
 0x254   : > { %v1259_v12 = vpack.c.b16 %v1258_v9, %v1257_v8  ;;  %v1409_v22 = vrot.slane %v1404_v21, 4 }
 0x256   : > { %v899_v14 = vpop.f32.mrf.mxu3  ;;  %v1264_v17 = vsel %vm881_vm13, %v1259_v12, 0  ;;  %v1438_v30 = vunpack.c.l.b16 %v1409_v22 }
 0x257   : > { %v3794_v18 = vadd.f32 %v899_v14, %v3790_v13  ;;  %1273 = vmatpush.bf16.xpose.msrb.mxu1 %v1264_v17  ;;  %v1256_v19 = vpop.permute.xlu0 %1255 }
 0x259   : > { %v932_v20 = vsel %vm928_vm14, %v3794_v18, -inf }
 0x25a   : > { %2715 = vmatmul.msk.bf16.vlgmr.msra.gmra.mxu0 %vm881_vm13, %v1412_v16  ;;  %933 = vmax.xlane.f32.xlu0 %v932_v20 }
 0x25e   : > { %v923_v25 = vpop.f32.mrf.mxu3  ;;  %2712 = vmatmul.msk.bf16.vlgmr.msrb.gmra.mxu1 %vm881_vm13, %v1256_v19 }
 0x25f   : > { %v3801_v26 = vadd.f32 %v923_v25, %v3781_v62  ;;  %v1406_v27 = vpop.permute.xlu0 %1405 }
 0x260   : > { %v1410_v28 = vrot.slane %v1406_v27, 4 }
 0x261   : > { %v935_v29 = vsel %vm928_vm14, %v3801_v26, -inf }
 0x262   : > { %v1439_v32 = vunpack.c.l.b16 %v1410_v28  ;;  %936 = vmax.xlane.f32.xlu2 %v935_v29 }
 0x264   : > { %v1440_v33 = vpack.c.b16 %v1439_v32, %v1438_v30 }
 0x266   : > { %v925_v34 = vpop.f32.mrf.mxu3  ;;  %v1445_v35 = vsel %vm881_vm13, %v1440_v33, 0 }
 0x267   : > { %v926_v36 = vadd.f32 %v925_v34, %v3790_v13  ;;  %1454 = vmatpush.bf16.xpose.msra.mxu1 %v1445_v35  ;;  %v1153_v37 = vpop.permute.xlu0 %1152 }
 0x268   : > { %1165 = vmatpush.bf16.msrb.mxu2 %v1153_v37 }
 0x269   : > { %v938_v38 = vsel %vm928_vm14, %v926_v36, -inf }
 0x26a   : > { %939 = vmax.xlane.f32.xlu1 %v938_v38 }
 0x26e   : > { %2716 = vmatmul.msk.bf16.vlgmr.msra.gmra.mxu1 %vm881_vm13, %v1437_v39 }
 0x2bb   : > { %v1069_v40 = vpop.f32.mrf.mxu1 }
 0x2bc   : > { %v3810_v23 = vadd.f32 %v1069_v40, %v3781_v62 }
 0x2be   : > { %v1099_v41 = vsel %vm928_vm14, %v3810_v23, -inf }
 0x2bf   : > { %1100 = vmax.xlane.f32.xlu0 %v1099_v41 }
 0x2c3   : > { %v1071_v15 = vpop.f32.mrf.mxu1 }
 0x2c4   : > { %v3820_v49 = vadd.f32 %v1071_v15, %v3790_v13 }
 0x2c5   : > { %v931_v42 = vpop.xlane.xlu1 %930 }
 0x2c6   : > { %v941_v45 = vsub.f32 %v898_v3, %v931_v42  ;;  %v1102_v53 = vsel %vm928_vm14, %v3820_v49, -inf }
 0x2c7   : > { %v1250_v43 = vpop.f32.mrf.mxu0 }
 0x2c8   : > { %v3815_v44 = vadd.f32 %v1250_v43, %v3781_v62  ;;  %v945_v48 = vmul.f32 1.442695, %v941_v45 }
 0x2ca   : > { %v1280_v46 = vsel %vm928_vm14, %v3815_v44, -inf  ;;  %3168 = vpow2.f32 %v945_v48 }
 0x2cb   : > { %1281 = vmax.xlane.f32.xlu2 %v1280_v46  ;;  %v1094_v47 = vpop.f32.mrf.mxu1 }
 0x2cc   : > { %v3835_v57 = vadd.f32 %v1094_v47, %v3781_v62 }
 0x2cd   : > { %v934_v58 = vpop.xlane.xlu0 %933 }
 0x2ce   : > { %v942_v63 = vsub.f32 %v3794_v18, %v934_v58  ;;  %v1105_v1 = vsel %vm928_vm14, %v3835_v57, -inf }
 0x2cf   : > { %v1252_v50 = vpop.f32.mrf.mxu0 }
 0x2d0   : > { %v3823_v51 = vadd.f32 %v1252_v50, %v3790_v13  ;;  %v3839_v60 = vpop.eup %3168  ;;  %v947_v3 = vmul.f32 1.442695, %v942_v63 }
 0x2d1   : > { %v953_v0 = vsel %vm928_vm14, %v3839_v60, 0.0 }
 0x2d2   : > { %v1283_v52 = vsel %vm928_vm14, %v3823_v51, -inf  ;;  %3170 = vpow2.f32 %v947_v3 }
 0x2d3   : > { %1284 = vmax.xlane.f32.xlu1 %v1283_v52  ;;  %1103 = vmax.xlane.f32.xlu2 %v1102_v53  ;;  %v1096_v54 = vpop.f32.mrf.mxu1 }
 0x2d4   : > { %v3830_v55 = vadd.f32 %v1096_v54, %v3790_v13 }
 0x2d5   : > { %v937_v4 = vpop.xlane.xlu2 %936 }
 0x2d6   : > { %v1108_v59 = vsel %vm928_vm14, %v3830_v55, -inf  ;;  %v943_v8 = vsub.f32 %v3801_v26, %v937_v4 }
 0x2d7   : > { %v1431_v61 = vpop.f32.mrf.mxu0  ;;  %1109 = vmax.xlane.f32.xlu0 %v1108_v59 }
 0x2d8   : > { %v3847_v5 = vadd.f32 %v1431_v61, %v3781_v62  ;;  %v949_v18 = vmul.f32 1.442695, %v943_v8  ;;  %v3865_v22 = vpop.eup %3170 }
 0x2d9   : > { %v956_v26 = vsel %vm928_vm14, %v3865_v22, 0.0 }
 0x2da   : > { %v1461_v14 = vsel %vm928_vm14, %v3847_v5, -inf  ;;  %3172 = vpow2.f32 %v949_v18 }
 0x2db   : > { %954 = vadd.xlane.f32.xlu2 %v953_v0  ;;  %1106 = vmax.xlane.f32.xlu1 %v1105_v1  ;;  %v1275_v2 = vpop.f32.mrf.mxu1 }
 0x2dc   : > { %v3861_v20 = vadd.f32 %v1275_v2, %v3781_v62 }
 0x2dd   : > { %v940_v6 = vpop.xlane.xlu1 %939 }
 0x2de   : > { %v944_v11 = vsub.f32 %v926_v36, %v940_v6  ;;  %v1286_v25 = vsel %vm928_vm14, %v3861_v20, -inf }
 0x2df   : > { %v1433_v7 = vpop.f32.mrf.mxu0 }
 0x2e0   : > { %v3851_v9 = vadd.f32 %v1433_v7, %v3790_v13  ;;  %v951_v16 = vmul.f32 1.442695, %v944_v11  ;;  %v3871_v28 = vpop.eup %3172 }
 0x2e1   : > { %v959_v32 = vsel %vm928_vm14, %v3871_v28, 0.0 }
 0x2e2   : > { %v1464_v12 = vsel %vm928_vm14, %v3851_v9, -inf  ;;  %3174 = vpow2.f32 %v951_v16 }
 0x2e3   : > { %1465 = vmax.xlane.f32.xlu0 %v1464_v12  ;;  %1462 = vmax.xlane.f32.xlu1 %v1461_v14  ;;  %v1277_v17 = vpop.f32.mrf.mxu1 }
 0x2e4   : > { %v3858_v19 = vadd.f32 %v1277_v17, %v3790_v13 }
 0x2e6   : > { %v1289_v21 = vsel %vm928_vm14, %v3858_v19, -inf }
 0x2e7   : > { %1290 = vmax.xlane.f32.xlu2 %v1289_v21 }
 0x2e8   : > { %v3873_v29 = vpop.eup %3174 }
 0x2e9   : > { %v962_v30 = vsel %vm928_vm14, %v3873_v29, 0.0 }
 0x2eb   : > { %1287 = vmax.xlane.f32.xlu0 %v1286_v25  ;;  %v1456_v27 = vpop.f32.mrf.mxu1  ;;  %957 = vadd.xlane.f32.xlu1 %v956_v26 }
 0x2ec   : > { %v3883_v35 = vadd.f32 %v1456_v27, %v3781_v62 }
 0x2ee   : > { %v1467_v37 = vsel %vm928_vm14, %v3883_v35, -inf }
 0x2f3   : > { %963 = vadd.xlane.f32.xlu0 %v962_v30  ;;  %v1458_v33 = vpop.f32.mrf.mxu1  ;;  %960 = vadd.xlane.f32.xlu1 %v959_v32 }
 0x2f4   : > { %v3880_v34 = vadd.f32 %v1458_v33, %v3790_v13 }
 0x2f6   : > { %v1470_v36 = vsel %vm928_vm14, %v3880_v34, -inf }
 0x2f7   : > { %1471 = vmax.xlane.f32.xlu2 %v1470_v36 }
 0x2fb   : > { %1468 = vmax.xlane.f32.xlu0 %v1467_v37 }
 0x30f   : > { %1333 = vrot.lane.b32.xlu0 %v3752_v24, %s3421_s21 }
 0x332   : > { %v1101_v38 = vpop.xlane.xlu0 %1100 }
 0x333   : > { %v1111_v39 = vsub.f32 %v3810_v23, %v1101_v38 }
 0x335   : > { %v1115_v40 = vmul.f32 1.442695, %v1111_v39 }
 0x337   : > { %3176 = vpow2.f32 %v1115_v40 }
 0x33d   : > { %v3892_v13 = vpop.eup %3176 }
 0x33e   : > { %v1282_v62 = vpop.xlane.xlu2 %1281  ;;  %v1123_v41 = vsel %vm928_vm14, %v3892_v13, 0.0 }
 0x33f   : > { %v1292_v15 = vsub.f32 %v3815_v44, %v1282_v62  ;;  %1124 = vadd.xlane.f32.xlu2 %v1123_v41 }
 0x341   : > { %v1296_v42 = vmul.f32 1.442695, %v1292_v15 }
 0x343   : > { %3178 = vpow2.f32 %v1296_v42 }
 0x346   : > { %v1285_v43 = vpop.xlane.xlu1 %1284  ;;  %v1104_v45 = vpop.xlane.xlu2 %1103 }
 0x347   : > { %v1112_v46 = vsub.f32 %v3820_v49, %v1104_v45  ;;  %v1293_v48 = vsub.f32 %v3823_v51, %v1285_v43 }
 0x349   : > { %v3898_v47 = vpop.eup %3178  ;;  %v1117_v23 = vmul.f32 1.442695, %v1112_v46  ;;  %v1298_v52 = vmul.f32 1.442695, %v1293_v48 }
 0x34a   : > { %v1304_v50 = vsel %vm928_vm14, %v3898_v47, 0.0  ;;  %v1110_v53 = vpop.xlane.xlu0 %1109 }
 0x34b   : > { %1305 = vadd.xlane.f32.xlu2 %v1304_v50  ;;  %3180 = vpow2.f32 %v1117_v23  ;;  %v1114_v58 = vsub.f32 %v3830_v55, %v1110_v53 }
 0x34c   : > { %3182 = vpow2.f32 %v1298_v52 }
 0x34d   : > { %v1121_v63 = vmul.f32 1.442695, %v1114_v58 }
 0x34e   : > { %v1107_v44 = vpop.xlane.xlu1 %1106  ;;  %v955_v49 = vpop.xlane.xlu2 %954 }
 0x34f   : > { %v1113_v54 = vsub.f32 %v3835_v57, %v1107_v44 }
 0x351   : > { %v1119_v59 = vmul.f32 1.442695, %v1113_v54  ;;  %v3905_v61 = vpop.eup %3180 }
 0x352   : > { %v1126_v51 = vsel %vm928_vm14, %v3905_v61, 0.0  ;;  %v3909_v2 = vpop.eup %3182 }
 0x353   : > { %3184 = vpow2.f32 %v1119_v59  ;;  %1127 = vadd.xlane.f32.xlu1 %v1126_v51  ;;  %v1307_v6 = vsel %vm928_vm14, %v3909_v2, 0.0 }
 0x354   : > { %3186 = vpow2.f32 %v1121_v63 }
 0x355   : > { %3188 = vrcp.f32 %v955_v49 }
 0x356   : > { %v1463_v0 = vpop.xlane.xlu1 %1462  ;;  %v1466_v1 = vpop.xlane.xlu0 %1465 }
 0x357   : > { %v1473_v16 = vsub.f32 %v3847_v5, %v1463_v0  ;;  %v1474_v37 = vsub.f32 %v3851_v9, %v1466_v1 }
 0x359   : > { %v3911_v3 = vpop.eup %3184  ;;  %v1477_v27 = vmul.f32 1.442695, %v1473_v16  ;;  %v1479_v45 = vmul.f32 1.442695, %v1474_v37 }
 0x35a   : > { %v1291_v55 = vpop.xlane.xlu2 %1290  ;;  %v1129_v57 = vsel %vm928_vm14, %v3911_v3, 0.0  ;;  %v3918_v12 = vpop.eup %3186 }
 0x35b   : > { %v1295_v4 = vsub.f32 %v3858_v19, %v1291_v55  ;;  %1130 = vadd.xlane.f32.xlu2 %v1129_v57  ;;  %1308 = vadd.xlane.f32.xlu1 %v1307_v6  ;;  %v3189_v17 = vpop.eup %3188  ;;  %v1132_v21 = vsel %vm928_vm14, %v3918_v12, 0.0 }
 0x35c   : > { %v969_v19 = vmul.f32 %v3189_v17, %v3839_v60 }
 0x35d   : > { %v1302_v7 = vmul.f32 1.442695, %v1295_v4 }
 0x35e   : > { %v958_v8 = vpop.xlane.xlu1 %957  ;;  %v1288_v11 = vpop.xlane.xlu0 %1287  ;;  %v973_v33 = vpack.c.bf16 %v969_v19, %v969_v19 }
 0x35f   : > { %3190 = vpow2.f32 %v1302_v7  ;;  %v1294_v14 = vsub.f32 %v3861_v20, %v1288_v11 }
 0x360   : > { %3192 = vrcp.f32 %v958_v8  ;;  %v979_v40 = vunpack.c.l.b16 %v973_v33 }
 0x361   : > { %v1300_v18 = vmul.f32 1.442695, %v1294_v14 }
 0x363   : > { %3194 = vpow2.f32 %v1300_v18  ;;  %1133 = vadd.xlane.f32.xlu1 %v1132_v21 }
 0x365   : > { %v3925_v25 = vpop.eup %3190 }
 0x366   : > { %v3193_v26 = vpop.eup %3192  ;;  %v961_v30 = vpop.xlane.xlu1 %960  ;;  %v1313_v20 = vsel %vm928_vm14, %v3925_v25, 0.0 }
 0x367   : > { %v964_v32 = vpop.xlane.xlu0 %963  ;;  %v970_v36 = vmul.f32 %v3193_v26, %v3865_v22  ;;  %3196 = vrcp.f32 %v961_v30  ;;  %1314 = vadd.xlane.f32.xlu0 %v1313_v20 }
 0x368   : > { %3198 = vrcp.f32 %v964_v32 }
 0x369   : > { %v3930_v60 = vpop.eup %3194  ;;  %v974_v5 = vpack.c.bf16 %v970_v36, %v970_v36  ;;  %3200 = vpow2.f32 %v1477_v27 }
 0x36a   : > { %v1472_v38 = vpop.xlane.xlu2 %1471  ;;  %v1310_v39 = vsel %vm928_vm14, %v3930_v60, 0.0 }
 0x36b   : > { %v980_v62 = vunpack.c.l.b16 %v974_v5  ;;  %v1476_v41 = vsub.f32 %v3880_v34, %v1472_v38  ;;  %1311 = vadd.xlane.f32.xlu1 %v1310_v39 }
 0x36d   : > { %v3197_v15 = vpop.eup %3196  ;;  %v981_v22 = vpack.c.b16 %v980_v62, %v979_v40  ;;  %v1483_v42 = vmul.f32 1.442695, %v1476_v41 }
 0x36e   : > { %v3199_v43 = vpop.eup %3198  ;;  %v971_v9 = vmul.f32 %v3197_v15, %v3871_v28 }
 0x36f   : > { %3202 = vpow2.f32 %v1483_v42  ;;  %2705 = vmatmul.msk.bf16.vlgmr.msra.gmra.mxu3 %vm928_vm14, %v981_v22  ;;  %v3937_v46 = vpop.eup %3200  ;;  %v972_v23 = vmul.f32 %v3199_v43, %v3873_v29  ;;  %v1469_v44 = vpop.xlane.xlu0 %1468 }
 0x370   : > { %1190 = vmatpush.bf16.msra.mxu3 %v3832_v56  ;;  %3204 = vpow2.f32 %v1479_v45  ;;  %v1485_v34 = vsel %vm928_vm14, %v3937_v46, 0.0  ;;  %v975_v50 = vpack.c.bf16 %v971_v9, %v971_v9  ;;  %v1475_v49 = vsub.f32 %v3883_v35, %v1469_v44 }
 0x371   : > { %v976_v52 = vpack.c.bf16 %v972_v23, %v972_v23 }
 0x372   : > { %v1007_v28 = vunpack.c.l.b16 %v975_v50  ;;  %v1481_v51 = vmul.f32 1.442695, %v1475_v49 }
 0x373   : > { %1358 = vrot.lane.b32.xlu2 %v3759_v31, %s3421_s21  ;;  %1486 = vadd.xlane.f32.xlu1 %v1485_v34  ;;  %v1008_v29 = vunpack.c.l.b16 %v976_v52 }
 0x374   : > { %3206 = vpow2.f32 %v1481_v51 }
 0x375   : > { %v3946_v48 = vpop.eup %3202  ;;  %v1009_v58 = vpack.c.b16 %v1008_v29, %v1007_v28 }
 0x376   : > { %v1494_v53 = vsel %vm928_vm14, %v3946_v48, 0.0  ;;  %v3950_v56 = vpop.eup %3204 }
 0x377   : > { %1495 = vadd.xlane.f32.xlu0 %v1494_v53  ;;  %v1488_v54 = vsel %vm928_vm14, %v3950_v56, 0.0 }
 0x37a   : > { %v3958_v63 = vpop.eup %3206 }
 0x37b   : > { %1489 = vadd.xlane.f32.xlu1 %v1488_v54  ;;  %v1491_v0 = vsel %vm928_vm14, %v3958_v63, 0.0 }
 0x37f   : > { %2706 = vmatmul.msk.bf16.vlgmr.msrb.gmra.mxu3 %vm928_vm14, %v1009_v58 }
 0x381   : > { %v1334_v59 = vpop.permute.xlu0 %1333 }
 0x382   : > { %1346 = vmatpush.bf16.msra.mxu2 %v1334_v59 }
 0x394   : > { %1514 = vrot.lane.b32.xlu1 %v3752_v24, %s3422_s17 }
 0x39c   : > { %1492 = vadd.xlane.f32.xlu2 %v1491_v0  ;;  %1539 = vrot.lane.b32.xlu1 %v3759_v31, %s3422_s17 }
 0x3b2   : > { %v1125_v1 = vpop.xlane.xlu2 %1124 }
 0x3b3   : > { %3208 = vrcp.f32 %v1125_v1 }
 0x3b9   : > { %v3209_v4 = vpop.eup %3208 }
 0x3ba   : > { %v1139_v35 = vmul.f32 %v3209_v4, %v3892_v13 }
 0x3bc   : > { %v1143_v24 = vpack.c.bf16 %v1139_v35, %v1139_v35 }
 0x3be   : > { %v1306_v55 = vpop.xlane.xlu2 %1305  ;;  %v1149_v17 = vunpack.c.l.b16 %v1143_v24 }
 0x3c6   : > { %v1128_v57 = vpop.xlane.xlu1 %1127 }
 0x3c7   : > { %3210 = vrcp.f32 %v1128_v57 }
 0x3cd   : > { %v3211_v6 = vpop.eup %3210 }
 0x3ce   : > { %v1131_v7 = vpop.xlane.xlu2 %1130  ;;  %v1140_v8 = vmul.f32 %v3211_v6, %v3905_v61  ;;  %v1309_v11 = vpop.xlane.xlu1 %1308 }
 0x3cf   : > { %3212 = vrcp.f32 %v1309_v11 }
 0x3d0   : > { %3214 = vrcp.f32 %v1306_v55  ;;  %v1144_v14 = vpack.c.bf16 %v1140_v8, %v1140_v8 }
 0x3d1   : > { %3216 = vrcp.f32 %v1131_v7 }
 0x3d2   : > { %v1150_v31 = vunpack.c.l.b16 %v1144_v14 }
 0x3d4   : > { %v1151_v18 = vpack.c.b16 %v1150_v31, %v1149_v17 }
 0x3d5   : > { %v3213_v16 = vpop.eup %3212 }
 0x3d6   : > { %v1359_v19 = vpop.permute.xlu2 %1358  ;;  %v3215_v21 = vpop.eup %3214  ;;  %2709 = vmatmul.msk.bf16.vlgmr.msrb.gmra.mxu2 %vm928_vm14, %v1151_v18  ;;  %v1321_v27 = vmul.f32 %v3213_v16, %v3909_v2 }
 0x3d7   : > { %v1134_v26 = vpop.xlane.xlu1 %1133  ;;  %1371 = vmatpush.bf16.msrb.mxu3 %v1359_v19  ;;  %v3217_v13 = vpop.eup %3216  ;;  %v1320_v61 = vmul.f32 %v3215_v21, %v3898_v47 }
 0x3d8   : > { %3218 = vrcp.f32 %v1134_v26  ;;  %v1141_v30 = vmul.f32 %v3217_v13, %v3911_v3  ;;  %v1325_v32 = vpack.c.bf16 %v1321_v27, %v1321_v27 }
 0x3d9   : > { %v1324_v33 = vpack.c.bf16 %v1320_v61, %v1320_v61 }
 0x3da   : > { %v1145_v36 = vpack.c.bf16 %v1141_v30, %v1141_v30  ;;  %v1315_v37 = vpop.xlane.xlu0 %1314  ;;  %v1331_v39 = vunpack.c.l.b16 %v1325_v32  ;;  %v3042_v32 = vld [vmem:[#allocation3 + $0x38] sm:$0xff] }
 0x3db   : > { %v1330_v62 = vunpack.c.l.b16 %v1324_v33  ;;  %1654 = vmatpush.bf16.msrb.mxu0 %v3042_v32  ;;  %v3040_v33 = vld [vmem:[#allocation3 + $0x28] sm:$0xff]  ;;  %v2867_v32 = vld [vmem:[%s4465_s10 + $0xf0] sm:$0xf0] }
 0x3dc   : > { %v1174_v41 = vunpack.c.l.b16 %v1145_v36 }
 0x3dd   : > { %v1332_v2 = vpack.c.b16 %v1331_v39, %v1330_v62  ;;  %v3039_v39 = vld [vmem:[#allocation3 + $0x20] sm:$0xff]  ;;  %v3037_v62 = vld [vmem:[#allocation3 + $0x10] sm:$0xff] }
 0x3de   : > { %v3219_v20 = vpop.eup %3218 }
 0x3df   : > { %v1142_v5 = vmul.f32 %v3219_v20, %v3918_v12  ;;  %v1312_v38 = vpop.xlane.xlu1 %1311  ;;  %v3041_v20 = vld [vmem:[#allocation3 + $0x30] sm:$0xff] }
 0x3e0   : > { %3220 = vrcp.f32 %v1312_v38  ;;  %1655 = vmatpush.bf16.msrb.mxu0 %v3041_v20  ;;  %v2873_v20 = vld [vmem:[%s4465_s10 + $0xe8] sm:$0xf] }
 0x3e1   : > { %v1146_v40 = vpack.c.bf16 %v1142_v5, %v1142_v5  ;;  %3222 = vrcp.f32 %v1315_v37 }
 0x3e3   : > { %v1175_v15 = vunpack.c.l.b16 %v1146_v40  ;;  %v3038_v40 = vld [vmem:[#allocation3 + $0x18] sm:$0xff] }
 0x3e4   : > { %1656 = vmatpush.bf16.msrb.mxu0 %v3040_v33  ;;  %v3074_v33 = vld [vmem:[%s4465_s10 + $0xf4] sm:$0xf0] }
 0x3e5   : > { %v1176_v22 = vpack.c.b16 %v1175_v15, %v1174_v41  ;;  %v3036_v15 = vld [vmem:[#allocation3 + $0x8] sm:$0xff] }
 0x3e6   : > { %v3221_v47 = vpop.eup %3220  ;;  %2713 = vmatmul.msk.bf16.vlgmr.msra.gmra.mxu2 %vm928_vm14, %v1332_v2  ;;  %v3035_v2 = vld [vmem:[#allocation3] sm:$0xff] }
 0x3e7   : > { %v1487_v42 = vpop.xlane.xlu1 %1486  ;;  %2710 = vmatmul.msk.bf16.vlgmr.msra.gmra.mxu3 %vm928_vm14, %v1176_v22  ;;  %v3223_v3 = vpop.eup %3222  ;;  %v1322_v12 = vmul.f32 %v3221_v47, %v3930_v60 }
 0x3e8   : > { %v1323_v43 = vmul.f32 %v3223_v3, %v3925_v25  ;;  %1657 = vmatpush.bf16.msrb.mxu0 %v3039_v39 }
 0x3e9   : > { %v1326_v45 = vpack.c.bf16 %v1322_v12, %v1322_v12 }
 0x3ea   : > { %v1327_v9 = vpack.c.bf16 %v1323_v43, %v1323_v43  ;;  %v1496_v0 = vpop.xlane.xlu0 %1495 }
 0x3eb   : > { %v1355_v23 = vunpack.c.l.b16 %v1326_v45 }
 0x3ec   : > { %v1356_v52 = vunpack.c.l.b16 %v1327_v9  ;;  %1658 = vmatpush.bf16.msrb.mxu0 %v3038_v40  ;;  %v2849_v40 = vld [vmem:[%s4465_s10 + $0xc0] sm:$0xf] }
 0x3ee   : > { %v1357_v53 = vpack.c.b16 %v1356_v52, %v1355_v23 }
 0x3ef   : > { %v1490_v34 = vpop.xlane.xlu1 %1489 }
 0x3f0   : > { %3224 = vrcp.f32 %v1490_v34  ;;  %1659 = vmatpush.bf16.msrb.mxu0 %v3037_v62  ;;  %v3069_v62 = vld [vmem:[%s4465_s10 + $0xcc] sm:$0xf0] }
 0x3f1   : > { %3226 = vrcp.f32 %v1487_v42 }
 0x3f2   : > { %v1000_v50 = vpop.f32.mrf.mxu3  ;;  %3228 = vrcp.f32 %v1496_v0 }
 0x3f3   : > { %1033 = vst.msk [vmem:[#allocation2] sm:$0xff] %vm881_vm13, %v1000_v50 }
 0x3f4   : > { %1660 = vmatpush.bf16.msrb.mxu0 %v3036_v15  ;;  %v2850_v15 = vor.u32 %v3069_v62, %v2849_v40 }
 0x3f6   : > { %v3225_v28 = vpop.eup %3224 }
 0x3f7   : > { %2714 = vmatmul.msk.bf16.vlgmr.msrb.gmra.mxu3 %vm928_vm14, %v1357_v53  ;;  %v3227_v60 = vpop.eup %3226  ;;  %v1502_v25 = vmul.f32 %v3225_v28, %v3950_v56  ;;  %v3154_v28 = vld [vmem:[#allocation5] ss:$0 sm:$0xff] }
 0x3f8   : > { %v1501_v44 = vmul.f32 %v3227_v60, %v3937_v46  ;;  %v3229_v46 = vpop.eup %3228  ;;  %1661 = vmatpush.bf16.msrb.mxu0 %v3035_v2  ;;  %v2851_v2 = vld [vmem:[%s4465_s10 + $0xd0] sm:$0xf0] }
 0x3f9   : > { %v1506_v54 = vpack.c.bf16 %v1502_v25, %v1502_v25  ;;  %v1504_v35 = vmul.f32 %v3229_v46, %v3946_v48  ;;  %v3304_v25 = vld [vmem:[%s3545_s23] sm:$0xff] }
 0x3fa   : > { %v1002_v29 = vpop.f32.mrf.mxu3  ;;  %v1505_v59 = vpack.c.bf16 %v1501_v44, %v1501_v44 }
 0x3fb   : > { %1034 = vst.msk [vmem:[#allocation2 + $0x8] sm:$0xff] %vm881_vm13, %v1002_v29  ;;  %v1512_v49 = vunpack.c.l.b16 %v1506_v54  ;;  %v1508_v7 = vpack.c.bf16 %v1504_v35, %v1504_v35 }
 0x3fc   : > { %v1511_v51 = vunpack.c.l.b16 %v1505_v59  ;;  %v3305_v59 = vld [vmem:[%s3545_s23 + $0x8] sm:$0xff] }
 0x3fd   : > { %v1537_v11 = vunpack.c.l.b16 %v1508_v7 }
 0x3fe   : > { %v1513_v55 = vpack.c.b16 %v1512_v49, %v1511_v51 }
 0x402   : > { %v1028_v58 = vpop.f32.mrf.mxu3 }
 0x403   : > { %1035 = vst.msk [vmem:[#allocation2 + $0x10] sm:$0xff] %vm881_vm13, %v1028_v58 }
 0x406   : > { %v1515_v1 = vpop.permute.xlu1 %1514 }
 0x407   : > { %1527 = vmatpush.bf16.msrb.mxu2 %v1515_v1  ;;  %v3306_v1 = vld [vmem:[%s3545_s23 + $0x10] sm:$0xff] }
 0x40a   : > { %v1030_v57 = vpop.f32.mrf.mxu3  ;;  %2717 = vmatmul.msk.bf16.vlgmr.msrb.gmra.mxu2 %vm928_vm14, %v1513_v55 }
 0x40b   : > { %1036 = vst.msk [vmem:[#allocation2 + $0x18] sm:$0xff] %vm881_vm13, %v1030_v57 }
 0x40e   : > { %v1540_v56 = vpop.permute.xlu1 %1539 }
 0x40f   : > { %v1493_v4 = vpop.xlane.xlu2 %1492  ;;  %1552 = vmatpush.bf16.msra.mxu3 %v1540_v56 }
 0x410   : > { %3230 = vrcp.f32 %v1493_v4  ;;  %v3307_v4 = vld [vmem:[%s3545_s23 + $0x18] sm:$0xff] }
 0x416   : > { %v3231_v6 = vpop.eup %3230 }
 0x417   : > { %v1503_v24 = vmul.f32 %v3231_v6, %v3958_v63 }
 0x419   : > { %v1507_v8 = vpack.c.bf16 %v1503_v24, %v1503_v24 }
 0x41b   : > { %v1536_v14 = vunpack.c.l.b16 %v1507_v8 }
 0x41d   : > { %v1538_v17 = vpack.c.b16 %v1537_v11, %v1536_v14 }
 0x41f   : > { %2718 = vmatmul.msk.bf16.vlgmr.msra.gmra.mxu3 %vm928_vm14, %v1538_v17 }
 0x459   : > { %v1167_v31 = vpop.f32.mrf.mxu2 }
 0x45a   : > { %1201 = vrot.lane.b32.xlu0 %v1167_v31, %s3422_s17 }
 0x461   : > { %v1169_v18 = vpop.f32.mrf.mxu2 }
 0x462   : > { %1203 = vrot.lane.b32.xlu1 %v1169_v18, %s3422_s17 }
 0x469   : > { %v1348_v16 = vpop.f32.mrf.mxu2 }
 0x46a   : > { %1382 = vrot.lane.b32.xlu1 %v1348_v16, %s3421_s21  ;;  %v1192_v48 = vpop.f32.mrf.mxu3 }
 0x471   : > { %v1350_v19 = vpop.f32.mrf.mxu2 }
 0x472   : > { %1205 = vrot.lane.b32.xlu1 %v1192_v48, %s3422_s17  ;;  %1384 = vrot.lane.b32.xlu2 %v1350_v19, %s3421_s21  ;;  %v1194_v63 = vpop.f32.mrf.mxu3 }
 0x47a   : > { %v1373_v26 = vpop.f32.mrf.mxu3 }
 0x482   : > { %v1375_v27 = vpop.f32.mrf.mxu3 }
 0x48d   : > { %v1529_v21 = vpop.f32.mrf.mxu2 }
 0x48e   : > { %1563 = vrot.lane.b32.xlu1 %v1529_v21, %s3420_s19 }
 0x495   : > { %v1531_v13 = vpop.f32.mrf.mxu2 }
 0x496   : > { %1565 = vrot.lane.b32.xlu0 %v1531_v13, %s3420_s19  ;;  %1386 = vrot.lane.b32.xlu1 %v1373_v26, %s3421_s21  ;;  %v2865_v13 = vld [vmem:[%s4465_s10 + $0xe0] sm:$0xf] }
 0x49e   : > { %1207 = vrot.lane.b32.xlu0 %v1194_v63, %s3422_s17 }
 0x4a2   : > { %v1554_v61 = vpop.f32.mrf.mxu3 }
 0x4a3   : > { %1567 = vrot.lane.b32.xlu2 %v1554_v61, %s3420_s19  ;;  %v3071_v61 = vld [vmem:[%s4465_s10 + $0xe4] sm:$0xf] }
 0x4a6   : > { %1388 = vrot.lane.b32.xlu0 %v1375_v27, %s3421_s21  ;;  %v3073_v27 = vld [vmem:[%s4465_s10 + $0xec] sm:$0xf0] }
 0x4aa   : > { %v1556_v30 = vpop.f32.mrf.mxu3 }
 0x4ab   : > { %1569 = vrot.lane.b32.xlu1 %v1556_v30, %s3420_s19  ;;  %v2866_v30 = vor.u32 %v3073_v27, %v2865_v13 }
 0x4ad   : > { %1977 = vmatpush.bf16.msrb.mxu1 %v2866_v30  ;;  %v2811_v30 = vld [vmem:[%s4465_s10 + $0x78] sm:$0xf0] }
 0x4b1   : > { %1978 = vmatpush.bf16.msrb.mxu1 %v2850_v15  ;;  %v2795_v15 = vld [vmem:[%s4465_s10 + $0x58] sm:$0xf0] }
 0x4cc   : > { %v1202_v36 = vpop.permute.xlu0 %1201  ;;  %v1385_v37 = vpop.permute.xlu2 %1384 }
 0x4cd   : > { %1214 = vst.msk [vmem:[#allocation2] sm:$0xff] %vm1213_vm15, %v1202_v36  ;;  %v2870_v36 = vor.u32 %v3071_v61, %v2867_v32  ;;  %v3056_v61 = vld [vmem:[%s4465_s10 + $0x6c] sm:$0xf] }
 0x4ce   : > { %v2814_v32 = vor.u32 %v3056_v61, %v2811_v30 }
 0x4cf   : > { %1996 = vmatpush.bf16.msra.mxu2 %v2870_v36  ;;  %v3051_v36 = vld [vmem:[%s4465_s10 + $0x44] sm:$0xf] }
 0x4d4   : > { %v1204_v5 = vpop.permute.xlu1 %1203 }
 0x4d5   : > { %1215 = vst.msk [vmem:[#allocation2 + $0x8] sm:$0xff] %vm1213_vm15, %v1204_v5  ;;  %v2874_v5 = vor.u32 %v3074_v33, %v2873_v20  ;;  %v2785_v20 = vld [vmem:[%s4465_s10 + $0x40] sm:$0xf]  ;;  %v3053_v33 = vld [vmem:[%s4465_s10 + $0x4c] sm:$0xf0] }
 0x4d6   : > { %1396 = vst.msk [vmem:[#allocation2 + $0x8] sm:$0xff] %vm1394_vm0, %v1385_v37  ;;  %v3072_v37 = vld [vmem:[%s4465_s10 + $0xec] sm:$0xf] }
 0x4d7   : > { %2015 = vmatpush.bf16.msrb.mxu3 %v2874_v5  ;;  %v2786_v5 = vor.u32 %v3053_v33, %v2785_v20 }
 0x4dc   : > { %v1383_v38 = vpop.permute.xlu1 %1382 }
 0x4dd   : > { %1395 = vst.msk [vmem:[#allocation2] sm:$0xff] %vm1394_vm0, %v1383_v38  ;;  %v2875_v38 = vld [vmem:[%s4465_s10 + $0xf8] sm:$0xf0] }
 0x4de   : > { %v2878_v39 = vor.u32 %v3072_v37, %v2875_v38  ;;  %v2787_v37 = vld [vmem:[%s4465_s10 + $0x50] sm:$0xf0]  ;;  %v2793_v38 = vld [vmem:[%s4465_s10 + $0x48] sm:$0xf] }
 0x4df   : > { %v2790_v40 = vor.u32 %v3051_v36, %v2787_v37 }
 0x4e0   : > { %2034 = vmatpush.bf16.msra.mxu0 %v2878_v39  ;;  %v3054_v39 = vld [vmem:[%s4465_s10 + $0x54] sm:$0xf0] }
 0x4e1   : > { %v2794_v62 = vor.u32 %v3054_v39, %v2793_v38  ;;  %v3155_v38 = vld [vmem:[%s4463_s8] ss:$0 sm:$0xff] }
 0x4e4   : > { %v1206_v41 = vpop.permute.xlu1 %1205 }
 0x4e5   : > { %1216 = vst.msk [vmem:[#allocation2 + $0x10] sm:$0xff] %vm1213_vm15, %v1206_v41  ;;  %v3067_v41 = vld [vmem:[%s4465_s10 + $0xc4] sm:$0xf] }
 0x4fd   : > { %v1568_v3 = vpop.permute.xlu2 %1567 }
 0x500   : > { %v1564_v22 = vpop.permute.xlu1 %1563 }
 0x501   : > { %1576 = vst.msk [vmem:[#allocation2] sm:$0xff] %vm1575_vm1, %v1564_v22  ;;  %v2857_v22 = vld [vmem:[%s4465_s10 + $0xc8] sm:$0xf] }
 0x508   : > { %v1387_v47 = vpop.permute.xlu1 %1386  ;;  %v1566_v42 = vpop.permute.xlu0 %1565  ;;  %v1580_v43 = vld [vmem:[#allocation2] sm:$0xff] }
 0x509   : > { %1397 = vst.msk [vmem:[#allocation2 + $0x10] sm:$0xff] %vm1394_vm0, %v1387_v47  ;;  %v3070_v47 = vld [vmem:[%s4465_s10 + $0xd4] sm:$0xf0] }
 0x50a   : > { %1578 = vst.msk [vmem:[#allocation2 + $0x10] sm:$0xff] %vm1575_vm1, %v1568_v3  ;;  %v2858_v3 = vor.u32 %v3070_v47, %v2857_v22  ;;  %v2769_v22 = vld [vmem:[%s4465_s10 + $0x20] sm:$0xf]  ;;  %v3049_v47 = vld [vmem:[%s4465_s10 + $0x2c] sm:$0xf0] }
 0x50b   : > { %1577 = vst.msk [vmem:[#allocation2 + $0x8] sm:$0xff] %vm1575_vm1, %v1566_v42  ;;  %v2854_v42 = vor.u32 %v3067_v41, %v2851_v2  ;;  %v3052_v41 = vld [vmem:[%s4465_s10 + $0x4c] sm:$0xf] }
 0x50c   : > { %2016 = vmatpush.bf16.msrb.mxu3 %v2858_v3  ;;  %v2798_v2 = vor.u32 %v3052_v41, %v2795_v15  ;;  %v2770_v3 = vor.u32 %v3049_v47, %v2769_v22 }
 0x50d   : > { %1997 = vmatpush.bf16.msra.mxu2 %v2854_v42  ;;  %v3047_v42 = vld [vmem:[%s4465_s10 + $0x24] sm:$0xf] }
 0x510   : > { %v1208_v12 = vpop.permute.xlu0 %1207 }
 0x511   : > { %1217 = vst.msk [vmem:[#allocation2 + $0x18] sm:$0xff] %vm1213_vm15, %v1208_v12  ;;  %v1582_v50 = vld [vmem:[#allocation2 + $0x10] sm:$0xff]  ;;  %v3068_v12 = vld [vmem:[%s4465_s10 + $0xcc] sm:$0xf] }
 0x512   : > { %v1581_v45 = vld [vmem:[#allocation2 + $0x8] sm:$0xff] }
 0x513   : > { %v1584_v9 = vpack.c.bf16 %v1581_v45, %v1580_v43  ;;  %v2859_v43 = vld [vmem:[%s4465_s10 + $0xd8] sm:$0xf0] }
 0x514   : > { %v2862_v45 = vor.u32 %v3068_v12, %v2859_v43  ;;  %v2771_v12 = vld [vmem:[%s4465_s10 + $0x30] sm:$0xf0]  ;;  %v2777_v43 = vld [vmem:[%s4465_s10 + $0x28] sm:$0xf] }
 0x515   : > { %1662 = vmatmul.bf16.vlgmr.msrb.gmra.mxu0 %v1584_v9  ;;  %v2833_v9 = vld [vmem:[%s4465_s10 + $0xa0] sm:$0xf] }
 0x516   : > { %2035 = vmatpush.bf16.msra.mxu0 %v2862_v45  ;;  %v3050_v45 = vld [vmem:[%s4465_s10 + $0x34] sm:$0xf0] }
 0x518   : > { %v1389_v23 = vpop.permute.xlu0 %1388 }
 0x519   : > { %1398 = vst.msk [vmem:[#allocation2 + $0x18] sm:$0xff] %vm1394_vm0, %v1389_v23  ;;  %v3065_v23 = vld [vmem:[%s4465_s10 + $0xac] sm:$0xf0] }
 0x51d   : > { %v1570_v34 = vpop.permute.xlu1 %1569 }
 0x51e   : > { %1579 = vst.msk [vmem:[#allocation2 + $0x18] sm:$0xff] %vm1575_vm1, %v1570_v34  ;;  %v3063_v34 = vld [vmem:[%s4465_s10 + $0xa4] sm:$0xf] }
 0x525   : > { %v1583_v52 = vld [vmem:[#allocation2 + $0x18] sm:$0xff] }
 0x526   : > { %v1585_v53 = vpack.c.bf16 %v1583_v52, %v1582_v50  ;;  %v2834_v50 = vor.u32 %v3065_v23, %v2833_v9  ;;  %v2835_v52 = vld [vmem:[%s4465_s10 + $0xb0] sm:$0xf0]  ;;  %v2774_v9 = vor.u32 %v3047_v42, %v2771_v12  ;;  %v2778_v23 = vor.u32 %v3050_v45, %v2777_v43 }
 0x528   : > { %1667 = vmatmul.bf16.gmra.mxu0 %v1585_v53  ;;  %v2841_v53 = vld [vmem:[%s4465_s10 + $0xa8] sm:$0xf]  ;;  %1979 = vmatpush.bf16.msrb.mxu1 %v2834_v50  ;;  %v2779_v50 = vld [vmem:[%s4465_s10 + $0x38] sm:$0xf0] }
 0x592   : > { %v1663_v29 = vpop.f32.mrf.mxu0 }
 0x593   : > { %v1664_v60 = vadd.f32 %v3154_v28, %v1663_v29  ;;  %v2838_v29 = vor.u32 %v3063_v34, %v2835_v52  ;;  %v3048_v34 = vld [vmem:[%s4465_s10 + $0x2c] sm:$0xf] }
 0x595   : > { %v4011_v44 = vadd.f32 %v3304_v25, %v1664_v60  ;;  %v3064_v25 = vld [vmem:[%s4465_s10 + $0xac] sm:$0xf]  ;;  %1998 = vmatpush.bf16.msra.mxu2 %v2838_v29  ;;  %v2753_v29 = vld [vmem:[%s4465_s10] sm:$0xf] }
 0x597   : > { %1679 = vadd.xlane.f32.xlu0 %v4011_v44 }
 0x59a   : > { %v1665_v54 = vpop.f32.mrf.mxu0 }
 0x59b   : > { %v1666_v58 = vadd.f32 %v3154_v28, %v1665_v54  ;;  %v2843_v54 = vld [vmem:[%s4465_s10 + $0xb8] sm:$0xf0] }
 0x59d   : > { %v4015_v49 = vadd.f32 %v3305_v59, %v1666_v58  ;;  %v2846_v58 = vor.u32 %v3064_v25, %v2843_v54  ;;  %v2817_v59 = vld [vmem:[%s4465_s10 + $0x80] sm:$0xf]  ;;  %v3043_v25 = vld [vmem:[%s4465_s10 + $0x4] sm:$0xf] }
 0x59f   : > { %1681 = vadd.xlane.f32.xlu2 %v4015_v49  ;;  %2036 = vmatpush.bf16.msra.mxu0 %v2846_v58  ;;  %v2755_v58 = vld [vmem:[%s4465_s10 + $0x10] sm:$0xf0] }
 0x5a5   : > { %v1668_v51 = vpop.f32.mrf.mxu0 }
 0x5a6   : > { %v1669_v0 = vadd.f32 %v3154_v28, %v1668_v51  ;;  %v3061_v51 = vld [vmem:[%s4465_s10 + $0x8c] sm:$0xf0] }
 0x5a8   : > { %v4019_v55 = vadd.f32 %v3306_v1, %v1669_v0  ;;  %v3059_v0 = vld [vmem:[%s4465_s10 + $0x84] sm:$0xf]  ;;  %v2818_v1 = vor.u32 %v3061_v51, %v2817_v59  ;;  %v2761_v59 = vld [vmem:[%s4465_s10 + $0x8] sm:$0xf]  ;;  %v3046_v51 = vld [vmem:[%s4465_s10 + $0x14] sm:$0xf0] }
 0x5aa   : > { %1683 = vadd.xlane.f32.xlu1 %v4019_v55  ;;  %1980 = vmatpush.bf16.msrb.mxu1 %v2818_v1  ;;  %v2758_v1 = vor.u32 %v3043_v25, %v2755_v58 }
 0x5ad   : > { %v1670_v57 = vpop.f32.mrf.mxu0 }
 0x5ae   : > { %v1671_v56 = vadd.f32 %v3154_v28, %v1670_v57  ;;  %v3066_v28 = vld [vmem:[%s4465_s10 + $0xb4] sm:$0xf0]  ;;  %v2819_v57 = vld [vmem:[%s4465_s10 + $0x90] sm:$0xf0] }
 0x5af   : > { %v2842_v60 = vor.u32 %v3066_v28, %v2841_v53  ;;  %v2782_v53 = vor.u32 %v3048_v34, %v2779_v50 }
 0x5b0   : > { %v4023_v46 = vadd.f32 %v3307_v4, %v1671_v56  ;;  %v2825_v56 = vld [vmem:[%s4465_s10 + $0x88] sm:$0xf]  ;;  %v3062_v4 = vld [vmem:[%s4465_s10 + $0x94] sm:$0xf0] }
 0x5b1   : > { %2017 = vmatpush.bf16.msrb.mxu3 %v2842_v60  ;;  %v3045_v60 = vld [vmem:[%s4465_s10 + $0xc] sm:$0xf0] }
 0x5b2   : > { %1685 = vadd.xlane.f32.xlu0 %v4023_v46  ;;  %v2754_v54 = vor.u32 %v3045_v60, %v2753_v29 }
 0x60a   : > { %v1680_v35 = vpop.xlane.xlu0 %1679 }
 0x60b   : > { %v1687_v6 = vmul.f32 %v1680_v35, %v3551_v10  ;;  %v2822_v35 = vor.u32 %v3059_v0, %v2819_v57  ;;  %v2762_v57 = vor.u32 %v3046_v51, %v2761_v59 }
 0x60d   : > { %v4028_v7 = vsub.f32 %v4011_v44, %v1687_v6  ;;  %v2826_v6 = vor.u32 %v3062_v4, %v2825_v56  ;;  %1999 = vmatpush.bf16.msra.mxu2 %v2822_v35  ;;  %v3044_v56 = vld [vmem:[%s4465_s10 + $0xc] sm:$0xf]  ;;  %v2763_v4 = vld [vmem:[%s4465_s10 + $0x18] sm:$0xf0] }
 0x60e   : > { %v2766_v35 = vor.u32 %v3044_v56, %v2763_v4  ;;  %v3090_v56 = vld [vmem:[%s4467_s12 + $0x78] sm:$0xff] }
 0x60f   : > { %v1695_v24 = vmul.f32 %v4028_v7, %v4028_v7  ;;  %2018 = vmatpush.bf16.msrb.mxu3 %v2826_v6  ;;  %v3098_v4 = vld [vmem:[%s4467_s12 + $0xb8] sm:$0xff] }
 0x611   : > { %1699 = vadd.xlane.f32.xlu2 %v1695_v24  ;;  %v3060_v24 = vld [vmem:[%s4465_s10 + $0x8c] sm:$0xf] }
 0x612   : > { %v1682_v8 = vpop.xlane.xlu2 %1681 }
 0x613   : > { %v1688_v11 = vmul.f32 %v1682_v8, %v3551_v10  ;;  %v2827_v8 = vld [vmem:[%s4465_s10 + $0x98] sm:$0xf0] }
 0x615   : > { %v4034_v14 = vsub.f32 %v4015_v49, %v1688_v11  ;;  %v2830_v11 = vor.u32 %v3060_v24, %v2827_v8 }
 0x617   : > { %v1696_v17 = vmul.f32 %v4034_v14, %v4034_v14  ;;  %2037 = vmatpush.bf16.msra.mxu0 %v2830_v11 }
 0x619   : > { %1701 = vadd.xlane.f32.xlu1 %v1696_v17  ;;  %v2801_v17 = vld [vmem:[%s4465_s10 + $0x60] sm:$0xf] }
 0x61b   : > { %2038 = vmatpush.bf16.msra.mxu0 %v2814_v32 }
 0x61d   : > { %v1684_v31 = vpop.xlane.xlu1 %1683 }
 0x61e   : > { %v1689_v18 = vmul.f32 %v1684_v31, %v3551_v10  ;;  %v3057_v31 = vld [vmem:[%s4465_s10 + $0x6c] sm:$0xf0] }
 0x61f   : > { %2039 = vmatpush.bf16.msra.mxu0 %v2798_v2 }
 0x620   : > { %v4040_v16 = vsub.f32 %v4019_v55, %v1689_v18  ;;  %v3055_v18 = vld [vmem:[%s4465_s10 + $0x64] sm:$0xf] }
 0x622   : > { %v1697_v48 = vmul.f32 %v4040_v16, %v4040_v16 }
 0x623   : > { %2040 = vmatpush.bf16.msra.mxu0 %v2782_v53 }
 0x624   : > { %1703 = vadd.xlane.f32.xlu0 %v1697_v48  ;;  %v2802_v48 = vor.u32 %v3057_v31, %v2801_v17 }
 0x625   : > { %v1686_v19 = vpop.xlane.xlu0 %1685 }
 0x626   : > { %v1690_v63 = vmul.f32 %v1686_v19, %v3551_v10  ;;  %v2803_v19 = vld [vmem:[%s4465_s10 + $0x70] sm:$0xf0]  ;;  %1981 = vmatpush.bf16.msrb.mxu1 %v2802_v48 }
 0x627   : > { %v2806_v13 = vor.u32 %v3055_v18, %v2803_v19  ;;  %2041 = vmatpush.bf16.msra.mxu0 %v2766_v35  ;;  %v3080_v35 = vld [vmem:[%s4467_s12 + $0x28] sm:$0xff] }
 0x628   : > { %v4046_v21 = vsub.f32 %v4023_v46, %v1690_v63  ;;  %v2809_v63 = vld [vmem:[%s4465_s10 + $0x68] sm:$0xf] }
 0x629   : > { %2000 = vmatpush.bf16.msra.mxu2 %v2806_v13 }
 0x62a   : > { %v1698_v26 = vmul.f32 %v4046_v21, %v4046_v21  ;;  %1982 = vmatpush.bf16.msrb.mxu1 %v2786_v5 }
 0x62c   : > { %1705 = vadd.xlane.f32.xlu2 %v1698_v26  ;;  %v3058_v26 = vld [vmem:[%s4465_s10 + $0x74] sm:$0xf0] }
 0x62d   : > { %v2810_v27 = vor.u32 %v3058_v26, %v2809_v63  ;;  %2001 = vmatpush.bf16.msra.mxu2 %v2790_v40 }
 0x62e   : > { %1983 = vmatpush.bf16.msrb.mxu1 %v2770_v3 }
 0x62f   : > { %2019 = vmatpush.bf16.msrb.mxu3 %v2810_v27 }
 0x631   : > { %2002 = vmatpush.bf16.msra.mxu2 %v2774_v9 }
 0x632   : > { %1984 = vmatpush.bf16.msrb.mxu1 %v2754_v54 }
 0x633   : > { %2020 = vmatpush.bf16.msrb.mxu3 %v2794_v62 }
 0x635   : > { %2003 = vmatpush.bf16.msra.mxu2 %v2758_v1  ;;  %v3082_v1 = vld [vmem:[%s4467_s12 + $0x38] sm:$0xff] }
 0x636   : > { %2417 = vmatpush.bf16.msra.mxu1 %v3082_v1 }
 0x637   : > { %2021 = vmatpush.bf16.msrb.mxu3 %v2778_v23 }
 0x639   : > { %2436 = vmatpush.bf16.msrb.mxu2 %v3090_v56 }
 0x63b   : > { %2022 = vmatpush.bf16.msrb.mxu3 %v2762_v57  ;;  %v3105_v57 = vld [vmem:[%s4467_s12 + $0xf0] sm:$0xff] }
 0x63f   : > { %2455 = vmatpush.bf16.msra.mxu3 %v3098_v4 }
 0x684   : > { %v1700_v52 = vpop.xlane.xlu2 %1699 }
 0x685   : > { %v1707_v28 = vmul.f32 %v1700_v52, %v3551_v10 }
 0x687   : > { %v1711_v0 = vadd.f32 1e-05, %v1707_v28 }
 0x689   : > { %3232 = vrsqrt.f32 %v1711_v0  ;;  %vm1721_vm3 = vweird.f32 %v1711_v0 }
 0x68c   : > { %v1702_v6 = vpop.xlane.xlu1 %1701 }
 0x68d   : > { %v1708_v24 = vmul.f32 %v1702_v6, %v3551_v10  ;;  %v3104_v6 = vld [vmem:[%s4467_s12 + $0xe8] sm:$0xff] }
 0x68f   : > { %v3233_v8 = vpop.eup %3232  ;;  %v1712_v11 = vadd.f32 1e-05, %v1708_v24  ;;  %v3089_v24 = vld [vmem:[%s4467_s12 + $0x70] sm:$0xff] }
 0x690   : > { %v1716_v17 = vmul.f32 %v3233_v8, %v1711_v0  ;;  %vm1722_vm2 = vweird.f32 %v3233_v8  ;;  %2437 = vmatpush.bf16.msrb.mxu2 %v3089_v24 }
 0x691   : > { %3234 = vrsqrt.f32 %v1712_v11  ;;  %vm1723_vm4 = vmor %vm1721_vm3, %vm1722_vm2  ;;  %vm1731_vm6 = vweird.f32 %v1712_v11 }
 0x692   : > { %v1717_v31 = vmul.f32 %v3233_v8, %v1716_v17  ;;  %v3103_v17 = vld [vmem:[%s4467_s12 + $0xe0] sm:$0xff] }
 0x694   : > { %v1718_v18 = vmul.f32 0.5, %v1717_v31  ;;  %v3088_v31 = vld [vmem:[%s4467_s12 + $0x68] sm:$0xff] }
 0x695   : > { %2438 = vmatpush.bf16.msrb.mxu2 %v3088_v31 }
 0x696   : > { %v1719_v48 = vsub.f32 1.5, %v1718_v18  ;;  %v3096_v18 = vld [vmem:[%s4467_s12 + $0xa8] sm:$0xff] }
 0x697   : > { %v1704_v19 = vpop.xlane.xlu0 %1703  ;;  %v3235_v63 = vpop.eup %3234 }
 0x698   : > { %v1709_v26 = vmul.f32 %v1704_v19, %v3551_v10  ;;  %v1720_v13 = vmul.f32 %v3233_v8, %v1719_v48  ;;  %v1726_v27 = vmul.f32 %v3235_v63, %v1712_v11  ;;  %vm1732_vm5 = vweird.f32 %v3235_v63  ;;  %v3079_v11 = vld [vmem:[%s4467_s12 + $0x20] sm:$0xff]  ;;  %v3078_v48 = vld [vmem:[%s4467_s12 + $0x18] sm:$0xff] }
 0x699   : > { %vm1733_vm7 = vmor %vm1731_vm6, %vm1732_vm5  ;;  %v3102_v19 = vld [vmem:[%s4467_s12 + $0xd8] sm:$0xff] }
 0x69a   : > { %v1713_v61 = vadd.f32 1e-05, %v1709_v26  ;;  %v1727_v30 = vmul.f32 %v3235_v63, %v1726_v27  ;;  %v1724_v32 = vsel %vm1723_vm4, %v3233_v8, %v1720_v13  ;;  %v3097_v8 = vld [vmem:[%s4467_s12 + $0xb0] sm:$0xff]  ;;  %v3095_v26 = vld [vmem:[%s4467_s12 + $0xa0] sm:$0xff] }
 0x69b   : > { %v1755_v5 = vmul.f32 %v1724_v32, %v4028_v7  ;;  %v3156_v7 = vld [vmem:[%s4464_s9] ss:$0 sm:$0xff]  ;;  %2456 = vmatpush.bf16.msra.mxu3 %v3097_v8  ;;  %v3077_v27 = vld [vmem:[%s4467_s12 + $0x10] sm:$0xff]  ;;  %v3094_v32 = vld [vmem:[%s4467_s12 + $0x98] sm:$0xff] }
 0x69c   : > { %3236 = vrsqrt.f32 %v1713_v61  ;;  %v1728_v20 = vmul.f32 0.5, %v1727_v30  ;;  %vm1741_vm9 = vweird.f32 %v1713_v61  ;;  %v1807_v13 = vld [vmem:[%s4466_s11] sm:$0xf]  ;;  %v3086_v30 = vld [vmem:[%s4467_s12 + $0x58] sm:$0xff] }
 0x69d   : > { %v1762_v22 = vmul.f32 %v3155_v38, %v1755_v5  ;;  %v3100_v5 = vld [vmem:[%s4467_s12 + $0xc8] sm:$0xff] }
 0x69e   : > { %v1729_v33 = vsub.f32 1.5, %v1728_v20  ;;  %v4325_v20 = vperm.slane %v1807_v13, 0 }
 0x69f   : > { %v1706_v36 = vpop.xlane.xlu2 %1705  ;;  %v1769_v3 = vadd.f32 %v3156_v7, %v1762_v22  ;;  %2457 = vmatpush.bf16.msra.mxu3 %v3096_v18 }
 0x6a0   : > { %v1710_v37 = vmul.f32 %v1706_v36, %v3551_v10  ;;  %v1730_v39 = vmul.f32 %v3235_v63, %v1729_v33  ;;  %v4327_v33 = vperm.slane %v1807_v13, 3  ;;  %v3076_v36 = vld [vmem:[%s4467_s12 + $0x8] sm:$0xff] }
 0x6a2   : > { %v3237_v40 = vpop.eup %3236  ;;  %v1714_v62 = vadd.f32 1e-05, %v1710_v37  ;;  %v1734_v41 = vsel %vm1733_vm7, %v3235_v63, %v1730_v39  ;;  %v3087_v63 = vld [vmem:[%s4467_s12 + $0x60] sm:$0xff]  ;;  %v3093_v39 = vld [vmem:[%s4467_s12 + $0x90] sm:$0xff] }
 0x6a3   : > { %v1736_v15 = vmul.f32 %v3237_v40, %v1713_v61  ;;  %v1756_v2 = vmul.f32 %v1734_v41, %v4034_v14  ;;  %vm1742_vm8 = vweird.f32 %v3237_v40  ;;  %2439 = vmatpush.bf16.msrb.mxu2 %v3087_v63  ;;  %2458 = vmatpush.bf16.msra.mxu3 %v3095_v26  ;;  %v3101_v61 = vld [vmem:[%s4467_s12 + $0xd0] sm:$0xff] }
 0x6a4   : > { %3238 = vrsqrt.f32 %v1714_v62  ;;  %vm1743_vm10 = vmor %vm1741_vm9, %vm1742_vm8  ;;  %vm1751_vm12 = vweird.f32 %v1714_v62 }
 0x6a5   : > { %v1737_v10 = vmul.f32 %v3237_v40, %v1736_v15  ;;  %v1763_v47 = vmul.f32 %v3155_v38, %v1756_v2  ;;  %v3075_v15 = vld [vmem:[%s4467_s12] sm:$0xff] }
 0x6a6   : > { %v3099_v2 = vld [vmem:[%s4467_s12 + $0xc0] sm:$0xff] }
 0x6a7   : > { %v1738_v42 = vmul.f32 0.5, %v1737_v10  ;;  %v1770_v12 = vadd.f32 %v3156_v7, %v1763_v47  ;;  %2440 = vmatpush.bf16.msrb.mxu2 %v3086_v30  ;;  %2459 = vmatpush.bf16.msra.mxu3 %v3094_v32  ;;  %v4357_v47 = vperm.slane %v1807_v13, 2 }
 0x6a9   : > { %v1739_v43 = vsub.f32 1.5, %v1738_v42  ;;  %v1773_v9 = vpack.c.bf16 %v1770_v12, %v1769_v3  ;;  %v3084_v42 = vld [vmem:[%s4467_s12 + $0x48] sm:$0xff] }
 0x6aa   : > { %v3239_v45 = vpop.eup %3238  ;;  %v3092_v3 = vld [vmem:[%s4467_s12 + $0x88] sm:$0xff] }
 0x6ab   : > { %v1740_v23 = vmul.f32 %v3237_v40, %v1739_v43  ;;  %v1746_v34 = vmul.f32 %v3239_v45, %v1714_v62  ;;  %1985 = vmatmul.bf16.vlgmr.msrb.gmra.mxu1 %v1773_v9  ;;  %2004 = vmatmul.bf16.vlgmr.msra.gmra.mxu2 %v1773_v9  ;;  %vm1752_vm11 = vweird.f32 %v3239_v45 }
 0x6ac   : > { %2023 = vmatmul.bf16.vlgmr.msrb.gmra.mxu3 %v1773_v9  ;;  %2042 = vmatmul.bf16.vlgmr.msra.gmra.mxu0 %v1773_v9  ;;  %vm1753_vm13 = vmor %vm1751_vm12, %vm1752_vm11 }
 0x6ad   : > { %v1747_v14 = vmul.f32 %v3239_v45, %v1746_v34  ;;  %v1744_v50 = vsel %vm1743_vm10, %v3237_v40, %v1740_v23  ;;  %2460 = vmatpush.bf16.msra.mxu3 %v3093_v39 }
 0x6ae   : > { %v1757_v28 = vmul.f32 %v1744_v50, %v4040_v16  ;;  %v3106_v16 = vld [vmem:[%s4467_s12 + $0xf8] sm:$0xff]  ;;  %v3083_v50 = vld [vmem:[%s4467_s12 + $0x40] sm:$0xff] }
 0x6af   : > { %v1748_v52 = vmul.f32 0.5, %v1747_v14  ;;  %2474 = vmatpush.bf16.msrb.mxu0 %v3106_v16 }
 0x6b0   : > { %v1764_v54 = vmul.f32 %v3155_v38, %v1757_v28 }
 0x6b1   : > { %v1749_v53 = vsub.f32 1.5, %v1748_v52  ;;  %2461 = vmatpush.bf16.msra.mxu3 %v3092_v3  ;;  %v3091_v52 = vld [vmem:[%s4467_s12 + $0x80] sm:$0xff] }
 0x6b2   : > { %v1771_v59 = vadd.f32 %v3156_v7, %v1764_v54 }
 0x6b3   : > { %v1750_v29 = vmul.f32 %v3239_v45, %v1749_v53  ;;  %2475 = vmatpush.bf16.msrb.mxu0 %v3105_v57 }
 0x6b5   : > { %v1754_v60 = vsel %vm1753_vm13, %v3239_v45, %v1750_v29  ;;  %2462 = vmatpush.bf16.msra.mxu3 %v3091_v52 }
 0x6b6   : > { %v1758_v25 = vmul.f32 %v1754_v60, %v4046_v21  ;;  %v3081_v21 = vld [vmem:[%s4467_s12 + $0x30] sm:$0xff] }
 0x6b7   : > { %2418 = vmatpush.bf16.msra.mxu1 %v3081_v21  ;;  %2476 = vmatpush.bf16.msrb.mxu0 %v3104_v6 }
 0x6b8   : > { %v1765_v58 = vmul.f32 %v3155_v38, %v1758_v25  ;;  %v3085_v38 = vld [vmem:[%s4467_s12 + $0x50] sm:$0xff] }
 0x6b9   : > { %2441 = vmatpush.bf16.msrb.mxu2 %v3085_v38 }
 0x6ba   : > { %v1772_v51 = vadd.f32 %v3156_v7, %v1765_v58  ;;  %v4354_v7 = vperm.slane %v1807_v13, 1 }
 0x6bb   : > { %2419 = vmatpush.bf16.msra.mxu1 %v3080_v35  ;;  %2477 = vmatpush.bf16.msrb.mxu0 %v3103_v17 }
 0x6bc   : > { %v1774_v0 = vpack.c.bf16 %v1772_v51, %v1771_v59 }
 0x6bd   : > { %2442 = vmatpush.bf16.msrb.mxu2 %v3084_v42 }
 0x6be   : > { %1990 = vmatmul.bf16.gmra.mxu1 %v1774_v0  ;;  %2009 = vmatmul.bf16.gmra.mxu2 %v1774_v0 }
 0x6bf   : > { %2028 = vmatmul.bf16.gmra.mxu3 %v1774_v0  ;;  %2047 = vmatmul.bf16.gmra.mxu0 %v1774_v0 }
 0x6c0   : > { %2420 = vmatpush.bf16.msra.mxu1 %v3079_v11  ;;  %2478 = vmatpush.bf16.msrb.mxu0 %v3102_v19 }
 0x6c1   : > { %2443 = vmatpush.bf16.msrb.mxu2 %v3083_v50 }
 0x6c4   : > { %2421 = vmatpush.bf16.msra.mxu1 %v3078_v48  ;;  %2479 = vmatpush.bf16.msrb.mxu0 %v3101_v61 }
 0x6c8   : > { %2422 = vmatpush.bf16.msra.mxu1 %v3077_v27  ;;  %2480 = vmatpush.bf16.msrb.mxu0 %v3100_v5 }
 0x6cc   : > { %2423 = vmatpush.bf16.msra.mxu1 %v3076_v36  ;;  %2481 = vmatpush.bf16.msrb.mxu0 %v3099_v2 }
 0x6d0   : > { %2424 = vmatpush.bf16.msra.mxu1 %v3075_v15 }
 0x728   : > { %v1986_v37 = vpop.f32.mrf.mxu1 }
 0x729   : > { %v4342_v40 = vadd.f32 %v1986_v37, %v4325_v20  ;;  %v2043_v62 = vpop.f32.mrf.mxu0 }
 0x72a   : > { %v4345_v41 = vadd.f32 %v2043_v62, %v4327_v33 }
 0x72b   : > { %v2053_v22 = vmul.f32 -1.702, %v4342_v40 }
 0x72c   : > { %v2056_v10 = vmul.f32 -1.702, %v4345_v41 }
 0x72d   : > { %v2069_v12 = vmul.f32 1.442695, %v2053_v22 }
 0x72e   : > { %v2075_v43 = vmul.f32 1.442695, %v2056_v10  ;;  %v2005_v45 = vpop.f32.mrf.mxu2 }
 0x72f   : > { %3240 = vpow2.f32 %v2069_v12  ;;  %v4366_v9 = vadd.f32 %v2005_v45, %v4354_v7  ;;  %v2024_v23 = vpop.f32.mrf.mxu3 }
 0x730   : > { %v4369_v34 = vadd.f32 %v2024_v23, %v4357_v47  ;;  %v1988_v14 = vpop.f32.mrf.mxu1  ;;  %3242 = vpow2.f32 %v2075_v43 }
 0x731   : > { %v2054_v53 = vmul.f32 -1.702, %v4366_v9  ;;  %v4379_v28 = vadd.f32 %v1988_v14, %v4325_v20  ;;  %v2045_v29 = vpop.f32.mrf.mxu0 }
 0x732   : > { %v2055_v60 = vmul.f32 -1.702, %v4369_v34  ;;  %v4383_v25 = vadd.f32 %v2045_v29, %v4327_v33 }
 0x733   : > { %v2071_v54 = vmul.f32 1.442695, %v2054_v53  ;;  %v2057_v58 = vmul.f32 -1.702, %v4379_v28 }
 0x734   : > { %v2060_v59 = vmul.f32 -1.702, %v4383_v25  ;;  %v2073_v0 = vmul.f32 1.442695, %v2055_v60 }
 0x735   : > { %v3241_v51 = vpop.eup %3240  ;;  %3244 = vpow2.f32 %v2071_v54  ;;  %v2077_v1 = vmul.f32 1.442695, %v2057_v58 }
 0x736   : > { %v2083_v16 = vmul.f32 1.442695, %v2060_v59  ;;  %v2007_v21 = vpop.f32.mrf.mxu2  ;;  %v3243_v57 = vpop.eup %3242  ;;  %v2101_v35 = vadd.f32 1.0, %v3241_v51 }
 0x737   : > { %3246 = vpow2.f32 %v2077_v1  ;;  %v4388_v56 = vadd.f32 %v2007_v21, %v4354_v7  ;;  %v2026_v4 = vpop.f32.mrf.mxu3  ;;  %v2104_v8 = vadd.f32 1.0, %v3243_v57 }
 0x738   : > { %v4391_v6 = vadd.f32 %v2026_v4, %v4357_v47  ;;  %3248 = vpow2.f32 %v2073_v0 }
 0x739   : > { %v2058_v24 = vmul.f32 -1.702, %v4388_v56  ;;  %3250 = vpow2.f32 %v2083_v16 }
 0x73a   : > { %v2059_v11 = vmul.f32 -1.702, %v4391_v6  ;;  %3252 = vrcp.f32 %v2101_v35 }
 0x73b   : > { %v1991_v17 = vpop.f32.mrf.mxu1  ;;  %v3245_v31 = vpop.eup %3244  ;;  %v2079_v18 = vmul.f32 1.442695, %v2058_v24 }
 0x73c   : > { %v4396_v48 = vadd.f32 %v1991_v17, %v4325_v20  ;;  %v2048_v19 = vpop.f32.mrf.mxu0  ;;  %v2102_v63 = vadd.f32 1.0, %v3245_v31  ;;  %v2081_v27 = vmul.f32 1.442695, %v2059_v11 }
 0x73d   : > { %v4399_v26 = vadd.f32 %v2048_v19, %v4327_v33  ;;  %v3247_v13 = vpop.eup %3246  ;;  %3254 = vpow2.f32 %v2079_v18 }
 0x73e   : > { %v2061_v61 = vmul.f32 -1.702, %v4396_v48  ;;  %3256 = vrcp.f32 %v2104_v8  ;;  %v2105_v30 = vadd.f32 1.0, %v3247_v13  ;;  %v3249_v36 = vpop.eup %3248 }
 0x73f   : > { %v2064_v32 = vmul.f32 -1.702, %v4399_v26  ;;  %3258 = vrcp.f32 %v2102_v63  ;;  %v3251_v37 = vpop.eup %3250  ;;  %v2103_v12 = vadd.f32 1.0, %v3249_v36 }
 0x740   : > { %v2085_v5 = vmul.f32 1.442695, %v2061_v61  ;;  %3260 = vrcp.f32 %v2105_v30  ;;  %v2108_v62 = vadd.f32 1.0, %v3251_v37  ;;  %v3253_v22 = vpop.eup %3252 }
 0x741   : > { %v2091_v38 = vmul.f32 1.442695, %v2064_v32  ;;  %v2010_v39 = vpop.f32.mrf.mxu2  ;;  %3262 = vpow2.f32 %v2081_v27 }
 0x742   : > { %v4404_v15 = vadd.f32 %v2010_v39, %v4354_v7  ;;  %v2029_v2 = vpop.f32.mrf.mxu3  ;;  %3264 = vpow2.f32 %v2085_v5 }
 0x743   : > { %v4407_v10 = vadd.f32 %v2029_v2, %v4357_v47  ;;  %v1993_v42 = vpop.f32.mrf.mxu1  ;;  %v3255_v3 = vpop.eup %3254  ;;  %3266 = vrcp.f32 %v2108_v62 }
 0x744   : > { %v2062_v43 = vmul.f32 -1.702, %v4404_v15  ;;  %v4411_v45 = vadd.f32 %v1993_v42, %v4325_v20  ;;  %v2050_v23 = vpop.f32.mrf.mxu0  ;;  %v3257_v14 = vpop.eup %3256  ;;  %v2106_v50 = vadd.f32 1.0, %v3255_v3  ;;  %3268 = vpow2.f32 %v2091_v38 }
 0x745   : > { %v4414_v52 = vadd.f32 %v2050_v23, %v4327_v33  ;;  %v3259_v53 = vpop.eup %3258  ;;  %v2063_v60 = vmul.f32 -1.702, %v4407_v10  ;;  %v2133_v20 = vmul.f32 %v3253_v22, %v4342_v40  ;;  %v2136_v40 = vmul.f32 %v3257_v14, %v4345_v41 }
 0x746   : > { %v2087_v29 = vmul.f32 1.442695, %v2062_v43  ;;  %v2065_v54 = vmul.f32 -1.702, %v4411_v45  ;;  %v3261_v58 = vpop.eup %3260  ;;  %3270 = vrcp.f32 %v2106_v50  ;;  %v2134_v18 = vmul.f32 %v3259_v53, %v4366_v9 }
 0x747   : > { %v2068_v59 = vmul.f32 -1.702, %v4414_v52  ;;  %v3263_v51 = vpop.eup %3262  ;;  %3272 = vrcp.f32 %v2103_v12  ;;  %v2137_v0 = vmul.f32 %v3261_v58, %v4379_v28  ;;  %v2089_v24 = vmul.f32 1.442695, %v2063_v60 }
 0x748   : > { %v2093_v1 = vmul.f32 1.442695, %v2065_v54  ;;  %v3265_v16 = vpop.eup %3264  ;;  %v2107_v33 = vadd.f32 1.0, %v3263_v51  ;;  %3274 = vpow2.f32 %v2087_v29 }
 0x749   : > { %v2099_v21 = vmul.f32 1.442695, %v2068_v59  ;;  %v2012_v57 = vpop.f32.mrf.mxu2  ;;  %v3267_v4 = vpop.eup %3266  ;;  %v2149_v35 = vpack.c.bf16 %v2137_v0, %v2133_v20  ;;  %v2109_v27 = vadd.f32 1.0, %v3265_v16 }
 0x74a   : > { %3276 = vpow2.f32 %v2093_v1  ;;  %v4422_v8 = vadd.f32 %v2012_v57, %v4354_v7  ;;  %v2031_v11 = vpop.f32.mrf.mxu3  ;;  %v3269_v17 = vpop.eup %3268  ;;  %v2140_v31 = vmul.f32 %v3267_v4, %v4383_v25  ;;  %v3157_v4 = vld [vmem:[#allocation7] ss:$0 sm:$0xff] }
 0x74b   : > { %3278 = vrcp.f32 %v2107_v33  ;;  %v4427_v28 = vadd.f32 %v2031_v11, %v4357_v47  ;;  %2425 = vmatmul.bf16.vlgmr.msra.gmra.mxu1 %v2149_v35  ;;  %v2112_v30 = vadd.f32 1.0, %v3269_v17 }
 0x74c   : > { %v2066_v19 = vmul.f32 -1.702, %v4422_v8  ;;  %v3271_v63 = vpop.eup %3270  ;;  %v2152_v13 = vpack.c.bf16 %v2140_v31, %v2136_v40  ;;  %3280 = vpow2.f32 %v2099_v21 }
 0x74d   : > { %v2067_v7 = vmul.f32 -1.702, %v4427_v28  ;;  %v3273_v61 = vpop.eup %3272  ;;  %v2138_v41 = vmul.f32 %v3271_v63, %v4388_v56  ;;  %3282 = vpow2.f32 %v2089_v24 }
 0x74e   : > { %v2095_v25 = vmul.f32 1.442695, %v2066_v19  ;;  %v3275_v32 = vpop.eup %3274  ;;  %2482 = vmatmul.bf16.vlgmr.msrb.gmra.mxu0 %v2152_v13  ;;  %v2135_v38 = vmul.f32 %v3273_v61, %v4369_v34 }
 0x74f   : > { %v2150_v36 = vpack.c.bf16 %v2138_v41, %v2134_v18  ;;  %v2097_v9 = vmul.f32 1.442695, %v2067_v7  ;;  %v2110_v56 = vadd.f32 1.0, %v3275_v32 }
 0x750   : > { %v3277_v47 = vpop.eup %3276  ;;  %3284 = vpow2.f32 %v2095_v25 }
 0x751   : > { %v3279_v5 = vpop.eup %3278  ;;  %3286 = vrcp.f32 %v2109_v27  ;;  %v2113_v37 = vadd.f32 1.0, %v3277_v47  ;;  %2444 = vmatmul.bf16.vlgmr.msrb.gmra.mxu2 %v2150_v36 }
 0x752   : > { %v2139_v39 = vmul.f32 %v3279_v5, %v4391_v6  ;;  %3288 = vrcp.f32 %v2112_v30  ;;  %v3281_v62 = vpop.eup %3280 }
 0x753   : > { %3290 = vrcp.f32 %v2113_v37  ;;  %v3283_v2 = vpop.eup %3282  ;;  %v2116_v42 = vadd.f32 1.0, %v3281_v62 }
 0x754   : > { %v2151_v22 = vpack.c.bf16 %v2139_v39, %v2135_v38  ;;  %3292 = vpow2.f32 %v2097_v9  ;;  %v2111_v43 = vadd.f32 1.0, %v3283_v2 }
 0x755   : > { %3294 = vrcp.f32 %v2116_v42 }
 0x756   : > { %v3285_v3 = vpop.eup %3284  ;;  %2463 = vmatmul.bf16.vlgmr.msra.gmra.mxu3 %v2151_v22  ;;  %3296 = vrcp.f32 %v2110_v56 }
 0x757   : > { %v3287_v12 = vpop.eup %3286  ;;  %v2114_v23 = vadd.f32 1.0, %v3285_v3 }
 0x758   : > { %v3289_v14 = vpop.eup %3288  ;;  %v2141_v50 = vmul.f32 %v3287_v12, %v4396_v48 }
 0x759   : > { %v3291_v34 = vpop.eup %3290  ;;  %3298 = vrcp.f32 %v2114_v23  ;;  %v2144_v59 = vmul.f32 %v3289_v14, %v4399_v26 }
 0x75a   : > { %v3293_v6 = vpop.eup %3292  ;;  %v2145_v53 = vmul.f32 %v3291_v34, %v4411_v45  ;;  %3300 = vrcp.f32 %v2111_v43 }
 0x75b   : > { %v2115_v29 = vadd.f32 1.0, %v3293_v6  ;;  %v3295_v60 = vpop.eup %3294 }
 0x75c   : > { %v2153_v54 = vpack.c.bf16 %v2145_v53, %v2141_v50  ;;  %v3297_v58 = vpop.eup %3296  ;;  %v2148_v51 = vmul.f32 %v3295_v60, %v4414_v52 }
 0x75d   : > { %3302 = vrcp.f32 %v2115_v29  ;;  %v2142_v1 = vmul.f32 %v3297_v58, %v4404_v15 }
 0x75e   : > { %2430 = vmatmul.bf16.gmra.mxu1 %v2153_v54  ;;  %v2156_v0 = vpack.c.bf16 %v2148_v51, %v2144_v59 }
 0x75f   : > { %v3299_v20 = vpop.eup %3298 }
 0x760   : > { %v2146_v16 = vmul.f32 %v3299_v20, %v4422_v8  ;;  %v3301_v48 = vpop.eup %3300  ;;  %2487 = vmatmul.bf16.gmra.mxu0 %v2156_v0 }
 0x761   : > { %v2143_v21 = vmul.f32 %v3301_v48, %v4407_v10 }
 0x762   : > { %v2154_v45 = vpack.c.bf16 %v2146_v16, %v2142_v1 }
 0x763   : > { %v3303_v33 = vpop.eup %3302 }
 0x764   : > { %v2147_v57 = vmul.f32 %v3303_v33, %v4427_v28  ;;  %2449 = vmatmul.bf16.gmra.mxu2 %v2154_v45 }
 0x766   : > { %v2155_v26 = vpack.c.bf16 %v2147_v57, %v2143_v21 }
 0x768   : > { %2468 = vmatmul.bf16.gmra.mxu3 %v2155_v26 }
 0x7c8   : > { %v2426_v52 = vpop.f32.mrf.mxu1 }
 0x7c9   : > { %v2427_v35 = vadd.f32 %v3157_v4, %v2426_v52 }
 0x7cb   : > { %v2483_v15 = vpop.f32.mrf.mxu0 }
 0x7d0   : > { %v2428_v17 = vpop.f32.mrf.mxu1 }
 0x7d1   : > { %v2429_v31 = vadd.f32 %v3157_v4, %v2428_v17 }
 0x7d3   : > { %v2485_v27 = vpop.f32.mrf.mxu0 }
 0x7d4   : > { %v2445_v24 = vpop.f32.mrf.mxu2 }
 0x7d5   : > { %v2446_v11 = vadd.f32 %v2445_v24, %v2427_v35 }
 0x7d9   : > { %v2464_v8 = vpop.f32.mrf.mxu3 }
 0x7da   : > { %v2465_v40 = vadd.f32 %v2464_v8, %v2446_v11 }
 0x7db   : > { %v2431_v13 = vpop.f32.mrf.mxu1 }
 0x7dc   : > { %v2484_v18 = vadd.f32 %v2483_v15, %v2465_v40  ;;  %v2447_v10 = vpop.f32.mrf.mxu2  ;;  %v2432_v30 = vadd.f32 %v3157_v4, %v2431_v13 }
 0x7dd   : > { %v2448_v19 = vadd.f32 %v2447_v10, %v2429_v31  ;;  %v2488_v47 = vpop.f32.mrf.mxu0 }
 0x7de   : > { %v2493_v28 = vadd.f32 %v2484_v18, %v4011_v44 }
 0x7e0   : > { %2497 = vst [vmem:[%s520_s15] sm:$0xff] %v2493_v28 }
 0x7e1   : > { %v2466_v63 = vpop.f32.mrf.mxu3 }
 0x7e2   : > { %v2467_v7 = vadd.f32 %v2466_v63, %v2448_v19 }
 0x7e3   : > { %v2433_v36 = vpop.f32.mrf.mxu1 }
 0x7e4   : > { %v2486_v61 = vadd.f32 %v2485_v27, %v2467_v7  ;;  %v2434_v37 = vadd.f32 %v3157_v4, %v2433_v36 }
 0x7e5   : > { %v2490_v22 = vpop.f32.mrf.mxu0 }
 0x7e6   : > { %v2494_v41 = vadd.f32 %v2486_v61, %v4015_v49 }
 0x7e7   : > { %v2450_v25 = vpop.f32.mrf.mxu2 }
 0x7e8   : > { %2498 = vst [vmem:[%s520_s15 + $0x8] sm:$0xff] %v2494_v41  ;;  %v2451_v32 = vadd.f32 %v2450_v25, %v2432_v30 }
 0x7eb   : > { %v2469_v9 = vpop.f32.mrf.mxu3 }
 0x7ec   : > { %v2470_v5 = vadd.f32 %v2469_v9, %v2451_v32 }
 0x7ee   : > { %v2489_v38 = vadd.f32 %v2488_v47, %v2470_v5 }
 0x7ef   : > { %v2452_v44 = vpop.f32.mrf.mxu2 }
 0x7f0   : > { %v2495_v39 = vadd.f32 %v2489_v38, %v4019_v55  ;;  %v2453_v62 = vadd.f32 %v2452_v44, %v2434_v37 }
 0x7f2   : > { %2499 = vst [vmem:[%s520_s15 + $0x10] sm:$0xff] %v2495_v39 }
 0x7f3   : > { %v2471_v56 = vpop.f32.mrf.mxu3 }
 0x7f4   : > { %v2472_v2 = vadd.f32 %v2471_v56, %v2453_v62 }
 0x7f6   : > { %v2491_v42 = vadd.f32 %v2490_v22, %v2472_v2 }
 0x7f8   : > { %v2496_v49 = vadd.f32 %v2491_v42, %v4023_v46 }
 0x7fa   : > { %2500 = vst [vmem:[%s520_s15 + $0x18] sm:$0xff] %v2496_v49 }
 0x7fb PF: > { %s26_s29 = sadd.s32 1, %s3412_s29  }
 0x7fc   : > { %p23_p7 = scmp.ge.s32.totalorder %s26_s29, 4  }
 0x7fe   :  { %25 = sbr.rel (!%p23_p7) target bundleno = 4 (0x4), region = 119 }
 0x803   :  { %2525 = vsyncpa [#allocation4], 1 }
 0x804   :  { %2527 = vsyncpa [#allocation4 + $0x1], 1 }
 0x805   :  { %2528 = vsyncpa [#allocation6], 1 }

</bundles_post_ra>
